<compile_context>
chip_gen: v7x
topology: tpu7x:2x2x1
jax: 0.10.0
libtpu: 0.0.40
codegen_flags: <defaults>
</compile_context>

<pallas_src>
import functools

import jax
import jax.numpy as jnp
import numpy as np
from jax import lax
from jax.experimental import pallas as pl
from jax.experimental.pallas import tpu as pltpu


def _mm(a3, w, b=None, *, mm_dtype):
    """(BB, S, K) @ (K, N) flattened to one wide MXU push, f32 accumulation."""
    bb, s, k = a3.shape
    y = jnp.dot(a3.reshape(bb * s, k).astype(mm_dtype), w,
                preferred_element_type=jnp.float32)
    if b is not None:
        y = y + b
    return y.reshape(bb, s, -1)


def _split_layers_kernel(
    x_att_ref, x_gru_ref, x_conv_ref,
    w_qkv_ref, b_qkv_ref, w_proj_ref, b_proj_ref,
    gru_wih_ref, gru_whh_ref, gru_bih_ref, gru_bhn_ref,
    conv_w0_ref, conv_w1_ref, conv_w2_ref, conv_b_ref,
    out_ref,
    *, d_att, d_gru, d_conv, dim_qk, seq_len, mm_dtype,
):
    bb = x_att_ref.shape[0]

    # ---------------- chunk 0: learnable attention head + output projection ----
    x_att = x_att_ref[...]                                       # (BB, S, C) bf16
    qkv = _mm(x_att, w_qkv_ref[...], b_qkv_ref[...], mm_dtype=mm_dtype)
    # TODO(synk): at production widths make dim_qk a multiple of 128 so these
    # splits are lane-aligned, and tile the scores flash-style over KV blocks.
    q = qkv[:, :, :dim_qk]
    k = qkv[:, :, dim_qk:2 * dim_qk]
    v = qkv[:, :, 2 * dim_qk:]

    inv_scale = 1.0 / float(dim_qk) ** 0.5                       # Python constant
    scores = jnp.einsum("bsd,btd->bst", q.astype(mm_dtype), k.astype(mm_dtype),
                        preferred_element_type=jnp.float32) * inv_scale
    scores = scores - jnp.max(scores, axis=-1, keepdims=True)
    e = jnp.exp(scores)
    p = e * pl.reciprocal(jnp.sum(e, axis=-1, keepdims=True), approx=True)
    # head_scale is folded into w_proj host-side: (s*(PV))@W == (PV)@(s*W).
    head = jnp.einsum("bst,btd->bsd", p.astype(mm_dtype), v.astype(mm_dtype),
                      preferred_element_type=jnp.float32)
    out_att = _mm(head, w_proj_ref[...], b_proj_ref[...], mm_dtype=mm_dtype)
    out_ref[:, :, 0:d_att] = out_att.astype(out_ref.dtype)       # direct lane-slice store

    # ---------------- chunk 2: Conv1d(k=3, padding='same'), channels-last ------
    xc = x_conv_ref[...]                                         # (BB, S, C) f32
    row = lax.broadcasted_iota(jnp.int32, xc.shape, 1)
    # Sublane shifts on the XLU + boundary-row mask (no (BB,S,3C) lane concat).
    x_prev = jnp.where(row == 0, 0.0, pltpu.roll(xc, shift=1, axis=1))
    x_next = jnp.where(row == seq_len - 1, 0.0,
                       pltpu.roll(xc, shift=seq_len - 1, axis=1))
    out_conv = (_mm(x_prev, conv_w0_ref[...], mm_dtype=mm_dtype)
                + _mm(xc, conv_w1_ref[...], mm_dtype=mm_dtype)
                + _mm(x_next, conv_w2_ref[...], conv_b_ref[...], mm_dtype=mm_dtype))
    out_ref[:, :, d_att + d_gru:d_att + d_gru + d_conv] = out_conv.astype(out_ref.dtype)

    # ---------------- chunk 1: GRU (gate order r|z|n) ---------------------------
    H = d_gru
    # All input gates for every step in one fused matmul (bias already includes
    # the r/z hidden biases, folded host-side).
    gates_x = _mm(x_gru_ref[...], gru_wih_ref[...], gru_bih_ref[...],
                  mm_dtype=mm_dtype)                             # (BB, S, 3H) f32
    gx_r = gates_x[:, :, :H]
    gx_z = gates_x[:, :, H:2 * H]
    gx_n = gates_x[:, :, 2 * H:]
    whh = gru_whh_ref[...]                                       # (H, 3H) bf16
    # Hoisted broadcast of the n-gate hidden bias (JAX does not CSE broadcasts).
    bhn = jnp.zeros((bb, H), jnp.float32) + gru_bhn_ref[...]
    h = jnp.zeros((bb, H), jnp.float32)                          # carry stays f32
    # seq_len is tiny & static here -> unrolled recurrence with per-step stores.
    # TODO(synk): at production S use lax.fori_loop(unroll=4..8) with pl.ds(t,1)
    # stores to bound live ranges.
    for t in range(seq_len):
        gh = jnp.dot(h.astype(mm_dtype), whh, preferred_element_type=jnp.float32)
        r = jax.nn.sigmoid(gx_r[:, t, :] + gh[:, :H])
        z = jax.nn.sigmoid(gx_z[:, t, :] + gh[:, H:2 * H])
        n = jnp.tanh(gx_n[:, t, :] + r * (gh[:, 2 * H:] + bhn))
        h = (1.0 - z) * n + z * h
        out_ref[:, t:t + 1, d_att:d_att + d_gru] = h[:, None, :].astype(out_ref.dtype)


def embedding_split_layers(x, params, *, dim_qk, batch_block=None,
                           matmul_dtype=jnp.bfloat16):
    B, S, D = x.shape
    d_att = params["wq"].shape[0]
    d_gru = params["gru_wih"].shape[0]
    d_conv = params["conv_w1"].shape[0]
    assert d_att + d_gru + d_conv == D
    H = d_gru
    f32 = jnp.float32

    # ---- chip-aware defaults (v7x: 2 TensorCores, 64 MiB VMEM per core) -------
    try:
        kind = jax.devices()[0].device_kind.lower()
    except Exception:  # pragma: no cover
        kind = ""
    two_tc = "v7" in kind
    if batch_block is None:
        batch_block = B // 2 if (two_tc and B >= 2 and B % 2 == 0) else B
    assert B % batch_block == 0
    grid = (B // batch_block,)
    if two_tc:
        vmem_limit = 48 * 1024 * 1024      # leave headroom under 64 MiB physical
    elif ("v5" in kind) or ("v6" in kind):
        vmem_limit = 96 * 1024 * 1024      # maximize block sizes on 128 MiB parts
    else:
        vmem_limit = 32 * 1024 * 1024

    # ---- chunk split at the XLA boundary (each chunk starts at lane 0) --------
    x_att = x[..., :d_att].astype(matmul_dtype)              # matmul-only use
    x_gru = x[..., d_att:d_att + d_gru].astype(matmul_dtype)  # matmul-only use
    x_conv = x[..., d_att + d_gru:]                            # masked in-kernel, keep f32

    # ---- host-side weight fusion / folding -------------------------------------
    w_qkv = jnp.concatenate([params["wq"], params["wk"], params["wv"]],
                            axis=1).astype(matmul_dtype)
    b_qkv = jnp.concatenate([params["bq"], params["bk"], params["bv"]],
                            axis=1).astype(f32)
    w_proj = (params["head_scale"][0] * params["wproj"]).astype(matmul_dtype)
    b_proj = params["bproj"].astype(f32)
    bhh = params["gru_bhh"]
    # Fold r/z hidden biases into the input bias; only the n-gate hidden bias
    # must stay inside the recurrence (it is multiplied by r).
    gru_bih = (params["gru_bih"]
               + jnp.concatenate([bhh[:, :2 * H], jnp.zeros_like(bhh[:, 2 * H:])],
                                 axis=1)).astype(f32)
    gru_bhn = bhh[:, 2 * H:].astype(f32)
    gru_wih = params["gru_wih"].astype(matmul_dtype)
    gru_whh = params["gru_whh"].astype(matmul_dtype)
    conv_w0 = params["conv_w0"].astype(matmul_dtype)
    conv_w1 = params["conv_w1"].astype(matmul_dtype)
    conv_w2 = params["conv_w2"].astype(matmul_dtype)
    conv_b = params["conv_b"].astype(f32)

    weights = [w_qkv, b_qkv, w_proj, b_proj,
               gru_wih, gru_whh, gru_bih, gru_bhn,
               conv_w0, conv_w1, conv_w2, conv_b]

    kernel = functools.partial(
        _split_layers_kernel, d_att=d_att, d_gru=d_gru, d_conv=d_conv,
        dim_qk=dim_qk, seq_len=S, mm_dtype=matmul_dtype)

    def chunk_spec(c):
        return pl.BlockSpec((batch_block, S, c), lambda b: (b, 0, 0))

    out_spec = pl.BlockSpec((batch_block, S, D), lambda b: (b, 0, 0))

    def build(weight_mode):
        def wspec(arr):
            idx = lambda b, n=arr.ndim: (0,) * n      # constant across the grid
            if weight_mode is None:
                return pl.BlockSpec(arr.shape, idx)
            return pl.BlockSpec(arr.shape, idx, pipeline_mode=weight_mode)
        in_specs = ([chunk_spec(d_att), chunk_spec(d_gru), chunk_spec(d_conv)]
                    + [wspec(w) for w in weights])
        return pl.pallas_call(
            kernel,
            out_shape=jax.ShapeDtypeStruct((B, S, D), x.dtype),
            grid=grid,
            in_specs=in_specs,
            out_specs=out_spec,
            compiler_params=pltpu.CompilerParams(
                dimension_semantics=("parallel",),
                vmem_limit_bytes=vmem_limit,
            ),
        )

    args = (x_att, x_gru, x_conv, *weights)
    try:
        # Constant index_map across the grid -> single-buffer the weights.
        out = build(pl.Buffered(1))(*args)
        return jax.block_until_ready(out)
    except Exception:
        # Fallback: default double-buffered constant blocks (known-good path) if
        # this jax build rejects pipeline_mode / Buffered(1) on pallas_call specs.
        out = build(None)(*args)
        return jax.block_until_ready(out)


def reference_forward(x, p, *, dim_qk):
    """Pure-JAX f32 reference mirroring the PyTorch module (eval mode)."""
    d_att = p["wq"].shape[0]
    d_gru = p["gru_wih"].shape[0]
    x_att = x[..., :d_att]
    x_gru = x[..., d_att:d_att + d_gru]
    x_conv = x[..., d_att + d_gru:]

    # attention chunk: KQVProduct + MHAMixer.project
    q = x_att @ p["wq"] + p["bq"]
    k = x_att @ p["wk"] + p["bk"]
    v = x_att @ p["wv"] + p["bv"]
    att = jnp.einsum("bsd,btd->bst", q, k) / (dim_qk ** 0.5)
    att = jax.nn.softmax(att, axis=-1)
    head = p["head_scale"][0] * jnp.einsum("bst,btd->bsd", att, v)
    out_att = head @ p["wproj"] + p["bproj"]

    # GRU chunk (all hidden states, h0 = 0, gate order r|z|n)
    H = d_gru

    def step(h, x_t):
        gx = x_t @ p["gru_wih"] + p["gru_bih"]
        gh = h @ p["gru_whh"] + p["gru_bhh"]
        r = jax.nn.sigmoid(gx[:, :H] + gh[:, :H])
        z = jax.nn.sigmoid(gx[:, H:2 * H] + gh[:, H:2 * H])
        n = jnp.tanh(gx[:, 2 * H:] + r * gh[:, 2 * H:])
        h_new = (1.0 - z) * n + z * h
        return h_new, h_new

    h0 = jnp.zeros((x.shape[0], H), x.dtype)
    _, hs = jax.lax.scan(step, h0, jnp.swapaxes(x_gru, 0, 1))
    out_gru = jnp.swapaxes(hs, 0, 1)

    # conv chunk: Conv1d(k=3, padding='same'), channels-last
    xp = jnp.pad(x_conv, ((0, 0), (1, 1), (0, 0)))
    out_conv = (jnp.einsum("bsc,cd->bsd", xp[:, :-2], p["conv_w0"])
                + jnp.einsum("bsc,cd->bsd", xp[:, 1:-1], p["conv_w1"])
                + jnp.einsum("bsc,cd->bsd", xp[:, 2:], p["conv_w2"])
                + p["conv_b"])

    return jnp.concatenate([out_att, out_gru, out_conv], axis=-1)


def make_params(key, dim_chunk, dim_qk):
    ks = jax.random.split(key, 16)

    def u(k, fan_in, shape):
        lim = 1.0 / np.sqrt(fan_in)
        return jax.random.uniform(k, shape, jnp.float32, -lim, lim)

    C = dim_chunk
    return {
        # attention chunk: KQVProduct (weights stored as (in, out)) + projection
        "wq": u(ks[0], C, (C, dim_qk)), "bq": u(ks[1], C, (1, dim_qk)),
        "wk": u(ks[2], C, (C, dim_qk)), "bk": u(ks[3], C, (1, dim_qk)),
        "wv": u(ks[4], C, (C, dim_qk)), "bv": u(ks[5], C, (1, dim_qk)),
        "head_scale": jnp.full((1,), 1.25, jnp.float32),
        "wproj": u(ks[6], dim_qk, (dim_qk, C)),
        "bproj": u(ks[7], dim_qk, (1, C)),
        # GRU chunk (gate order r|z|n, weights stored as (in, 3*hidden))
        "gru_wih": u(ks[8], C, (C, 3 * C)),
        "gru_whh": u(ks[9], C, (C, 3 * C)),
        "gru_bih": u(ks[10], C, (1, 3 * C)),
        "gru_bhh": u(ks[11], C, (1, 3 * C)),
        # conv chunk: tap k stored as (in, out) == torch weight[:, :, k].T
        "conv_w0": u(ks[12], 3 * C, (C, C)),
        "conv_w1": u(ks[13], 3 * C, (C, C)),
        "conv_w2": u(ks[14], 3 * C, (C, C)),
        "conv_b": u(ks[15], 3 * C, (1, C)),
    }


if __name__ == "__main__":
    B, S = 2, 8
    dim_chunk, dim_qk = 16, 16
    dim_in = 3 * dim_chunk   # 48 -> torch.chunk gives 3 equal 16-wide slices

    key = jax.random.PRNGKey(0)
    k_x, k_p = jax.random.split(key)
    x = jax.random.normal(k_x, (B, S, dim_in), jnp.float32)
    params = make_params(k_p, dim_chunk, dim_qk)

    out = jax.block_until_ready(embedding_split_layers(x, params, dim_qk=dim_qk))
    ref = jax.block_until_ready(reference_forward(x, params, dim_qk=dim_qk))

    # bf16 MXU operands (f32 accumulation) + approx softmax reciprocal shift
    # numerics at the ~1e-2 level vs the f32 reference, hence the tolerance.
    np.testing.assert_allclose(np.asarray(out), np.asarray(ref),
                               rtol=4e-2, atol=4e-2)
    print("KERNEL_OK")
</pallas_src>

<mosaic_0001>
module attributes {stable_mosaic.version = 11 : i64} {
  func.func @_split_layers_kernel(%arg0: i32, %arg1: memref<2x8x16xbf16, #tpu.memory_space<vmem>>, %arg2: memref<2x8x16xbf16, #tpu.memory_space<vmem>>, %arg3: memref<2x8x16xf32, #tpu.memory_space<vmem>>, %arg4: memref<16x48xbf16, #tpu.memory_space<vmem>>, %arg5: memref<1x48xf32, #tpu.memory_space<vmem>>, %arg6: memref<16x16xbf16, #tpu.memory_space<vmem>>, %arg7: memref<1x16xf32, #tpu.memory_space<vmem>>, %arg8: memref<16x48xbf16, #tpu.memory_space<vmem>>, %arg9: memref<16x48xbf16, #tpu.memory_space<vmem>>, %arg10: memref<1x48xf32, #tpu.memory_space<vmem>>, %arg11: memref<1x16xf32, #tpu.memory_space<vmem>>, %arg12: memref<16x16xbf16, #tpu.memory_space<vmem>>, %arg13: memref<16x16xbf16, #tpu.memory_space<vmem>>, %arg14: memref<16x16xbf16, #tpu.memory_space<vmem>>, %arg15: memref<1x16xf32, #tpu.memory_space<vmem>>, %arg16: memref<2x8x48xf32, #tpu.memory_space<vmem>>) attributes {dimension_semantics = [#tpu.dimension_semantics<parallel>], iteration_bounds = array<i64: 1>, scalar_prefetch = 0 : i64, scratch_operands = 0 : i64, tpu.core_type = #tpu.core_type<tc>, window_params = [{transform_indices = @transform_0, window_bounds = array<i64: 2, 8, 16>}, {transform_indices = @transform_1, window_bounds = array<i64: 2, 8, 16>}, {transform_indices = @transform_2, window_bounds = array<i64: 2, 8, 16>}, {pipeline_mode = #tpu.pipeline_mode<synchronous>, transform_indices = @transform_3, window_bounds = array<i64: 16, 48>}, {pipeline_mode = #tpu.pipeline_mode<synchronous>, transform_indices = @transform_4, window_bounds = array<i64: 1, 48>}, {pipeline_mode = #tpu.pipeline_mode<synchronous>, transform_indices = @transform_5, window_bounds = array<i64: 16, 16>}, {pipeline_mode = #tpu.pipeline_mode<synchronous>, transform_indices = @transform_6, window_bounds = array<i64: 1, 16>}, {pipeline_mode = #tpu.pipeline_mode<synchronous>, transform_indices = @transform_7, window_bounds = array<i64: 16, 48>}, {pipeline_mode = #tpu.pipeline_mode<synchronous>, transform_indices = @transform_8, window_bounds = array<i64: 16, 48>}, {pipeline_mode = #tpu.pipeline_mode<synchronous>, transform_indices = @transform_9, window_bounds = array<i64: 1, 48>}, {pipeline_mode = #tpu.pipeline_mode<synchronous>, transform_indices = @transform_10, window_bounds = array<i64: 1, 16>}, {pipeline_mode = #tpu.pipeline_mode<synchronous>, transform_indices = @transform_11, window_bounds = array<i64: 16, 16>}, {pipeline_mode = #tpu.pipeline_mode<synchronous>, transform_indices = @transform_12, window_bounds = array<i64: 16, 16>}, {pipeline_mode = #tpu.pipeline_mode<synchronous>, transform_indices = @transform_13, window_bounds = array<i64: 16, 16>}, {pipeline_mode = #tpu.pipeline_mode<synchronous>, transform_indices = @transform_14, window_bounds = array<i64: 1, 16>}, {transform_indices = @transform_15, window_bounds = array<i64: 2, 8, 48>}]} {
    %c0 = arith.constant 0 : index
    %c0_0 = arith.constant 0 : index
    %c0_1 = arith.constant 0 : index
    %0 = vector.load %arg1[%c0, %c0_0, %c0_1] : memref<2x8x16xbf16, #tpu.memory_space<vmem>>, vector<2x8x16xbf16>
    %c0_2 = arith.constant 0 : index
    %c0_3 = arith.constant 0 : index
    %1 = vector.load %arg4[%c0_2, %c0_3] : memref<16x48xbf16, #tpu.memory_space<vmem>>, vector<16x48xbf16>
    %c0_4 = arith.constant 0 : index
    %c0_5 = arith.constant 0 : index
    %2 = vector.load %arg5[%c0_4, %c0_5] : memref<1x48xf32, #tpu.memory_space<vmem>>, vector<1x48xf32>
    %3 = vector.shape_cast %0 : vector<2x8x16xbf16> to vector<16x16xbf16>
    %cst = arith.constant dense<0.000000e+00> : vector<16x48xf32>
    %4 = tpu.matmul %3, %1, %cst {dimension_numbers = #tpu.dot_dimension_numbers<[1], [0], [0], [1], [0, 0, 1, 1], [], []>} : vector<16x16xbf16>, vector<16x48xbf16>, vector<16x48xf32> -> vector<16x48xf32>
    %5 = vector.broadcast %2 : vector<1x48xf32> to vector<16x48xf32>
    %6 = arith.addf %4, %5 : vector<16x48xf32>
    %7 = vector.shape_cast %6 : vector<16x48xf32> to vector<2x8x48xf32>
    %8 = vector.extract_strided_slice %7 {offsets = [0, 0, 0], sizes = [2, 8, 16], strides = [1, 1, 1]} : vector<2x8x48xf32> to vector<2x8x16xf32>
    %9 = vector.extract_strided_slice %7 {offsets = [0, 0, 16], sizes = [2, 8, 16], strides = [1, 1, 1]} : vector<2x8x48xf32> to vector<2x8x16xf32>
    %10 = vector.extract_strided_slice %7 {offsets = [0, 0, 32], sizes = [2, 8, 16], strides = [1, 1, 1]} : vector<2x8x48xf32> to vector<2x8x16xf32>
    %11 = arith.truncf %8 : vector<2x8x16xf32> to vector<2x8x16xbf16>
    %12 = arith.truncf %9 : vector<2x8x16xf32> to vector<2x8x16xbf16>
    "tpu.trace_start"() <{level = 10 : i32, message = "bsd,btd->bst"}> : () -> ()
    %cst_6 = arith.constant dense<0.000000e+00> : vector<2x8x8xf32>
    %13 = tpu.matmul %11, %12, %cst_6 {dimension_numbers = #tpu.dot_dimension_numbers<[2], [2], [1], [1], [0, 0, 0, 1, 1, 1], [0], [0]>} : vector<2x8x16xbf16>, vector<2x8x16xbf16>, vector<2x8x8xf32> -> vector<2x8x8xf32>
    "tpu.trace_stop"() : () -> ()
    %cst_7 = arith.constant 2.500000e-01 : f32
    %14 = vector.broadcast %cst_7 : f32 to vector<2x8x8xf32>
    %15 = arith.mulf %13, %14 : vector<2x8x8xf32>
    %cst_8 = arith.constant dense<0xFF800000> : vector<2x8xf32>
    %16 = vector.multi_reduction <maximumf>, %15, %cst_8 [2] : vector<2x8x8xf32> to vector<2x8xf32>
    %17 = vector.shape_cast %16 : vector<2x8xf32> to vector<2x8x1xf32>
    %18 = vector.broadcast %17 : vector<2x8x1xf32> to vector<2x8x8xf32>
    %19 = arith.subf %15, %18 : vector<2x8x8xf32>
    %20 = math.exp %19 : vector<2x8x8xf32>
    %cst_9 = arith.constant dense<0.000000e+00> : vector<2x8xf32>
    %21 = vector.multi_reduction <add>, %20, %cst_9 [2] : vector<2x8x8xf32> to vector<2x8xf32>
    %22 = vector.shape_cast %21 : vector<2x8xf32> to vector<2x8x1xf32>
    %23 = tpu.reciprocal %22 {approx = true} : vector<2x8x1xf32> -> vector<2x8x1xf32>
    %24 = vector.broadcast %23 : vector<2x8x1xf32> to vector<2x8x8xf32>
    %25 = arith.mulf %20, %24 : vector<2x8x8xf32>
    %26 = arith.truncf %25 : vector<2x8x8xf32> to vector<2x8x8xbf16>
    %27 = arith.truncf %10 : vector<2x8x16xf32> to vector<2x8x16xbf16>
    "tpu.trace_start"() <{level = 10 : i32, message = "bst,btd->bsd"}> : () -> ()
    %cst_10 = arith.constant dense<0.000000e+00> : vector<2x8x16xf32>
    %28 = tpu.matmul %26, %27, %cst_10 {dimension_numbers = #tpu.dot_dimension_numbers<[2], [1], [1], [2], [0, 0, 0, 1, 1, 2], [0], [0]>} : vector<2x8x8xbf16>, vector<2x8x16xbf16>, vector<2x8x16xf32> -> vector<2x8x16xf32>
    "tpu.trace_stop"() : () -> ()
    %c0_11 = arith.constant 0 : index
    %c0_12 = arith.constant 0 : index
    %29 = vector.load %arg6[%c0_11, %c0_12] : memref<16x16xbf16, #tpu.memory_space<vmem>>, vector<16x16xbf16>
    %c0_13 = arith.constant 0 : index
    %c0_14 = arith.constant 0 : index
    %30 = vector.load %arg7[%c0_13, %c0_14] : memref<1x16xf32, #tpu.memory_space<vmem>>, vector<1x16xf32>
    %31 = vector.shape_cast %28 : vector<2x8x16xf32> to vector<16x16xf32>
    %32 = arith.truncf %31 : vector<16x16xf32> to vector<16x16xbf16>
    %cst_15 = arith.constant dense<0.000000e+00> : vector<16x16xf32>
    %33 = tpu.matmul %32, %29, %cst_15 {dimension_numbers = #tpu.dot_dimension_numbers<[1], [0], [0], [1], [0, 0, 1, 1], [], []>} : vector<16x16xbf16>, vector<16x16xbf16>, vector<16x16xf32> -> vector<16x16xf32>
    %34 = vector.broadcast %30 : vector<1x16xf32> to vector<16x16xf32>
    %35 = arith.addf %33, %34 : vector<16x16xf32>
    %36 = vector.shape_cast %35 : vector<16x16xf32> to vector<2x8x16xf32>
    %c0_16 = arith.constant 0 : index
    %c0_17 = arith.constant 0 : index
    %c0_18 = arith.constant 0 : index
    %37 = vector.load %arg16[%c0_16, %c0_17, %c0_18] : memref<2x8x48xf32, #tpu.memory_space<vmem>>, vector<2x8x16xf32>
    tpu.vector_store %arg16[%c0_16, %c0_17, %c0_18], %36 {strides = array<i32>} : memref<2x8x48xf32, #tpu.memory_space<vmem>>, vector<2x8x16xf32>,
    %c0_19 = arith.constant 0 : index
    %c0_20 = arith.constant 0 : index
    %c0_21 = arith.constant 0 : index
    %38 = vector.load %arg3[%c0_19, %c0_20, %c0_21] : memref<2x8x16xf32, #tpu.memory_space<vmem>>, vector<2x8x16xf32>
    %39 = tpu.iota {dimensions = array<i32: 1>} : vector<2x8x16xi32>
    %c0_i32 = arith.constant 0 : i32
    %40 = vector.broadcast %c0_i32 : i32 to vector<2x8x16xi32>
    %41 = arith.cmpi eq, %39, %40 : vector<2x8x16xi32>
    %c1_i32 = arith.constant 1 : i32
    %42 = tpu.dynamic_rotate %38 by %c1_i32 dim 1 : vector<2x8x16xf32>, i32 -> vector<2x8x16xf32>
    %cst_22 = arith.constant 0.000000e+00 : f32
    %43 = vector.broadcast %cst_22 : f32 to vector<2x8x16xf32>
    %44 = arith.select %41, %43, %42 : vector<2x8x16xi1>, vector<2x8x16xf32>
    %c7_i32 = arith.constant 7 : i32
    %45 = vector.broadcast %c7_i32 : i32 to vector<2x8x16xi32>
    %46 = arith.cmpi eq, %39, %45 : vector<2x8x16xi32>
    %c7_i32_23 = arith.constant 7 : i32
    %47 = tpu.dynamic_rotate %38 by %c7_i32_23 dim 1 : vector<2x8x16xf32>, i32 -> vector<2x8x16xf32>
    %cst_24 = arith.constant 0.000000e+00 : f32
    %48 = vector.broadcast %cst_24 : f32 to vector<2x8x16xf32>
    %49 = arith.select %46, %48, %47 : vector<2x8x16xi1>, vector<2x8x16xf32>
    %c0_25 = arith.constant 0 : index
    %c0_26 = arith.constant 0 : index
    %50 = vector.load %arg12[%c0_25, %c0_26] : memref<16x16xbf16, #tpu.memory_space<vmem>>, vector<16x16xbf16>
    %51 = vector.shape_cast %44 : vector<2x8x16xf32> to vector<16x16xf32>
    %52 = arith.truncf %51 : vector<16x16xf32> to vector<16x16xbf16>
    %cst_27 = arith.constant dense<0.000000e+00> : vector<16x16xf32>
    %53 = tpu.matmul %52, %50, %cst_27 {dimension_numbers = #tpu.dot_dimension_numbers<[1], [0], [0], [1], [0, 0, 1, 1], [], []>} : vector<16x16xbf16>, vector<16x16xbf16>, vector<16x16xf32> -> vector<16x16xf32>
    %54 = vector.shape_cast %53 : vector<16x16xf32> to vector<2x8x16xf32>
    %c0_28 = arith.constant 0 : index
    %c0_29 = arith.constant 0 : index
    %55 = vector.load %arg13[%c0_28, %c0_29] : memref<16x16xbf16, #tpu.memory_space<vmem>>, vector<16x16xbf16>
    %56 = vector.shape_cast %38 : vector<2x8x16xf32> to vector<16x16xf32>
    %57 = arith.truncf %56 : vector<16x16xf32> to vector<16x16xbf16>
    %cst_30 = arith.constant dense<0.000000e+00> : vector<16x16xf32>
    %58 = tpu.matmul %57, %55, %cst_30 {dimension_numbers = #tpu.dot_dimension_numbers<[1], [0], [0], [1], [0, 0, 1, 1], [], []>} : vector<16x16xbf16>, vector<16x16xbf16>, vector<16x16xf32> -> vector<16x16xf32>
    %59 = vector.shape_cast %58 : vector<16x16xf32> to vector<2x8x16xf32>
    %60 = arith.addf %54, %59 : vector<2x8x16xf32>
    %c0_31 = arith.constant 0 : index
    %c0_32 = arith.constant 0 : index
    %61 = vector.load %arg14[%c0_31, %c0_32] : memref<16x16xbf16, #tpu.memory_space<vmem>>, vector<16x16xbf16>
    %c0_33 = arith.constant 0 : index
    %c0_34 = arith.constant 0 : index
    %62 = vector.load %arg15[%c0_33, %c0_34] : memref<1x16xf32, #tpu.memory_space<vmem>>, vector<1x16xf32>
    %63 = vector.shape_cast %49 : vector<2x8x16xf32> to vector<16x16xf32>
    %64 = arith.truncf %63 : vector<16x16xf32> to vector<16x16xbf16>
    %cst_35 = arith.constant dense<0.000000e+00> : vector<16x16xf32>
    %65 = tpu.matmul %64, %61, %cst_35 {dimension_numbers = #tpu.dot_dimension_numbers<[1], [0], [0], [1], [0, 0, 1, 1], [], []>} : vector<16x16xbf16>, vector<16x16xbf16>, vector<16x16xf32> -> vector<16x16xf32>
    %66 = vector.broadcast %62 : vector<1x16xf32> to vector<16x16xf32>
    %67 = arith.addf %65, %66 : vector<16x16xf32>
    %68 = vector.shape_cast %67 : vector<16x16xf32> to vector<2x8x16xf32>
    %69 = arith.addf %60, %68 : vector<2x8x16xf32>
    %c0_36 = arith.constant 0 : index
    %c0_37 = arith.constant 0 : index
    %c32 = arith.constant 32 : index
    %70 = vector.load %arg16[%c0_36, %c0_37, %c32] : memref<2x8x48xf32, #tpu.memory_space<vmem>>, vector<2x8x16xf32>
    tpu.vector_store %arg16[%c0_36, %c0_37, %c32], %69 {strides = array<i32>} : memref<2x8x48xf32, #tpu.memory_space<vmem>>, vector<2x8x16xf32>,
    %c0_38 = arith.constant 0 : index
    %c0_39 = arith.constant 0 : index
    %c0_40 = arith.constant 0 : index
    %71 = vector.load %arg2[%c0_38, %c0_39, %c0_40] : memref<2x8x16xbf16, #tpu.memory_space<vmem>>, vector<2x8x16xbf16>
    %c0_41 = arith.constant 0 : index
    %c0_42 = arith.constant 0 : index
    %72 = vector.load %arg8[%c0_41, %c0_42] : memref<16x48xbf16, #tpu.memory_space<vmem>>, vector<16x48xbf16>
    %c0_43 = arith.constant 0 : index
    %c0_44 = arith.constant 0 : index
    %73 = vector.load %arg10[%c0_43, %c0_44] : memref<1x48xf32, #tpu.memory_space<vmem>>, vector<1x48xf32>
    %74 = vector.shape_cast %71 : vector<2x8x16xbf16> to vector<16x16xbf16>
    %cst_45 = arith.constant dense<0.000000e+00> : vector<16x48xf32>
    %75 = tpu.matmul %74, %72, %cst_45 {dimension_numbers = #tpu.dot_dimension_numbers<[1], [0], [0], [1], [0, 0, 1, 1], [], []>} : vector<16x16xbf16>, vector<16x48xbf16>, vector<16x48xf32> -> vector<16x48xf32>
    %76 = vector.broadcast %73 : vector<1x48xf32> to vector<16x48xf32>
    %77 = arith.addf %75, %76 : vector<16x48xf32>
    %78 = vector.shape_cast %77 : vector<16x48xf32> to vector<2x8x48xf32>
    %79 = vector.extract_strided_slice %78 {offsets = [0, 0, 0], sizes = [2, 8, 16], strides = [1, 1, 1]} : vector<2x8x48xf32> to vector<2x8x16xf32>
    %80 = vector.extract_strided_slice %78 {offsets = [0, 0, 16], sizes = [2, 8, 16], strides = [1, 1, 1]} : vector<2x8x48xf32> to vector<2x8x16xf32>
    %81 = vector.extract_strided_slice %78 {offsets = [0, 0, 32], sizes = [2, 8, 16], strides = [1, 1, 1]} : vector<2x8x48xf32> to vector<2x8x16xf32>
    %c0_46 = arith.constant 0 : index
    %c0_47 = arith.constant 0 : index
    %82 = vector.load %arg9[%c0_46, %c0_47] : memref<16x48xbf16, #tpu.memory_space<vmem>>, vector<16x48xbf16>
    %cst_48 = arith.constant 0.000000e+00 : f32
    %83 = vector.broadcast %cst_48 : f32 to vector<2x16xf32>
    %c0_49 = arith.constant 0 : index
    %c0_50 = arith.constant 0 : index
    %84 = vector.load %arg11[%c0_49, %c0_50] : memref<1x16xf32, #tpu.memory_space<vmem>>, vector<1x16xf32>
    %85 = vector.broadcast %84 : vector<1x16xf32> to vector<2x16xf32>
    %86 = arith.addf %83, %85 : vector<2x16xf32>
    %cst_51 = arith.constant 0.000000e+00 : f32
    %87 = vector.broadcast %cst_51 : f32 to vector<2x16xf32>
    %88 = arith.truncf %87 : vector<2x16xf32> to vector<2x16xbf16>
    %cst_52 = arith.constant dense<0.000000e+00> : vector<2x48xf32>
    %89 = tpu.matmul %88, %82, %cst_52 {dimension_numbers = #tpu.dot_dimension_numbers<[1], [0], [0], [1], [0, 0, 1, 1], [], []>} : vector<2x16xbf16>, vector<16x48xbf16>, vector<2x48xf32> -> vector<2x48xf32>
    %90 = vector.extract_strided_slice %79 {offsets = [0, 0, 0], sizes = [2, 1, 16], strides = [1, 1, 1]} : vector<2x8x16xf32> to vector<2x1x16xf32>
    %91 = vector.shape_cast %90 : vector<2x1x16xf32> to vector<2x16xf32>
    %92 = vector.extract_strided_slice %89 {offsets = [0, 0], sizes = [2, 16], strides = [1, 1]} : vector<2x48xf32> to vector<2x16xf32>
    %93 = arith.addf %91, %92 : vector<2x16xf32>
    %94 = arith.negf %93 : vector<2x16xf32>
    %95 = math.exp %94 : vector<2x16xf32>
    %cst_53 = arith.constant 1.000000e+00 : f32
    %96 = vector.broadcast %cst_53 : f32 to vector<2x16xf32>
    %97 = arith.addf %96, %95 : vector<2x16xf32>
    %98 = arith.divf %96, %97 : vector<2x16xf32>
    %99 = vector.extract_strided_slice %80 {offsets = [0, 0, 0], sizes = [2, 1, 16], strides = [1, 1, 1]} : vector<2x8x16xf32> to vector<2x1x16xf32>
    %100 = vector.shape_cast %99 : vector<2x1x16xf32> to vector<2x16xf32>
    %101 = vector.extract_strided_slice %89 {offsets = [0, 16], sizes = [2, 16], strides = [1, 1]} : vector<2x48xf32> to vector<2x16xf32>
    %102 = arith.addf %100, %101 : vector<2x16xf32>
    %103 = arith.negf %102 : vector<2x16xf32>
    %104 = math.exp %103 : vector<2x16xf32>
    %cst_54 = arith.constant 1.000000e+00 : f32
    %105 = vector.broadcast %cst_54 : f32 to vector<2x16xf32>
    %106 = arith.addf %105, %104 : vector<2x16xf32>
    %107 = arith.divf %105, %106 : vector<2x16xf32>
    %108 = vector.extract_strided_slice %81 {offsets = [0, 0, 0], sizes = [2, 1, 16], strides = [1, 1, 1]} : vector<2x8x16xf32> to vector<2x1x16xf32>
    %109 = vector.shape_cast %108 : vector<2x1x16xf32> to vector<2x16xf32>
    %110 = vector.extract_strided_slice %89 {offsets = [0, 32], sizes = [2, 16], strides = [1, 1]} : vector<2x48xf32> to vector<2x16xf32>
    %111 = arith.addf %110, %86 : vector<2x16xf32>
    %112 = arith.mulf %98, %111 : vector<2x16xf32>
    %113 = arith.addf %109, %112 : vector<2x16xf32>
    %114 = math.tanh %113 : vector<2x16xf32>
    %cst_55 = arith.constant 1.000000e+00 : f32
    %115 = vector.broadcast %cst_55 : f32 to vector<2x16xf32>
    %116 = arith.subf %115, %107 : vector<2x16xf32>
    %117 = arith.mulf %116, %114 : vector<2x16xf32>
    %118 = arith.mulf %107, %87 : vector<2x16xf32>
    %119 = arith.addf %117, %118 : vector<2x16xf32>
    %120 = vector.shape_cast %119 : vector<2x16xf32> to vector<2x1x16xf32>
    %c0_56 = arith.constant 0 : index
    %c0_57 = arith.constant 0 : index
    %c16 = arith.constant 16 : index
    %121 = vector.load %arg16[%c0_56, %c0_57, %c16] : memref<2x8x48xf32, #tpu.memory_space<vmem>>, vector<2x1x16xf32>
    tpu.vector_store %arg16[%c0_56, %c0_57, %c16], %120 {strides = array<i32>} : memref<2x8x48xf32, #tpu.memory_space<vmem>>, vector<2x1x16xf32>,
    %122 = arith.truncf %119 : vector<2x16xf32> to vector<2x16xbf16>
    %cst_58 = arith.constant dense<0.000000e+00> : vector<2x48xf32>
    %123 = tpu.matmul %122, %82, %cst_58 {dimension_numbers = #tpu.dot_dimension_numbers<[1], [0], [0], [1], [0, 0, 1, 1], [], []>} : vector<2x16xbf16>, vector<16x48xbf16>, vector<2x48xf32> -> vector<2x48xf32>
    %124 = vector.extract_strided_slice %79 {offsets = [0, 1, 0], sizes = [2, 1, 16], strides = [1, 1, 1]} : vector<2x8x16xf32> to vector<2x1x16xf32>
    %125 = vector.shape_cast %124 : vector<2x1x16xf32> to vector<2x16xf32>
    %126 = vector.extract_strided_slice %123 {offsets = [0, 0], sizes = [2, 16], strides = [1, 1]} : vector<2x48xf32> to vector<2x16xf32>
    %127 = arith.addf %125, %126 : vector<2x16xf32>
    %128 = arith.negf %127 : vector<2x16xf32>
    %129 = math.exp %128 : vector<2x16xf32>
    %cst_59 = arith.constant 1.000000e+00 : f32
    %130 = vector.broadcast %cst_59 : f32 to vector<2x16xf32>
    %131 = arith.addf %130, %129 : vector<2x16xf32>
    %132 = arith.divf %130, %131 : vector<2x16xf32>
    %133 = vector.extract_strided_slice %80 {offsets = [0, 1, 0], sizes = [2, 1, 16], strides = [1, 1, 1]} : vector<2x8x16xf32> to vector<2x1x16xf32>
    %134 = vector.shape_cast %133 : vector<2x1x16xf32> to vector<2x16xf32>
    %135 = vector.extract_strided_slice %123 {offsets = [0, 16], sizes = [2, 16], strides = [1, 1]} : vector<2x48xf32> to vector<2x16xf32>
    %136 = arith.addf %134, %135 : vector<2x16xf32>
    %137 = arith.negf %136 : vector<2x16xf32>
    %138 = math.exp %137 : vector<2x16xf32>
    %cst_60 = arith.constant 1.000000e+00 : f32
    %139 = vector.broadcast %cst_60 : f32 to vector<2x16xf32>
    %140 = arith.addf %139, %138 : vector<2x16xf32>
    %141 = arith.divf %139, %140 : vector<2x16xf32>
    %142 = vector.extract_strided_slice %81 {offsets = [0, 1, 0], sizes = [2, 1, 16], strides = [1, 1, 1]} : vector<2x8x16xf32> to vector<2x1x16xf32>
    %143 = vector.shape_cast %142 : vector<2x1x16xf32> to vector<2x16xf32>
    %144 = vector.extract_strided_slice %123 {offsets = [0, 32], sizes = [2, 16], strides = [1, 1]} : vector<2x48xf32> to vector<2x16xf32>
    %145 = arith.addf %144, %86 : vector<2x16xf32>
    %146 = arith.mulf %132, %145 : vector<2x16xf32>
    %147 = arith.addf %143, %146 : vector<2x16xf32>
    %148 = math.tanh %147 : vector<2x16xf32>
    %cst_61 = arith.constant 1.000000e+00 : f32
    %149 = vector.broadcast %cst_61 : f32 to vector<2x16xf32>
    %150 = arith.subf %149, %141 : vector<2x16xf32>
    %151 = arith.mulf %150, %148 : vector<2x16xf32>
    %152 = arith.mulf %141, %119 : vector<2x16xf32>
    %153 = arith.addf %151, %152 : vector<2x16xf32>
    %154 = vector.shape_cast %153 : vector<2x16xf32> to vector<2x1x16xf32>
    %c0_62 = arith.constant 0 : index
    %c1 = arith.constant 1 : index
    %c16_63 = arith.constant 16 : index
    %155 = vector.load %arg16[%c0_62, %c1, %c16_63] : memref<2x8x48xf32, #tpu.memory_space<vmem>>, vector<2x1x16xf32>
    tpu.vector_store %arg16[%c0_62, %c1, %c16_63], %154 {strides = array<i32>} : memref<2x8x48xf32, #tpu.memory_space<vmem>>, vector<2x1x16xf32>,
    %156 = arith.truncf %153 : vector<2x16xf32> to vector<2x16xbf16>
    %cst_64 = arith.constant dense<0.000000e+00> : vector<2x48xf32>
    %157 = tpu.matmul %156, %82, %cst_64 {dimension_numbers = #tpu.dot_dimension_numbers<[1], [0], [0], [1], [0, 0, 1, 1], [], []>} : vector<2x16xbf16>, vector<16x48xbf16>, vector<2x48xf32> -> vector<2x48xf32>
    %158 = vector.extract_strided_slice %79 {offsets = [0, 2, 0], sizes = [2, 1, 16], strides = [1, 1, 1]} : vector<2x8x16xf32> to vector<2x1x16xf32>
    %159 = vector.shape_cast %158 : vector<2x1x16xf32> to vector<2x16xf32>
    %160 = vector.extract_strided_slice %157 {offsets = [0, 0], sizes = [2, 16], strides = [1, 1]} : vector<2x48xf32> to vector<2x16xf32>
    %161 = arith.addf %159, %160 : vector<2x16xf32>
    %162 = arith.negf %161 : vector<2x16xf32>
    %163 = math.exp %162 : vector<2x16xf32>
    %cst_65 = arith.constant 1.000000e+00 : f32
    %164 = vector.broadcast %cst_65 : f32 to vector<2x16xf32>
    %165 = arith.addf %164, %163 : vector<2x16xf32>
    %166 = arith.divf %164, %165 : vector<2x16xf32>
    %167 = vector.extract_strided_slice %80 {offsets = [0, 2, 0], sizes = [2, 1, 16], strides = [1, 1, 1]} : vector<2x8x16xf32> to vector<2x1x16xf32>
    %168 = vector.shape_cast %167 : vector<2x1x16xf32> to vector<2x16xf32>
    %169 = vector.extract_strided_slice %157 {offsets = [0, 16], sizes = [2, 16], strides = [1, 1]} : vector<2x48xf32> to vector<2x16xf32>
    %170 = arith.addf %168, %169 : vector<2x16xf32>
    %171 = arith.negf %170 : vector<2x16xf32>
    %172 = math.exp %171 : vector<2x16xf32>
    %cst_66 = arith.constant 1.000000e+00 : f32
    %173 = vector.broadcast %cst_66 : f32 to vector<2x16xf32>
    %174 = arith.addf %173, %172 : vector<2x16xf32>
    %175 = arith.divf %173, %174 : vector<2x16xf32>
    %176 = vector.extract_strided_slice %81 {offsets = [0, 2, 0], sizes = [2, 1, 16], strides = [1, 1, 1]} : vector<2x8x16xf32> to vector<2x1x16xf32>
    %177 = vector.shape_cast %176 : vector<2x1x16xf32> to vector<2x16xf32>
    %178 = vector.extract_strided_slice %157 {offsets = [0, 32], sizes = [2, 16], strides = [1, 1]} : vector<2x48xf32> to vector<2x16xf32>
    %179 = arith.addf %178, %86 : vector<2x16xf32>
    %180 = arith.mulf %166, %179 : vector<2x16xf32>
    %181 = arith.addf %177, %180 : vector<2x16xf32>
    %182 = math.tanh %181 : vector<2x16xf32>
    %cst_67 = arith.constant 1.000000e+00 : f32
    %183 = vector.broadcast %cst_67 : f32 to vector<2x16xf32>
    %184 = arith.subf %183, %175 : vector<2x16xf32>
    %185 = arith.mulf %184, %182 : vector<2x16xf32>
    %186 = arith.mulf %175, %153 : vector<2x16xf32>
    %187 = arith.addf %185, %186 : vector<2x16xf32>
    %188 = vector.shape_cast %187 : vector<2x16xf32> to vector<2x1x16xf32>
    %c0_68 = arith.constant 0 : index
    %c2 = arith.constant 2 : index
    %c16_69 = arith.constant 16 : index
    %189 = vector.load %arg16[%c0_68, %c2, %c16_69] : memref<2x8x48xf32, #tpu.memory_space<vmem>>, vector<2x1x16xf32>
    tpu.vector_store %arg16[%c0_68, %c2, %c16_69], %188 {strides = array<i32>} : memref<2x8x48xf32, #tpu.memory_space<vmem>>, vector<2x1x16xf32>,
    %190 = arith.truncf %187 : vector<2x16xf32> to vector<2x16xbf16>
    %cst_70 = arith.constant dense<0.000000e+00> : vector<2x48xf32>
    %191 = tpu.matmul %190, %82, %cst_70 {dimension_numbers = #tpu.dot_dimension_numbers<[1], [0], [0], [1], [0, 0, 1, 1], [], []>} : vector<2x16xbf16>, vector<16x48xbf16>, vector<2x48xf32> -> vector<2x48xf32>
    %192 = vector.extract_strided_slice %79 {offsets = [0, 3, 0], sizes = [2, 1, 16], strides = [1, 1, 1]} : vector<2x8x16xf32> to vector<2x1x16xf32>
    %193 = vector.shape_cast %192 : vector<2x1x16xf32> to vector<2x16xf32>
    %194 = vector.extract_strided_slice %191 {offsets = [0, 0], sizes = [2, 16], strides = [1, 1]} : vector<2x48xf32> to vector<2x16xf32>
    %195 = arith.addf %193, %194 : vector<2x16xf32>
    %196 = arith.negf %195 : vector<2x16xf32>
    %197 = math.exp %196 : vector<2x16xf32>
    %cst_71 = arith.constant 1.000000e+00 : f32
    %198 = vector.broadcast %cst_71 : f32 to vector<2x16xf32>
    %199 = arith.addf %198, %197 : vector<2x16xf32>
    %200 = arith.divf %198, %199 : vector<2x16xf32>
    %201 = vector.extract_strided_slice %80 {offsets = [0, 3, 0], sizes = [2, 1, 16], strides = [1, 1, 1]} : vector<2x8x16xf32> to vector<2x1x16xf32>
    %202 = vector.shape_cast %201 : vector<2x1x16xf32> to vector<2x16xf32>
    %203 = vector.extract_strided_slice %191 {offsets = [0, 16], sizes = [2, 16], strides = [1, 1]} : vector<2x48xf32> to vector<2x16xf32>
    %204 = arith.addf %202, %203 : vector<2x16xf32>
    %205 = arith.negf %204 : vector<2x16xf32>
    %206 = math.exp %205 : vector<2x16xf32>
    %cst_72 = arith.constant 1.000000e+00 : f32
    %207 = vector.broadcast %cst_72 : f32 to vector<2x16xf32>
    %208 = arith.addf %207, %206 : vector<2x16xf32>
    %209 = arith.divf %207, %208 : vector<2x16xf32>
    %210 = vector.extract_strided_slice %81 {offsets = [0, 3, 0], sizes = [2, 1, 16], strides = [1, 1, 1]} : vector<2x8x16xf32> to vector<2x1x16xf32>
    %211 = vector.shape_cast %210 : vector<2x1x16xf32> to vector<2x16xf32>
    %212 = vector.extract_strided_slice %191 {offsets = [0, 32], sizes = [2, 16], strides = [1, 1]} : vector<2x48xf32> to vector<2x16xf32>
    %213 = arith.addf %212, %86 : vector<2x16xf32>
    %214 = arith.mulf %200, %213 : vector<2x16xf32>
    %215 = arith.addf %211, %214 : vector<2x16xf32>
    %216 = math.tanh %215 : vector<2x16xf32>
    %cst_73 = arith.constant 1.000000e+00 : f32
    %217 = vector.broadcast %cst_73 : f32 to vector<2x16xf32>
    %218 = arith.subf %217, %209 : vector<2x16xf32>
    %219 = arith.mulf %218, %216 : vector<2x16xf32>
    %220 = arith.mulf %209, %187 : vector<2x16xf32>
    %221 = arith.addf %219, %220 : vector<2x16xf32>
    %222 = vector.shape_cast %221 : vector<2x16xf32> to vector<2x1x16xf32>
    %c0_74 = arith.constant 0 : index
    %c3 = arith.constant 3 : index
    %c16_75 = arith.constant 16 : index
    %223 = vector.load %arg16[%c0_74, %c3, %c16_75] : memref<2x8x48xf32, #tpu.memory_space<vmem>>, vector<2x1x16xf32>
    tpu.vector_store %arg16[%c0_74, %c3, %c16_75], %222 {strides = array<i32>} : memref<2x8x48xf32, #tpu.memory_space<vmem>>, vector<2x1x16xf32>,
    %224 = arith.truncf %221 : vector<2x16xf32> to vector<2x16xbf16>
    %cst_76 = arith.constant dense<0.000000e+00> : vector<2x48xf32>
    %225 = tpu.matmul %224, %82, %cst_76 {dimension_numbers = #tpu.dot_dimension_numbers<[1], [0], [0], [1], [0, 0, 1, 1], [], []>} : vector<2x16xbf16>, vector<16x48xbf16>, vector<2x48xf32> -> vector<2x48xf32>
    %226 = vector.extract_strided_slice %79 {offsets = [0, 4, 0], sizes = [2, 1, 16], strides = [1, 1, 1]} : vector<2x8x16xf32> to vector<2x1x16xf32>
    %227 = vector.shape_cast %226 : vector<2x1x16xf32> to vector<2x16xf32>
    %228 = vector.extract_strided_slice %225 {offsets = [0, 0], sizes = [2, 16], strides = [1, 1]} : vector<2x48xf32> to vector<2x16xf32>
    %229 = arith.addf %227, %228 : vector<2x16xf32>
    %230 = arith.negf %229 : vector<2x16xf32>
    %231 = math.exp %230 : vector<2x16xf32>
    %cst_77 = arith.constant 1.000000e+00 : f32
    %232 = vector.broadcast %cst_77 : f32 to vector<2x16xf32>
    %233 = arith.addf %232, %231 : vector<2x16xf32>
    %234 = arith.divf %232, %233 : vector<2x16xf32>
    %235 = vector.extract_strided_slice %80 {offsets = [0, 4, 0], sizes = [2, 1, 16], strides = [1, 1, 1]} : vector<2x8x16xf32> to vector<2x1x16xf32>
    %236 = vector.shape_cast %235 : vector<2x1x16xf32> to vector<2x16xf32>
    %237 = vector.extract_strided_slice %225 {offsets = [0, 16], sizes = [2, 16], strides = [1, 1]} : vector<2x48xf32> to vector<2x16xf32>
    %238 = arith.addf %236, %237 : vector<2x16xf32>
    %239 = arith.negf %238 : vector<2x16xf32>
    %240 = math.exp %239 : vector<2x16xf32>
    %cst_78 = arith.constant 1.000000e+00 : f32
    %241 = vector.broadcast %cst_78 : f32 to vector<2x16xf32>
    %242 = arith.addf %241, %240 : vector<2x16xf32>
    %243 = arith.divf %241, %242 : vector<2x16xf32>
    %244 = vector.extract_strided_slice %81 {offsets = [0, 4, 0], sizes = [2, 1, 16], strides = [1, 1, 1]} : vector<2x8x16xf32> to vector<2x1x16xf32>
    %245 = vector.shape_cast %244 : vector<2x1x16xf32> to vector<2x16xf32>
    %246 = vector.extract_strided_slice %225 {offsets = [0, 32], sizes = [2, 16], strides = [1, 1]} : vector<2x48xf32> to vector<2x16xf32>
    %247 = arith.addf %246, %86 : vector<2x16xf32>
    %248 = arith.mulf %234, %247 : vector<2x16xf32>
    %249 = arith.addf %245, %248 : vector<2x16xf32>
    %250 = math.tanh %249 : vector<2x16xf32>
    %cst_79 = arith.constant 1.000000e+00 : f32
    %251 = vector.broadcast %cst_79 : f32 to vector<2x16xf32>
    %252 = arith.subf %251, %243 : vector<2x16xf32>
    %253 = arith.mulf %252, %250 : vector<2x16xf32>
    %254 = arith.mulf %243, %221 : vector<2x16xf32>
    %255 = arith.addf %253, %254 : vector<2x16xf32>
    %256 = vector.shape_cast %255 : vector<2x16xf32> to vector<2x1x16xf32>
    %c0_80 = arith.constant 0 : index
    %c4 = arith.constant 4 : index
    %c16_81 = arith.constant 16 : index
    %257 = vector.load %arg16[%c0_80, %c4, %c16_81] : memref<2x8x48xf32, #tpu.memory_space<vmem>>, vector<2x1x16xf32>
    tpu.vector_store %arg16[%c0_80, %c4, %c16_81], %256 {strides = array<i32>} : memref<2x8x48xf32, #tpu.memory_space<vmem>>, vector<2x1x16xf32>,
    %258 = arith.truncf %255 : vector<2x16xf32> to vector<2x16xbf16>
    %cst_82 = arith.constant dense<0.000000e+00> : vector<2x48xf32>
    %259 = tpu.matmul %258, %82, %cst_82 {dimension_numbers = #tpu.dot_dimension_numbers<[1], [0], [0], [1], [0, 0, 1, 1], [], []>} : vector<2x16xbf16>, vector<16x48xbf16>, vector<2x48xf32> -> vector<2x48xf32>
    %260 = vector.extract_strided_slice %79 {offsets = [0, 5, 0], sizes = [2, 1, 16], strides = [1, 1, 1]} : vector<2x8x16xf32> to vector<2x1x16xf32>
    %261 = vector.shape_cast %260 : vector<2x1x16xf32> to vector<2x16xf32>
    %262 = vector.extract_strided_slice %259 {offsets = [0, 0], sizes = [2, 16], strides = [1, 1]} : vector<2x48xf32> to vector<2x16xf32>
    %263 = arith.addf %261, %262 : vector<2x16xf32>
    %264 = arith.negf %263 : vector<2x16xf32>
    %265 = math.exp %264 : vector<2x16xf32>
    %cst_83 = arith.constant 1.000000e+00 : f32
    %266 = vector.broadcast %cst_83 : f32 to vector<2x16xf32>
    %267 = arith.addf %266, %265 : vector<2x16xf32>
    %268 = arith.divf %266, %267 : vector<2x16xf32>
    %269 = vector.extract_strided_slice %80 {offsets = [0, 5, 0], sizes = [2, 1, 16], strides = [1, 1, 1]} : vector<2x8x16xf32> to vector<2x1x16xf32>
    %270 = vector.shape_cast %269 : vector<2x1x16xf32> to vector<2x16xf32>
    %271 = vector.extract_strided_slice %259 {offsets = [0, 16], sizes = [2, 16], strides = [1, 1]} : vector<2x48xf32> to vector<2x16xf32>
    %272 = arith.addf %270, %271 : vector<2x16xf32>
    %273 = arith.negf %272 : vector<2x16xf32>
    %274 = math.exp %273 : vector<2x16xf32>
    %cst_84 = arith.constant 1.000000e+00 : f32
    %275 = vector.broadcast %cst_84 : f32 to vector<2x16xf32>
    %276 = arith.addf %275, %274 : vector<2x16xf32>
    %277 = arith.divf %275, %276 : vector<2x16xf32>
    %278 = vector.extract_strided_slice %81 {offsets = [0, 5, 0], sizes = [2, 1, 16], strides = [1, 1, 1]} : vector<2x8x16xf32> to vector<2x1x16xf32>
    %279 = vector.shape_cast %278 : vector<2x1x16xf32> to vector<2x16xf32>
    %280 = vector.extract_strided_slice %259 {offsets = [0, 32], sizes = [2, 16], strides = [1, 1]} : vector<2x48xf32> to vector<2x16xf32>
    %281 = arith.addf %280, %86 : vector<2x16xf32>
    %282 = arith.mulf %268, %281 : vector<2x16xf32>
    %283 = arith.addf %279, %282 : vector<2x16xf32>
    %284 = math.tanh %283 : vector<2x16xf32>
    %cst_85 = arith.constant 1.000000e+00 : f32
    %285 = vector.broadcast %cst_85 : f32 to vector<2x16xf32>
    %286 = arith.subf %285, %277 : vector<2x16xf32>
    %287 = arith.mulf %286, %284 : vector<2x16xf32>
    %288 = arith.mulf %277, %255 : vector<2x16xf32>
    %289 = arith.addf %287, %288 : vector<2x16xf32>
    %290 = vector.shape_cast %289 : vector<2x16xf32> to vector<2x1x16xf32>
    %c0_86 = arith.constant 0 : index
    %c5 = arith.constant 5 : index
    %c16_87 = arith.constant 16 : index
    %291 = vector.load %arg16[%c0_86, %c5, %c16_87] : memref<2x8x48xf32, #tpu.memory_space<vmem>>, vector<2x1x16xf32>
    tpu.vector_store %arg16[%c0_86, %c5, %c16_87], %290 {strides = array<i32>} : memref<2x8x48xf32, #tpu.memory_space<vmem>>, vector<2x1x16xf32>,
    %292 = arith.truncf %289 : vector<2x16xf32> to vector<2x16xbf16>
    %cst_88 = arith.constant dense<0.000000e+00> : vector<2x48xf32>
    %293 = tpu.matmul %292, %82, %cst_88 {dimension_numbers = #tpu.dot_dimension_numbers<[1], [0], [0], [1], [0, 0, 1, 1], [], []>} : vector<2x16xbf16>, vector<16x48xbf16>, vector<2x48xf32> -> vector<2x48xf32>
    %294 = vector.extract_strided_slice %79 {offsets = [0, 6, 0], sizes = [2, 1, 16], strides = [1, 1, 1]} : vector<2x8x16xf32> to vector<2x1x16xf32>
    %295 = vector.shape_cast %294 : vector<2x1x16xf32> to vector<2x16xf32>
    %296 = vector.extract_strided_slice %293 {offsets = [0, 0], sizes = [2, 16], strides = [1, 1]} : vector<2x48xf32> to vector<2x16xf32>
    %297 = arith.addf %295, %296 : vector<2x16xf32>
    %298 = arith.negf %297 : vector<2x16xf32>
    %299 = math.exp %298 : vector<2x16xf32>
    %cst_89 = arith.constant 1.000000e+00 : f32
    %300 = vector.broadcast %cst_89 : f32 to vector<2x16xf32>
    %301 = arith.addf %300, %299 : vector<2x16xf32>
    %302 = arith.divf %300, %301 : vector<2x16xf32>
    %303 = vector.extract_strided_slice %80 {offsets = [0, 6, 0], sizes = [2, 1, 16], strides = [1, 1, 1]} : vector<2x8x16xf32> to vector<2x1x16xf32>
    %304 = vector.shape_cast %303 : vector<2x1x16xf32> to vector<2x16xf32>
    %305 = vector.extract_strided_slice %293 {offsets = [0, 16], sizes = [2, 16], strides = [1, 1]} : vector<2x48xf32> to vector<2x16xf32>
    %306 = arith.addf %304, %305 : vector<2x16xf32>
    %307 = arith.negf %306 : vector<2x16xf32>
    %308 = math.exp %307 : vector<2x16xf32>
    %cst_90 = arith.constant 1.000000e+00 : f32
    %309 = vector.broadcast %cst_90 : f32 to vector<2x16xf32>
    %310 = arith.addf %309, %308 : vector<2x16xf32>
    %311 = arith.divf %309, %310 : vector<2x16xf32>
    %312 = vector.extract_strided_slice %81 {offsets = [0, 6, 0], sizes = [2, 1, 16], strides = [1, 1, 1]} : vector<2x8x16xf32> to vector<2x1x16xf32>
    %313 = vector.shape_cast %312 : vector<2x1x16xf32> to vector<2x16xf32>
    %314 = vector.extract_strided_slice %293 {offsets = [0, 32], sizes = [2, 16], strides = [1, 1]} : vector<2x48xf32> to vector<2x16xf32>
    %315 = arith.addf %314, %86 : vector<2x16xf32>
    %316 = arith.mulf %302, %315 : vector<2x16xf32>
    %317 = arith.addf %313, %316 : vector<2x16xf32>
    %318 = math.tanh %317 : vector<2x16xf32>
    %cst_91 = arith.constant 1.000000e+00 : f32
    %319 = vector.broadcast %cst_91 : f32 to vector<2x16xf32>
    %320 = arith.subf %319, %311 : vector<2x16xf32>
    %321 = arith.mulf %320, %318 : vector<2x16xf32>
    %322 = arith.mulf %311, %289 : vector<2x16xf32>
    %323 = arith.addf %321, %322 : vector<2x16xf32>
    %324 = vector.shape_cast %323 : vector<2x16xf32> to vector<2x1x16xf32>
    %c0_92 = arith.constant 0 : index
    %c6 = arith.constant 6 : index
    %c16_93 = arith.constant 16 : index
    %325 = vector.load %arg16[%c0_92, %c6, %c16_93] : memref<2x8x48xf32, #tpu.memory_space<vmem>>, vector<2x1x16xf32>
    tpu.vector_store %arg16[%c0_92, %c6, %c16_93], %324 {strides = array<i32>} : memref<2x8x48xf32, #tpu.memory_space<vmem>>, vector<2x1x16xf32>,
    %326 = arith.truncf %323 : vector<2x16xf32> to vector<2x16xbf16>
    %cst_94 = arith.constant dense<0.000000e+00> : vector<2x48xf32>
    %327 = tpu.matmul %326, %82, %cst_94 {dimension_numbers = #tpu.dot_dimension_numbers<[1], [0], [0], [1], [0, 0, 1, 1], [], []>} : vector<2x16xbf16>, vector<16x48xbf16>, vector<2x48xf32> -> vector<2x48xf32>
    %328 = vector.extract_strided_slice %79 {offsets = [0, 7, 0], sizes = [2, 1, 16], strides = [1, 1, 1]} : vector<2x8x16xf32> to vector<2x1x16xf32>
    %329 = vector.shape_cast %328 : vector<2x1x16xf32> to vector<2x16xf32>
    %330 = vector.extract_strided_slice %327 {offsets = [0, 0], sizes = [2, 16], strides = [1, 1]} : vector<2x48xf32> to vector<2x16xf32>
    %331 = arith.addf %329, %330 : vector<2x16xf32>
    %332 = arith.negf %331 : vector<2x16xf32>
    %333 = math.exp %332 : vector<2x16xf32>
    %cst_95 = arith.constant 1.000000e+00 : f32
    %334 = vector.broadcast %cst_95 : f32 to vector<2x16xf32>
    %335 = arith.addf %334, %333 : vector<2x16xf32>
    %336 = arith.divf %334, %335 : vector<2x16xf32>
    %337 = vector.extract_strided_slice %80 {offsets = [0, 7, 0], sizes = [2, 1, 16], strides = [1, 1, 1]} : vector<2x8x16xf32> to vector<2x1x16xf32>
    %338 = vector.shape_cast %337 : vector<2x1x16xf32> to vector<2x16xf32>
    %339 = vector.extract_strided_slice %327 {offsets = [0, 16], sizes = [2, 16], strides = [1, 1]} : vector<2x48xf32> to vector<2x16xf32>
    %340 = arith.addf %338, %339 : vector<2x16xf32>
    %341 = arith.negf %340 : vector<2x16xf32>
    %342 = math.exp %341 : vector<2x16xf32>
    %cst_96 = arith.constant 1.000000e+00 : f32
    %343 = vector.broadcast %cst_96 : f32 to vector<2x16xf32>
    %344 = arith.addf %343, %342 : vector<2x16xf32>
    %345 = arith.divf %343, %344 : vector<2x16xf32>
    %346 = vector.extract_strided_slice %81 {offsets = [0, 7, 0], sizes = [2, 1, 16], strides = [1, 1, 1]} : vector<2x8x16xf32> to vector<2x1x16xf32>
    %347 = vector.shape_cast %346 : vector<2x1x16xf32> to vector<2x16xf32>
    %348 = vector.extract_strided_slice %327 {offsets = [0, 32], sizes = [2, 16], strides = [1, 1]} : vector<2x48xf32> to vector<2x16xf32>
    %349 = arith.addf %348, %86 : vector<2x16xf32>
    %350 = arith.mulf %336, %349 : vector<2x16xf32>
    %351 = arith.addf %347, %350 : vector<2x16xf32>
    %352 = math.tanh %351 : vector<2x16xf32>
    %cst_97 = arith.constant 1.000000e+00 : f32
    %353 = vector.broadcast %cst_97 : f32 to vector<2x16xf32>
    %354 = arith.subf %353, %345 : vector<2x16xf32>
    %355 = arith.mulf %354, %352 : vector<2x16xf32>
    %356 = arith.mulf %345, %323 : vector<2x16xf32>
    %357 = arith.addf %355, %356 : vector<2x16xf32>
    %358 = vector.shape_cast %357 : vector<2x16xf32> to vector<2x1x16xf32>
    %c0_98 = arith.constant 0 : index
    %c7 = arith.constant 7 : index
    %c16_99 = arith.constant 16 : index
    %359 = vector.load %arg16[%c0_98, %c7, %c16_99] : memref<2x8x48xf32, #tpu.memory_space<vmem>>, vector<2x1x16xf32>
    tpu.vector_store %arg16[%c0_98, %c7, %c16_99], %358 {strides = array<i32>} : memref<2x8x48xf32, #tpu.memory_space<vmem>>, vector<2x1x16xf32>,
    return
  }
  func.func @transform_0(%arg0: i32) -> (i32, i32, i32) {
    %c0_i32 = arith.constant 0 : i32
    %c0_i32_0 = arith.constant 0 : i32
    %c0_i32_1 = arith.constant 0 : i32
    return %arg0, %c0_i32, %c0_i32_0 : i32, i32, i32
  }
  func.func @transform_1(%arg0: i32) -> (i32, i32, i32) {
    %c0_i32 = arith.constant 0 : i32
    %c0_i32_0 = arith.constant 0 : i32
    %c0_i32_1 = arith.constant 0 : i32
    return %arg0, %c0_i32, %c0_i32_0 : i32, i32, i32
  }
  func.func @transform_2(%arg0: i32) -> (i32, i32, i32) {
    %c0_i32 = arith.constant 0 : i32
    %c0_i32_0 = arith.constant 0 : i32
    %c0_i32_1 = arith.constant 0 : i32
    return %arg0, %c0_i32, %c0_i32_0 : i32, i32, i32
  }
  func.func @transform_3(%arg0: i32) -> (i32, i32) {
    %c0_i32 = arith.constant 0 : i32
    %c0_i32_0 = arith.constant 0 : i32
    %c0_i32_1 = arith.constant 0 : i32
    return %c0_i32, %c0_i32_0 : i32, i32
  }
  func.func @transform_4(%arg0: i32) -> (i32, i32) {
    %c0_i32 = arith.constant 0 : i32
    %c0_i32_0 = arith.constant 0 : i32
    %c0_i32_1 = arith.constant 0 : i32
    return %c0_i32, %c0_i32_0 : i32, i32
  }
  func.func @transform_5(%arg0: i32) -> (i32, i32) {
    %c0_i32 = arith.constant 0 : i32
    %c0_i32_0 = arith.constant 0 : i32
    %c0_i32_1 = arith.constant 0 : i32
    return %c0_i32, %c0_i32_0 : i32, i32
  }
  func.func @transform_6(%arg0: i32) -> (i32, i32) {
    %c0_i32 = arith.constant 0 : i32
    %c0_i32_0 = arith.constant 0 : i32
    %c0_i32_1 = arith.constant 0 : i32
    return %c0_i32, %c0_i32_0 : i32, i32
  }
  func.func @transform_7(%arg0: i32) -> (i32, i32) {
    %c0_i32 = arith.constant 0 : i32
    %c0_i32_0 = arith.constant 0 : i32
    %c0_i32_1 = arith.constant 0 : i32
    return %c0_i32, %c0_i32_0 : i32, i32
  }
  func.func @transform_8(%arg0: i32) -> (i32, i32) {
    %c0_i32 = arith.constant 0 : i32
    %c0_i32_0 = arith.constant 0 : i32
    %c0_i32_1 = arith.constant 0 : i32
    return %c0_i32, %c0_i32_0 : i32, i32
  }
  func.func @transform_9(%arg0: i32) -> (i32, i32) {
    %c0_i32 = arith.constant 0 : i32
    %c0_i32_0 = arith.constant 0 : i32
    %c0_i32_1 = arith.constant 0 : i32
    return %c0_i32, %c0_i32_0 : i32, i32
  }
  func.func @transform_10(%arg0: i32) -> (i32, i32) {
    %c0_i32 = arith.constant 0 : i32
    %c0_i32_0 = arith.constant 0 : i32
    %c0_i32_1 = arith.constant 0 : i32
    return %c0_i32, %c0_i32_0 : i32, i32
  }
  func.func @transform_11(%arg0: i32) -> (i32, i32) {
    %c0_i32 = arith.constant 0 : i32
    %c0_i32_0 = arith.constant 0 : i32
    %c0_i32_1 = arith.constant 0 : i32
    return %c0_i32, %c0_i32_0 : i32, i32
  }
  func.func @transform_12(%arg0: i32) -> (i32, i32) {
    %c0_i32 = arith.constant 0 : i32
    %c0_i32_0 = arith.constant 0 : i32
    %c0_i32_1 = arith.constant 0 : i32
    return %c0_i32, %c0_i32_0 : i32, i32
  }
  func.func @transform_13(%arg0: i32) -> (i32, i32) {
    %c0_i32 = arith.constant 0 : i32
    %c0_i32_0 = arith.constant 0 : i32
    %c0_i32_1 = arith.constant 0 : i32
    return %c0_i32, %c0_i32_0 : i32, i32
  }
  func.func @transform_14(%arg0: i32) -> (i32, i32) {
    %c0_i32 = arith.constant 0 : i32
    %c0_i32_0 = arith.constant 0 : i32
    %c0_i32_1 = arith.constant 0 : i32
    return %c0_i32, %c0_i32_0 : i32, i32
  }
  func.func @transform_15(%arg0: i32) -> (i32, i32, i32) {
    %c0_i32 = arith.constant 0 : i32
    %c0_i32_0 = arith.constant 0 : i32
    %c0_i32_1 = arith.constant 0 : i32
    return %arg0, %c0_i32, %c0_i32_0 : i32, i32, i32
  }
}

module attributes {stable_mosaic.version = 11 : i64} {
  func.func @_split_layers_kernel(%arg0: i32, %arg1: memref<2x8x16xbf16, #tpu.memory_space<vmem>>, %arg2: memref<2x8x16xbf16, #tpu.memory_space<vmem>>, %arg3: memref<2x8x16xf32, #tpu.memory_space<vmem>>, %arg4: memref<16x48xbf16, #tpu.memory_space<vmem>>, %arg5: memref<1x48xf32, #tpu.memory_space<vmem>>, %arg6: memref<16x16xbf16, #tpu.memory_space<vmem>>, %arg7: memref<1x16xf32, #tpu.memory_space<vmem>>, %arg8: memref<16x48xbf16, #tpu.memory_space<vmem>>, %arg9: memref<16x48xbf16, #tpu.memory_space<vmem>>, %arg10: memref<1x48xf32, #tpu.memory_space<vmem>>, %arg11: memref<1x16xf32, #tpu.memory_space<vmem>>, %arg12: memref<16x16xbf16, #tpu.memory_space<vmem>>, %arg13: memref<16x16xbf16, #tpu.memory_space<vmem>>, %arg14: memref<16x16xbf16, #tpu.memory_space<vmem>>, %arg15: memref<1x16xf32, #tpu.memory_space<vmem>>, %arg16: memref<2x8x48xf32, #tpu.memory_space<vmem>>) attributes {dimension_semantics = [#tpu.dimension_semantics<parallel>], iteration_bounds = array<i64: 1>, scalar_prefetch = 0 : i64, scratch_operands = 0 : i64, tpu.core_type = #tpu.core_type<tc>, window_params = [{transform_indices = @transform_0, window_bounds = array<i64: 2, 8, 16>}, {transform_indices = @transform_1, window_bounds = array<i64: 2, 8, 16>}, {transform_indices = @transform_2, window_bounds = array<i64: 2, 8, 16>}, {pipeline_mode = #tpu.pipeline_mode<synchronous>, transform_indices = @transform_3, window_bounds = array<i64: 16, 48>}, {pipeline_mode = #tpu.pipeline_mode<synchronous>, transform_indices = @transform_4, window_bounds = array<i64: 1, 48>}, {pipeline_mode = #tpu.pipeline_mode<synchronous>, transform_indices = @transform_5, window_bounds = array<i64: 16, 16>}, {pipeline_mode = #tpu.pipeline_mode<synchronous>, transform_indices = @transform_6, window_bounds = array<i64: 1, 16>}, {pipeline_mode = #tpu.pipeline_mode<synchronous>, transform_indices = @transform_7, window_bounds = array<i64: 16, 48>}, {pipeline_mode = #tpu.pipeline_mode<synchronous>, transform_indices = @transform_8, window_bounds = array<i64: 16, 48>}, {pipeline_mode = #tpu.pipeline_mode<synchronous>, transform_indices = @transform_9, window_bounds = array<i64: 1, 48>}, {pipeline_mode = #tpu.pipeline_mode<synchronous>, transform_indices = @transform_10, window_bounds = array<i64: 1, 16>}, {pipeline_mode = #tpu.pipeline_mode<synchronous>, transform_indices = @transform_11, window_bounds = array<i64: 16, 16>}, {pipeline_mode = #tpu.pipeline_mode<synchronous>, transform_indices = @transform_12, window_bounds = array<i64: 16, 16>}, {pipeline_mode = #tpu.pipeline_mode<synchronous>, transform_indices = @transform_13, window_bounds = array<i64: 16, 16>}, {pipeline_mode = #tpu.pipeline_mode<synchronous>, transform_indices = @transform_14, window_bounds = array<i64: 1, 16>}, {transform_indices = @transform_15, window_bounds = array<i64: 2, 8, 48>}]} {
    %c0 = arith.constant 0 : index
    %c0_0 = arith.constant 0 : index
    %c0_1 = arith.constant 0 : index
    %0 = vector.load %arg1[%c0, %c0_0, %c0_1] : memref<2x8x16xbf16, #tpu.memory_space<vmem>>, vector<2x8x16xbf16>
    %c0_2 = arith.constant 0 : index
    %c0_3 = arith.constant 0 : index
    %1 = vector.load %arg4[%c0_2, %c0_3] : memref<16x48xbf16, #tpu.memory_space<vmem>>, vector<16x48xbf16>
    %c0_4 = arith.constant 0 : index
    %c0_5 = arith.constant 0 : index
    %2 = vector.load %arg5[%c0_4, %c0_5] : memref<1x48xf32, #tpu.memory_space<vmem>>, vector<1x48xf32>
    %3 = vector.shape_cast %0 : vector<2x8x16xbf16> to vector<16x16xbf16>
    %cst = arith.constant dense<0.000000e+00> : vector<16x48xf32>
    %4 = tpu.matmul %3, %1, %cst {dimension_numbers = #tpu.dot_dimension_numbers<[1], [0], [0], [1], [0, 0, 1, 1], [], []>} : vector<16x16xbf16>, vector<16x48xbf16>, vector<16x48xf32> -> vector<16x48xf32>
    %5 = vector.broadcast %2 : vector<1x48xf32> to vector<16x48xf32>
    %6 = arith.addf %4, %5 : vector<16x48xf32>
    %7 = vector.shape_cast %6 : vector<16x48xf32> to vector<2x8x48xf32>
    %8 = vector.extract_strided_slice %7 {offsets = [0, 0, 0], sizes = [2, 8, 16], strides = [1, 1, 1]} : vector<2x8x48xf32> to vector<2x8x16xf32>
    %9 = vector.extract_strided_slice %7 {offsets = [0, 0, 16], sizes = [2, 8, 16], strides = [1, 1, 1]} : vector<2x8x48xf32> to vector<2x8x16xf32>
    %10 = vector.extract_strided_slice %7 {offsets = [0, 0, 32], sizes = [2, 8, 16], strides = [1, 1, 1]} : vector<2x8x48xf32> to vector<2x8x16xf32>
    %11 = arith.truncf %8 : vector<2x8x16xf32> to vector<2x8x16xbf16>
    %12 = arith.truncf %9 : vector<2x8x16xf32> to vector<2x8x16xbf16>
    "tpu.trace_start"() <{level = 10 : i32, message = "bsd,btd->bst"}> : () -> ()
    %cst_6 = arith.constant dense<0.000000e+00> : vector<2x8x8xf32>
    %13 = tpu.matmul %11, %12, %cst_6 {dimension_numbers = #tpu.dot_dimension_numbers<[2], [2], [1], [1], [0, 0, 0, 1, 1, 1], [0], [0]>} : vector<2x8x16xbf16>, vector<2x8x16xbf16>, vector<2x8x8xf32> -> vector<2x8x8xf32>
    "tpu.trace_stop"() : () -> ()
    %cst_7 = arith.constant 2.500000e-01 : f32
    %14 = vector.broadcast %cst_7 : f32 to vector<2x8x8xf32>
    %15 = arith.mulf %13, %14 : vector<2x8x8xf32>
    %cst_8 = arith.constant dense<0xFF800000> : vector<2x8xf32>
    %16 = vector.multi_reduction <maximumf>, %15, %cst_8 [2] : vector<2x8x8xf32> to vector<2x8xf32>
    %17 = vector.shape_cast %16 : vector<2x8xf32> to vector<2x8x1xf32>
    %18 = vector.broadcast %17 : vector<2x8x1xf32> to vector<2x8x8xf32>
    %19 = arith.subf %15, %18 : vector<2x8x8xf32>
    %20 = math.exp %19 : vector<2x8x8xf32>
    %cst_9 = arith.constant dense<0.000000e+00> : vector<2x8xf32>
    %21 = vector.multi_reduction <add>, %20, %cst_9 [2] : vector<2x8x8xf32> to vector<2x8xf32>
    %22 = vector.shape_cast %21 : vector<2x8xf32> to vector<2x8x1xf32>
    %23 = tpu.reciprocal %22 {approx = true} : vector<2x8x1xf32> -> vector<2x8x1xf32>
    %24 = vector.broadcast %23 : vector<2x8x1xf32> to vector<2x8x8xf32>
    %25 = arith.mulf %20, %24 : vector<2x8x8xf32>
    %26 = arith.truncf %25 : vector<2x8x8xf32> to vector<2x8x8xbf16>
    %27 = arith.truncf %10 : vector<2x8x16xf32> to vector<2x8x16xbf16>
    "tpu.trace_start"() <{level = 10 : i32, message = "bst,btd->bsd"}> : () -> ()
    %cst_10 = arith.constant dense<0.000000e+00> : vector<2x8x16xf32>
    %28 = tpu.matmul %26, %27, %cst_10 {dimension_numbers = #tpu.dot_dimension_numbers<[2], [1], [1], [2], [0, 0, 0, 1, 1, 2], [0], [0]>} : vector<2x8x8xbf16>, vector<2x8x16xbf16>, vector<2x8x16xf32> -> vector<2x8x16xf32>
    "tpu.trace_stop"() : () -> ()
    %c0_11 = arith.constant 0 : index
    %c0_12 = arith.constant 0 : index
    %29 = vector.load %arg6[%c0_11, %c0_12] : memref<16x16xbf16, #tpu.memory_space<vmem>>, vector<16x16xbf16>
    %c0_13 = arith.constant 0 : index
    %c0_14 = arith.constant 0 : index
    %30 = vector.load %arg7[%c0_13, %c0_14] : memref<1x16xf32, #tpu.memory_space<vmem>>, vector<1x16xf32>
    %31 = vector.shape_cast %28 : vector<2x8x16xf32> to vector<16x16xf32>
    %32 = arith.truncf %31 : vector<16x16xf32> to vector<16x16xbf16>
    %cst_15 = arith.constant dense<0.000000e+00> : vector<16x16xf32>
    %33 = tpu.matmul %32, %29, %cst_15 {dimension_numbers = #tpu.dot_dimension_numbers<[1], [0], [0], [1], [0, 0, 1, 1], [], []>} : vector<16x16xbf16>, vector<16x16xbf16>, vector<16x16xf32> -> vector<16x16xf32>
    %34 = vector.broadcast %30 : vector<1x16xf32> to vector<16x16xf32>
    %35 = arith.addf %33, %34 : vector<16x16xf32>
    %36 = vector.shape_cast %35 : vector<16x16xf32> to vector<2x8x16xf32>
    %c0_16 = arith.constant 0 : index
    %c0_17 = arith.constant 0 : index
    %c0_18 = arith.constant 0 : index
    %37 = vector.load %arg16[%c0_16, %c0_17, %c0_18] : memref<2x8x48xf32, #tpu.memory_space<vmem>>, vector<2x8x16xf32>
    tpu.vector_store %arg16[%c0_16, %c0_17, %c0_18], %36 {strides = array<i32>} : memref<2x8x48xf32, #tpu.memory_space<vmem>>, vector<2x8x16xf32>,
    %c0_19 = arith.constant 0 : index
    %c0_20 = arith.constant 0 : index
    %c0_21 = arith.constant 0 : index
    %38 = vector.load %arg3[%c0_19, %c0_20, %c0_21] : memref<2x8x16xf32, #tpu.memory_space<vmem>>, vector<2x8x16xf32>
    %39 = tpu.iota {dimensions = array<i32: 1>} : vector<2x8x16xi32>
    %c0_i32 = arith.constant 0 : i32
    %40 = vector.broadcast %c0_i32 : i32 to vector<2x8x16xi32>
    %41 = arith.cmpi eq, %39, %40 : vector<2x8x16xi32>
    %c1_i32 = arith.constant 1 : i32
    %42 = tpu.dynamic_rotate %38 by %c1_i32 dim 1 : vector<2x8x16xf32>, i32 -> vector<2x8x16xf32>
    %cst_22 = arith.constant 0.000000e+00 : f32
    %43 = vector.broadcast %cst_22 : f32 to vector<2x8x16xf32>
    %44 = arith.select %41, %43, %42 : vector<2x8x16xi1>, vector<2x8x16xf32>
    %c7_i32 = arith.constant 7 : i32
    %45 = vector.broadcast %c7_i32 : i32 to vector<2x8x16xi32>
    %46 = arith.cmpi eq, %39, %45 : vector<2x8x16xi32>
    %c7_i32_23 = arith.constant 7 : i32
    %47 = tpu.dynamic_rotate %38 by %c7_i32_23 dim 1 : vector<2x8x16xf32>, i32 -> vector<2x8x16xf32>
    %cst_24 = arith.constant 0.000000e+00 : f32
    %48 = vector.broadcast %cst_24 : f32 to vector<2x8x16xf32>
    %49 = arith.select %46, %48, %47 : vector<2x8x16xi1>, vector<2x8x16xf32>
    %c0_25 = arith.constant 0 : index
    %c0_26 = arith.constant 0 : index
    %50 = vector.load %arg12[%c0_25, %c0_26] : memref<16x16xbf16, #tpu.memory_space<vmem>>, vector<16x16xbf16>
    %51 = vector.shape_cast %44 : vector<2x8x16xf32> to vector<16x16xf32>
    %52 = arith.truncf %51 : vector<16x16xf32> to vector<16x16xbf16>
    %cst_27 = arith.constant dense<0.000000e+00> : vector<16x16xf32>
    %53 = tpu.matmul %52, %50, %cst_27 {dimension_numbers = #tpu.dot_dimension_numbers<[1], [0], [0], [1], [0, 0, 1, 1], [], []>} : vector<16x16xbf16>, vector<16x16xbf16>, vector<16x16xf32> -> vector<16x16xf32>
    %54 = vector.shape_cast %53 : vector<16x16xf32> to vector<2x8x16xf32>
    %c0_28 = arith.constant 0 : index
    %c0_29 = arith.constant 0 : index
    %55 = vector.load %arg13[%c0_28, %c0_29] : memref<16x16xbf16, #tpu.memory_space<vmem>>, vector<16x16xbf16>
    %56 = vector.shape_cast %38 : vector<2x8x16xf32> to vector<16x16xf32>
    %57 = arith.truncf %56 : vector<16x16xf32> to vector<16x16xbf16>
    %cst_30 = arith.constant dense<0.000000e+00> : vector<16x16xf32>
    %58 = tpu.matmul %57, %55, %cst_30 {dimension_numbers = #tpu.dot_dimension_numbers<[1], [0], [0], [1], [0, 0, 1, 1], [], []>} : vector<16x16xbf16>, vector<16x16xbf16>, vector<16x16xf32> -> vector<16x16xf32>
    %59 = vector.shape_cast %58 : vector<16x16xf32> to vector<2x8x16xf32>
    %60 = arith.addf %54, %59 : vector<2x8x16xf32>
    %c0_31 = arith.constant 0 : index
    %c0_32 = arith.constant 0 : index
    %61 = vector.load %arg14[%c0_31, %c0_32] : memref<16x16xbf16, #tpu.memory_space<vmem>>, vector<16x16xbf16>
    %c0_33 = arith.constant 0 : index
    %c0_34 = arith.constant 0 : index
    %62 = vector.load %arg15[%c0_33, %c0_34] : memref<1x16xf32, #tpu.memory_space<vmem>>, vector<1x16xf32>
    %63 = vector.shape_cast %49 : vector<2x8x16xf32> to vector<16x16xf32>
    %64 = arith.truncf %63 : vector<16x16xf32> to vector<16x16xbf16>
    %cst_35 = arith.constant dense<0.000000e+00> : vector<16x16xf32>
    %65 = tpu.matmul %64, %61, %cst_35 {dimension_numbers = #tpu.dot_dimension_numbers<[1], [0], [0], [1], [0, 0, 1, 1], [], []>} : vector<16x16xbf16>, vector<16x16xbf16>, vector<16x16xf32> -> vector<16x16xf32>
    %66 = vector.broadcast %62 : vector<1x16xf32> to vector<16x16xf32>
    %67 = arith.addf %65, %66 : vector<16x16xf32>
    %68 = vector.shape_cast %67 : vector<16x16xf32> to vector<2x8x16xf32>
    %69 = arith.addf %60, %68 : vector<2x8x16xf32>
    %c0_36 = arith.constant 0 : index
    %c0_37 = arith.constant 0 : index
    %c32 = arith.constant 32 : index
    %70 = vector.load %arg16[%c0_36, %c0_37, %c32] : memref<2x8x48xf32, #tpu.memory_space<vmem>>, vector<2x8x16xf32>
    tpu.vector_store %arg16[%c0_36, %c0_37, %c32], %69 {strides = array<i32>} : memref<2x8x48xf32, #tpu.memory_space<vmem>>, vector<2x8x16xf32>,
    %c0_38 = arith.constant 0 : index
    %c0_39 = arith.constant 0 : index
    %c0_40 = arith.constant 0 : index
    %71 = vector.load %arg2[%c0_38, %c0_39, %c0_40] : memref<2x8x16xbf16, #tpu.memory_space<vmem>>, vector<2x8x16xbf16>
    %c0_41 = arith.constant 0 : index
    %c0_42 = arith.constant 0 : index
    %72 = vector.load %arg8[%c0_41, %c0_42] : memref<16x48xbf16, #tpu.memory_space<vmem>>, vector<16x48xbf16>
    %c0_43 = arith.constant 0 : index
    %c0_44 = arith.constant 0 : index
    %73 = vector.load %arg10[%c0_43, %c0_44] : memref<1x48xf32, #tpu.memory_space<vmem>>, vector<1x48xf32>
    %74 = vector.shape_cast %71 : vector<2x8x16xbf16> to vector<16x16xbf16>
    %cst_45 = arith.constant dense<0.000000e+00> : vector<16x48xf32>
    %75 = tpu.matmul %74, %72, %cst_45 {dimension_numbers = #tpu.dot_dimension_numbers<[1], [0], [0], [1], [0, 0, 1, 1], [], []>} : vector<16x16xbf16>, vector<16x48xbf16>, vector<16x48xf32> -> vector<16x48xf32>
    %76 = vector.broadcast %73 : vector<1x48xf32> to vector<16x48xf32>
    %77 = arith.addf %75, %76 : vector<16x48xf32>
    %78 = vector.shape_cast %77 : vector<16x48xf32> to vector<2x8x48xf32>
    %79 = vector.extract_strided_slice %78 {offsets = [0, 0, 0], sizes = [2, 8, 16], strides = [1, 1, 1]} : vector<2x8x48xf32> to vector<2x8x16xf32>
    %80 = vector.extract_strided_slice %78 {offsets = [0, 0, 16], sizes = [2, 8, 16], strides = [1, 1, 1]} : vector<2x8x48xf32> to vector<2x8x16xf32>
    %81 = vector.extract_strided_slice %78 {offsets = [0, 0, 32], sizes = [2, 8, 16], strides = [1, 1, 1]} : vector<2x8x48xf32> to vector<2x8x16xf32>
    %c0_46 = arith.constant 0 : index
    %c0_47 = arith.constant 0 : index
    %82 = vector.load %arg9[%c0_46, %c0_47] : memref<16x48xbf16, #tpu.memory_space<vmem>>, vector<16x48xbf16>
    %cst_48 = arith.constant 0.000000e+00 : f32
    %83 = vector.broadcast %cst_48 : f32 to vector<2x16xf32>
    %c0_49 = arith.constant 0 : index
    %c0_50 = arith.constant 0 : index
    %84 = vector.load %arg11[%c0_49, %c0_50] : memref<1x16xf32, #tpu.memory_space<vmem>>, vector<1x16xf32>
    %85 = vector.broadcast %84 : vector<1x16xf32> to vector<2x16xf32>
    %86 = arith.addf %83, %85 : vector<2x16xf32>
    %cst_51 = arith.constant 0.000000e+00 : f32
    %87 = vector.broadcast %cst_51 : f32 to vector<2x16xf32>
    %88 = arith.truncf %87 : vector<2x16xf32> to vector<2x16xbf16>
    %cst_52 = arith.constant dense<0.000000e+00> : vector<2x48xf32>
    %89 = tpu.matmul %88, %82, %cst_52 {dimension_numbers = #tpu.dot_dimension_numbers<[1], [0], [0], [1], [0, 0, 1, 1], [], []>} : vector<2x16xbf16>, vector<16x48xbf16>, vector<2x48xf32> -> vector<2x48xf32>
    %90 = vector.extract_strided_slice %79 {offsets = [0, 0, 0], sizes = [2, 1, 16], strides = [1, 1, 1]} : vector<2x8x16xf32> to vector<2x1x16xf32>
    %91 = vector.shape_cast %90 : vector<2x1x16xf32> to vector<2x16xf32>
    %92 = vector.extract_strided_slice %89 {offsets = [0, 0], sizes = [2, 16], strides = [1, 1]} : vector<2x48xf32> to vector<2x16xf32>
    %93 = arith.addf %91, %92 : vector<2x16xf32>
    %94 = arith.negf %93 : vector<2x16xf32>
    %95 = math.exp %94 : vector<2x16xf32>
    %cst_53 = arith.constant 1.000000e+00 : f32
    %96 = vector.broadcast %cst_53 : f32 to vector<2x16xf32>
    %97 = arith.addf %96, %95 : vector<2x16xf32>
    %98 = arith.divf %96, %97 : vector<2x16xf32>
    %99 = vector.extract_strided_slice %80 {offsets = [0, 0, 0], sizes = [2, 1, 16], strides = [1, 1, 1]} : vector<2x8x16xf32> to vector<2x1x16xf32>
    %100 = vector.shape_cast %99 : vector<2x1x16xf32> to vector<2x16xf32>
    %101 = vector.extract_strided_slice %89 {offsets = [0, 16], sizes = [2, 16], strides = [1, 1]} : vector<2x48xf32> to vector<2x16xf32>
    %102 = arith.addf %100, %101 : vector<2x16xf32>
    %103 = arith.negf %102 : vector<2x16xf32>
    %104 = math.exp %103 : vector<2x16xf32>
    %cst_54 = arith.constant 1.000000e+00 : f32
    %105 = vector.broadcast %cst_54 : f32 to vector<2x16xf32>
    %106 = arith.addf %105, %104 : vector<2x16xf32>
    %107 = arith.divf %105, %106 : vector<2x16xf32>
    %108 = vector.extract_strided_slice %81 {offsets = [0, 0, 0], sizes = [2, 1, 16], strides = [1, 1, 1]} : vector<2x8x16xf32> to vector<2x1x16xf32>
    %109 = vector.shape_cast %108 : vector<2x1x16xf32> to vector<2x16xf32>
    %110 = vector.extract_strided_slice %89 {offsets = [0, 32], sizes = [2, 16], strides = [1, 1]} : vector<2x48xf32> to vector<2x16xf32>
    %111 = arith.addf %110, %86 : vector<2x16xf32>
    %112 = arith.mulf %98, %111 : vector<2x16xf32>
    %113 = arith.addf %109, %112 : vector<2x16xf32>
    %114 = math.tanh %113 : vector<2x16xf32>
    %cst_55 = arith.constant 1.000000e+00 : f32
    %115 = vector.broadcast %cst_55 : f32 to vector<2x16xf32>
    %116 = arith.subf %115, %107 : vector<2x16xf32>
    %117 = arith.mulf %116, %114 : vector<2x16xf32>
    %118 = arith.mulf %107, %87 : vector<2x16xf32>
    %119 = arith.addf %117, %118 : vector<2x16xf32>
    %120 = vector.shape_cast %119 : vector<2x16xf32> to vector<2x1x16xf32>
    %c0_56 = arith.constant 0 : index
    %c0_57 = arith.constant 0 : index
    %c16 = arith.constant 16 : index
    %121 = vector.load %arg16[%c0_56, %c0_57, %c16] : memref<2x8x48xf32, #tpu.memory_space<vmem>>, vector<2x1x16xf32>
    tpu.vector_store %arg16[%c0_56, %c0_57, %c16], %120 {strides = array<i32>} : memref<2x8x48xf32, #tpu.memory_space<vmem>>, vector<2x1x16xf32>,
    %122 = arith.truncf %119 : vector<2x16xf32> to vector<2x16xbf16>
    %cst_58 = arith.constant dense<0.000000e+00> : vector<2x48xf32>
    %123 = tpu.matmul %122, %82, %cst_58 {dimension_numbers = #tpu.dot_dimension_numbers<[1], [0], [0], [1], [0, 0, 1, 1], [], []>} : vector<2x16xbf16>, vector<16x48xbf16>, vector<2x48xf32> -> vector<2x48xf32>
    %124 = vector.extract_strided_slice %79 {offsets = [0, 1, 0], sizes = [2, 1, 16], strides = [1, 1, 1]} : vector<2x8x16xf32> to vector<2x1x16xf32>
    %125 = vector.shape_cast %124 : vector<2x1x16xf32> to vector<2x16xf32>
    %126 = vector.extract_strided_slice %123 {offsets = [0, 0], sizes = [2, 16], strides = [1, 1]} : vector<2x48xf32> to vector<2x16xf32>
    %127 = arith.addf %125, %126 : vector<2x16xf32>
    %128 = arith.negf %127 : vector<2x16xf32>
    %129 = math.exp %128 : vector<2x16xf32>
    %cst_59 = arith.constant 1.000000e+00 : f32
    %130 = vector.broadcast %cst_59 : f32 to vector<2x16xf32>
    %131 = arith.addf %130, %129 : vector<2x16xf32>
    %132 = arith.divf %130, %131 : vector<2x16xf32>
    %133 = vector.extract_strided_slice %80 {offsets = [0, 1, 0], sizes = [2, 1, 16], strides = [1, 1, 1]} : vector<2x8x16xf32> to vector<2x1x16xf32>
    %134 = vector.shape_cast %133 : vector<2x1x16xf32> to vector<2x16xf32>
    %135 = vector.extract_strided_slice %123 {offsets = [0, 16], sizes = [2, 16], strides = [1, 1]} : vector<2x48xf32> to vector<2x16xf32>
    %136 = arith.addf %134, %135 : vector<2x16xf32>
    %137 = arith.negf %136 : vector<2x16xf32>
    %138 = math.exp %137 : vector<2x16xf32>
    %cst_60 = arith.constant 1.000000e+00 : f32
    %139 = vector.broadcast %cst_60 : f32 to vector<2x16xf32>
    %140 = arith.addf %139, %138 : vector<2x16xf32>
    %141 = arith.divf %139, %140 : vector<2x16xf32>
    %142 = vector.extract_strided_slice %81 {offsets = [0, 1, 0], sizes = [2, 1, 16], strides = [1, 1, 1]} : vector<2x8x16xf32> to vector<2x1x16xf32>
    %143 = vector.shape_cast %142 : vector<2x1x16xf32> to vector<2x16xf32>
    %144 = vector.extract_strided_slice %123 {offsets = [0, 32], sizes = [2, 16], strides = [1, 1]} : vector<2x48xf32> to vector<2x16xf32>
    %145 = arith.addf %144, %86 : vector<2x16xf32>
    %146 = arith.mulf %132, %145 : vector<2x16xf32>
    %147 = arith.addf %143, %146 : vector<2x16xf32>
    %148 = math.tanh %147 : vector<2x16xf32>
    %cst_61 = arith.constant 1.000000e+00 : f32
    %149 = vector.broadcast %cst_61 : f32 to vector<2x16xf32>
    %150 = arith.subf %149, %141 : vector<2x16xf32>
    %151 = arith.mulf %150, %148 : vector<2x16xf32>
    %152 = arith.mulf %141, %119 : vector<2x16xf32>
    %153 = arith.addf %151, %152 : vector<2x16xf32>
    %154 = vector.shape_cast %153 : vector<2x16xf32> to vector<2x1x16xf32>
    %c0_62 = arith.constant 0 : index
    %c1 = arith.constant 1 : index
    %c16_63 = arith.constant 16 : index
    %155 = vector.load %arg16[%c0_62, %c1, %c16_63] : memref<2x8x48xf32, #tpu.memory_space<vmem>>, vector<2x1x16xf32>
    tpu.vector_store %arg16[%c0_62, %c1, %c16_63], %154 {strides = array<i32>} : memref<2x8x48xf32, #tpu.memory_space<vmem>>, vector<2x1x16xf32>,
    %156 = arith.truncf %153 : vector<2x16xf32> to vector<2x16xbf16>
    %cst_64 = arith.constant dense<0.000000e+00> : vector<2x48xf32>
    %157 = tpu.matmul %156, %82, %cst_64 {dimension_numbers = #tpu.dot_dimension_numbers<[1], [0], [0], [1], [0, 0, 1, 1], [], []>} : vector<2x16xbf16>, vector<16x48xbf16>, vector<2x48xf32> -> vector<2x48xf32>
    %158 = vector.extract_strided_slice %79 {offsets = [0, 2, 0], sizes = [2, 1, 16], strides = [1, 1, 1]} : vector<2x8x16xf32> to vector<2x1x16xf32>
    %159 = vector.shape_cast %158 : vector<2x1x16xf32> to vector<2x16xf32>
    %160 = vector.extract_strided_slice %157 {offsets = [0, 0], sizes = [2, 16], strides = [1, 1]} : vector<2x48xf32> to vector<2x16xf32>
    %161 = arith.addf %159, %160 : vector<2x16xf32>
    %162 = arith.negf %161 : vector<2x16xf32>
    %163 = math.exp %162 : vector<2x16xf32>
    %cst_65 = arith.constant 1.000000e+00 : f32
    %164 = vector.broadcast %cst_65 : f32 to vector<2x16xf32>
    %165 = arith.addf %164, %163 : vector<2x16xf32>
    %166 = arith.divf %164, %165 : vector<2x16xf32>
    %167 = vector.extract_strided_slice %80 {offsets = [0, 2, 0], sizes = [2, 1, 16], strides = [1, 1, 1]} : vector<2x8x16xf32> to vector<2x1x16xf32>
    %168 = vector.shape_cast %167 : vector<2x1x16xf32> to vector<2x16xf32>
    %169 = vector.extract_strided_slice %157 {offsets = [0, 16], sizes = [2, 16], strides = [1, 1]} : vector<2x48xf32> to vector<2x16xf32>
    %170 = arith.addf %168, %169 : vector<2x16xf32>
    %171 = arith.negf %170 : vector<2x16xf32>
    %172 = math.exp %171 : vector<2x16xf32>
    %cst_66 = arith.constant 1.000000e+00 : f32
    %173 = vector.broadcast %cst_66 : f32 to vector<2x16xf32>
    %174 = arith.addf %173, %172 : vector<2x16xf32>
    %175 = arith.divf %173, %174 : vector<2x16xf32>
    %176 = vector.extract_strided_slice %81 {offsets = [0, 2, 0], sizes = [2, 1, 16], strides = [1, 1, 1]} : vector<2x8x16xf32> to vector<2x1x16xf32>
    %177 = vector.shape_cast %176 : vector<2x1x16xf32> to vector<2x16xf32>
    %178 = vector.extract_strided_slice %157 {offsets = [0, 32], sizes = [2, 16], strides = [1, 1]} : vector<2x48xf32> to vector<2x16xf32>
    %179 = arith.addf %178, %86 : vector<2x16xf32>
    %180 = arith.mulf %166, %179 : vector<2x16xf32>
    %181 = arith.addf %177, %180 : vector<2x16xf32>
    %182 = math.tanh %181 : vector<2x16xf32>
    %cst_67 = arith.constant 1.000000e+00 : f32
    %183 = vector.broadcast %cst_67 : f32 to vector<2x16xf32>
    %184 = arith.subf %183, %175 : vector<2x16xf32>
    %185 = arith.mulf %184, %182 : vector<2x16xf32>
    %186 = arith.mulf %175, %153 : vector<2x16xf32>
    %187 = arith.addf %185, %186 : vector<2x16xf32>
    %188 = vector.shape_cast %187 : vector<2x16xf32> to vector<2x1x16xf32>
    %c0_68 = arith.constant 0 : index
    %c2 = arith.constant 2 : index
    %c16_69 = arith.constant 16 : index
    %189 = vector.load %arg16[%c0_68, %c2, %c16_69] : memref<2x8x48xf32, #tpu.memory_space<vmem>>, vector<2x1x16xf32>
    tpu.vector_store %arg16[%c0_68, %c2, %c16_69], %188 {strides = array<i32>} : memref<2x8x48xf32, #tpu.memory_space<vmem>>, vector<2x1x16xf32>,
    %190 = arith.truncf %187 : vector<2x16xf32> to vector<2x16xbf16>
    %cst_70 = arith.constant dense<0.000000e+00> : vector<2x48xf32>
    %191 = tpu.matmul %190, %82, %cst_70 {dimension_numbers = #tpu.dot_dimension_numbers<[1], [0], [0], [1], [0, 0, 1, 1], [], []>} : vector<2x16xbf16>, vector<16x48xbf16>, vector<2x48xf32> -> vector<2x48xf32>
    %192 = vector.extract_strided_slice %79 {offsets = [0, 3, 0], sizes = [2, 1, 16], strides = [1, 1, 1]} : vector<2x8x16xf32> to vector<2x1x16xf32>
    %193 = vector.shape_cast %192 : vector<2x1x16xf32> to vector<2x16xf32>
    %194 = vector.extract_strided_slice %191 {offsets = [0, 0], sizes = [2, 16], strides = [1, 1]} : vector<2x48xf32> to vector<2x16xf32>
    %195 = arith.addf %193, %194 : vector<2x16xf32>
    %196 = arith.negf %195 : vector<2x16xf32>
    %197 = math.exp %196 : vector<2x16xf32>
    %cst_71 = arith.constant 1.000000e+00 : f32
    %198 = vector.broadcast %cst_71 : f32 to vector<2x16xf32>
    %199 = arith.addf %198, %197 : vector<2x16xf32>
    %200 = arith.divf %198, %199 : vector<2x16xf32>
    %201 = vector.extract_strided_slice %80 {offsets = [0, 3, 0], sizes = [2, 1, 16], strides = [1, 1, 1]} : vector<2x8x16xf32> to vector<2x1x16xf32>
    %202 = vector.shape_cast %201 : vector<2x1x16xf32> to vector<2x16xf32>
    %203 = vector.extract_strided_slice %191 {offsets = [0, 16], sizes = [2, 16], strides = [1, 1]} : vector<2x48xf32> to vector<2x16xf32>
    %204 = arith.addf %202, %203 : vector<2x16xf32>
    %205 = arith.negf %204 : vector<2x16xf32>
    %206 = math.exp %205 : vector<2x16xf32>
    %cst_72 = arith.constant 1.000000e+00 : f32
    %207 = vector.broadcast %cst_72 : f32 to vector<2x16xf32>
    %208 = arith.addf %207, %206 : vector<2x16xf32>
    %209 = arith.divf %207, %208 : vector<2x16xf32>
    %210 = vector.extract_strided_slice %81 {offsets = [0, 3, 0], sizes = [2, 1, 16], strides = [1, 1, 1]} : vector<2x8x16xf32> to vector<2x1x16xf32>
    %211 = vector.shape_cast %210 : vector<2x1x16xf32> to vector<2x16xf32>
    %212 = vector.extract_strided_slice %191 {offsets = [0, 32], sizes = [2, 16], strides = [1, 1]} : vector<2x48xf32> to vector<2x16xf32>
    %213 = arith.addf %212, %86 : vector<2x16xf32>
    %214 = arith.mulf %200, %213 : vector<2x16xf32>
    %215 = arith.addf %211, %214 : vector<2x16xf32>
    %216 = math.tanh %215 : vector<2x16xf32>
    %cst_73 = arith.constant 1.000000e+00 : f32
    %217 = vector.broadcast %cst_73 : f32 to vector<2x16xf32>
    %218 = arith.subf %217, %209 : vector<2x16xf32>
    %219 = arith.mulf %218, %216 : vector<2x16xf32>
    %220 = arith.mulf %209, %187 : vector<2x16xf32>
    %221 = arith.addf %219, %220 : vector<2x16xf32>
    %222 = vector.shape_cast %221 : vector<2x16xf32> to vector<2x1x16xf32>
    %c0_74 = arith.constant 0 : index
    %c3 = arith.constant 3 : index
    %c16_75 = arith.constant 16 : index
    %223 = vector.load %arg16[%c0_74, %c3, %c16_75] : memref<2x8x48xf32, #tpu.memory_space<vmem>>, vector<2x1x16xf32>
    tpu.vector_store %arg16[%c0_74, %c3, %c16_75], %222 {strides = array<i32>} : memref<2x8x48xf32, #tpu.memory_space<vmem>>, vector<2x1x16xf32>,
    %224 = arith.truncf %221 : vector<2x16xf32> to vector<2x16xbf16>
    %cst_76 = arith.constant dense<0.000000e+00> : vector<2x48xf32>
    %225 = tpu.matmul %224, %82, %cst_76 {dimension_numbers = #tpu.dot_dimension_numbers<[1], [0], [0], [1], [0, 0, 1, 1], [], []>} : vector<2x16xbf16>, vector<16x48xbf16>, vector<2x48xf32> -> vector<2x48xf32>
    %226 = vector.extract_strided_slice %79 {offsets = [0, 4, 0], sizes = [2, 1, 16], strides = [1, 1, 1]} : vector<2x8x16xf32> to vector<2x1x16xf32>
    %227 = vector.shape_cast %226 : vector<2x1x16xf32> to vector<2x16xf32>
    %228 = vector.extract_strided_slice %225 {offsets = [0, 0], sizes = [2, 16], strides = [1, 1]} : vector<2x48xf32> to vector<2x16xf32>
    %229 = arith.addf %227, %228 : vector<2x16xf32>
    %230 = arith.negf %229 : vector<2x16xf32>
    %231 = math.exp %230 : vector<2x16xf32>
    %cst_77 = arith.constant 1.000000e+00 : f32
    %232 = vector.broadcast %cst_77 : f32 to vector<2x16xf32>
    %233 = arith.addf %232, %231 : vector<2x16xf32>
    %234 = arith.divf %232, %233 : vector<2x16xf32>
    %235 = vector.extract_strided_slice %80 {offsets = [0, 4, 0], sizes = [2, 1, 16], strides = [1, 1, 1]} : vector<2x8x16xf32> to vector<2x1x16xf32>
    %236 = vector.shape_cast %235 : vector<2x1x16xf32> to vector<2x16xf32>
    %237 = vector.extract_strided_slice %225 {offsets = [0, 16], sizes = [2, 16], strides = [1, 1]} : vector<2x48xf32> to vector<2x16xf32>
    %238 = arith.addf %236, %237 : vector<2x16xf32>
    %239 = arith.negf %238 : vector<2x16xf32>
    %240 = math.exp %239 : vector<2x16xf32>
    %cst_78 = arith.constant 1.000000e+00 : f32
    %241 = vector.broadcast %cst_78 : f32 to vector<2x16xf32>
    %242 = arith.addf %241, %240 : vector<2x16xf32>
    %243 = arith.divf %241, %242 : vector<2x16xf32>
    %244 = vector.extract_strided_slice %81 {offsets = [0, 4, 0], sizes = [2, 1, 16], strides = [1, 1, 1]} : vector<2x8x16xf32> to vector<2x1x16xf32>
    %245 = vector.shape_cast %244 : vector<2x1x16xf32> to vector<2x16xf32>
    %246 = vector.extract_strided_slice %225 {offsets = [0, 32], sizes = [2, 16], strides = [1, 1]} : vector<2x48xf32> to vector<2x16xf32>
    %247 = arith.addf %246, %86 : vector<2x16xf32>
    %248 = arith.mulf %234, %247 : vector<2x16xf32>
    %249 = arith.addf %245, %248 : vector<2x16xf32>
    %250 = math.tanh %249 : vector<2x16xf32>
    %cst_79 = arith.constant 1.000000e+00 : f32
    %251 = vector.broadcast %cst_79 : f32 to vector<2x16xf32>
    %252 = arith.subf %251, %243 : vector<2x16xf32>
    %253 = arith.mulf %252, %250 : vector<2x16xf32>
    %254 = arith.mulf %243, %221 : vector<2x16xf32>
    %255 = arith.addf %253, %254 : vector<2x16xf32>
    %256 = vector.shape_cast %255 : vector<2x16xf32> to vector<2x1x16xf32>
    %c0_80 = arith.constant 0 : index
    %c4 = arith.constant 4 : index
    %c16_81 = arith.constant 16 : index
    %257 = vector.load %arg16[%c0_80, %c4, %c16_81] : memref<2x8x48xf32, #tpu.memory_space<vmem>>, vector<2x1x16xf32>
    tpu.vector_store %arg16[%c0_80, %c4, %c16_81], %256 {strides = array<i32>} : memref<2x8x48xf32, #tpu.memory_space<vmem>>, vector<2x1x16xf32>,
    %258 = arith.truncf %255 : vector<2x16xf32> to vector<2x16xbf16>
    %cst_82 = arith.constant dense<0.000000e+00> : vector<2x48xf32>
    %259 = tpu.matmul %258, %82, %cst_82 {dimension_numbers = #tpu.dot_dimension_numbers<[1], [0], [0], [1], [0, 0, 1, 1], [], []>} : vector<2x16xbf16>, vector<16x48xbf16>, vector<2x48xf32> -> vector<2x48xf32>
    %260 = vector.extract_strided_slice %79 {offsets = [0, 5, 0], sizes = [2, 1, 16], strides = [1, 1, 1]} : vector<2x8x16xf32> to vector<2x1x16xf32>
    %261 = vector.shape_cast %260 : vector<2x1x16xf32> to vector<2x16xf32>
    %262 = vector.extract_strided_slice %259 {offsets = [0, 0], sizes = [2, 16], strides = [1, 1]} : vector<2x48xf32> to vector<2x16xf32>
    %263 = arith.addf %261, %262 : vector<2x16xf32>
    %264 = arith.negf %263 : vector<2x16xf32>
    %265 = math.exp %264 : vector<2x16xf32>
    %cst_83 = arith.constant 1.000000e+00 : f32
    %266 = vector.broadcast %cst_83 : f32 to vector<2x16xf32>
    %267 = arith.addf %266, %265 : vector<2x16xf32>
    %268 = arith.divf %266, %267 : vector<2x16xf32>
    %269 = vector.extract_strided_slice %80 {offsets = [0, 5, 0], sizes = [2, 1, 16], strides = [1, 1, 1]} : vector<2x8x16xf32> to vector<2x1x16xf32>
    %270 = vector.shape_cast %269 : vector<2x1x16xf32> to vector<2x16xf32>
    %271 = vector.extract_strided_slice %259 {offsets = [0, 16], sizes = [2, 16], strides = [1, 1]} : vector<2x48xf32> to vector<2x16xf32>
    %272 = arith.addf %270, %271 : vector<2x16xf32>
    %273 = arith.negf %272 : vector<2x16xf32>
    %274 = math.exp %273 : vector<2x16xf32>
    %cst_84 = arith.constant 1.000000e+00 : f32
    %275 = vector.broadcast %cst_84 : f32 to vector<2x16xf32>
    %276 = arith.addf %275, %274 : vector<2x16xf32>
    %277 = arith.divf %275, %276 : vector<2x16xf32>
    %278 = vector.extract_strided_slice %81 {offsets = [0, 5, 0], sizes = [2, 1, 16], strides = [1, 1, 1]} : vector<2x8x16xf32> to vector<2x1x16xf32>
    %279 = vector.shape_cast %278 : vector<2x1x16xf32> to vector<2x16xf32>
    %280 = vector.extract_strided_slice %259 {offsets = [0, 32], sizes = [2, 16], strides = [1, 1]} : vector<2x48xf32> to vector<2x16xf32>
    %281 = arith.addf %280, %86 : vector<2x16xf32>
    %282 = arith.mulf %268, %281 : vector<2x16xf32>
    %283 = arith.addf %279, %282 : vector<2x16xf32>
    %284 = math.tanh %283 : vector<2x16xf32>
    %cst_85 = arith.constant 1.000000e+00 : f32
    %285 = vector.broadcast %cst_85 : f32 to vector<2x16xf32>
    %286 = arith.subf %285, %277 : vector<2x16xf32>
    %287 = arith.mulf %286, %284 : vector<2x16xf32>
    %288 = arith.mulf %277, %255 : vector<2x16xf32>
    %289 = arith.addf %287, %288 : vector<2x16xf32>
    %290 = vector.shape_cast %289 : vector<2x16xf32> to vector<2x1x16xf32>
    %c0_86 = arith.constant 0 : index
    %c5 = arith.constant 5 : index
    %c16_87 = arith.constant 16 : index
    %291 = vector.load %arg16[%c0_86, %c5, %c16_87] : memref<2x8x48xf32, #tpu.memory_space<vmem>>, vector<2x1x16xf32>
    tpu.vector_store %arg16[%c0_86, %c5, %c16_87], %290 {strides = array<i32>} : memref<2x8x48xf32, #tpu.memory_space<vmem>>, vector<2x1x16xf32>,
    %292 = arith.truncf %289 : vector<2x16xf32> to vector<2x16xbf16>
    %cst_88 = arith.constant dense<0.000000e+00> : vector<2x48xf32>
    %293 = tpu.matmul %292, %82, %cst_88 {dimension_numbers = #tpu.dot_dimension_numbers<[1], [0], [0], [1], [0, 0, 1, 1], [], []>} : vector<2x16xbf16>, vector<16x48xbf16>, vector<2x48xf32> -> vector<2x48xf32>
    %294 = vector.extract_strided_slice %79 {offsets = [0, 6, 0], sizes = [2, 1, 16], strides = [1, 1, 1]} : vector<2x8x16xf32> to vector<2x1x16xf32>
    %295 = vector.shape_cast %294 : vector<2x1x16xf32> to vector<2x16xf32>
    %296 = vector.extract_strided_slice %293 {offsets = [0, 0], sizes = [2, 16], strides = [1, 1]} : vector<2x48xf32> to vector<2x16xf32>
    %297 = arith.addf %295, %296 : vector<2x16xf32>
    %298 = arith.negf %297 : vector<2x16xf32>
    %299 = math.exp %298 : vector<2x16xf32>
    %cst_89 = arith.constant 1.000000e+00 : f32
    %300 = vector.broadcast %cst_89 : f32 to vector<2x16xf32>
    %301 = arith.addf %300, %299 : vector<2x16xf32>
    %302 = arith.divf %300, %301 : vector<2x16xf32>
    %303 = vector.extract_strided_slice %80 {offsets = [0, 6, 0], sizes = [2, 1, 16], strides = [1, 1, 1]} : vector<2x8x16xf32> to vector<2x1x16xf32>
    %304 = vector.shape_cast %303 : vector<2x1x16xf32> to vector<2x16xf32>
    %305 = vector.extract_strided_slice %293 {offsets = [0, 16], sizes = [2, 16], strides = [1, 1]} : vector<2x48xf32> to vector<2x16xf32>
    %306 = arith.addf %304, %305 : vector<2x16xf32>
    %307 = arith.negf %306 : vector<2x16xf32>
    %308 = math.exp %307 : vector<2x16xf32>
    %cst_90 = arith.constant 1.000000e+00 : f32
    %309 = vector.broadcast %cst_90 : f32 to vector<2x16xf32>
    %310 = arith.addf %309, %308 : vector<2x16xf32>
    %311 = arith.divf %309, %310 : vector<2x16xf32>
    %312 = vector.extract_strided_slice %81 {offsets = [0, 6, 0], sizes = [2, 1, 16], strides = [1, 1, 1]} : vector<2x8x16xf32> to vector<2x1x16xf32>
    %313 = vector.shape_cast %312 : vector<2x1x16xf32> to vector<2x16xf32>
    %314 = vector.extract_strided_slice %293 {offsets = [0, 32], sizes = [2, 16], strides = [1, 1]} : vector<2x48xf32> to vector<2x16xf32>
    %315 = arith.addf %314, %86 : vector<2x16xf32>
    %316 = arith.mulf %302, %315 : vector<2x16xf32>
    %317 = arith.addf %313, %316 : vector<2x16xf32>
    %318 = math.tanh %317 : vector<2x16xf32>
    %cst_91 = arith.constant 1.000000e+00 : f32
    %319 = vector.broadcast %cst_91 : f32 to vector<2x16xf32>
    %320 = arith.subf %319, %311 : vector<2x16xf32>
    %321 = arith.mulf %320, %318 : vector<2x16xf32>
    %322 = arith.mulf %311, %289 : vector<2x16xf32>
    %323 = arith.addf %321, %322 : vector<2x16xf32>
    %324 = vector.shape_cast %323 : vector<2x16xf32> to vector<2x1x16xf32>
    %c0_92 = arith.constant 0 : index
    %c6 = arith.constant 6 : index
    %c16_93 = arith.constant 16 : index
    %325 = vector.load %arg16[%c0_92, %c6, %c16_93] : memref<2x8x48xf32, #tpu.memory_space<vmem>>, vector<2x1x16xf32>
    tpu.vector_store %arg16[%c0_92, %c6, %c16_93], %324 {strides = array<i32>} : memref<2x8x48xf32, #tpu.memory_space<vmem>>, vector<2x1x16xf32>,
    %326 = arith.truncf %323 : vector<2x16xf32> to vector<2x16xbf16>
    %cst_94 = arith.constant dense<0.000000e+00> : vector<2x48xf32>
    %327 = tpu.matmul %326, %82, %cst_94 {dimension_numbers = #tpu.dot_dimension_numbers<[1], [0], [0], [1], [0, 0, 1, 1], [], []>} : vector<2x16xbf16>, vector<16x48xbf16>, vector<2x48xf32> -> vector<2x48xf32>
    %328 = vector.extract_strided_slice %79 {offsets = [0, 7, 0], sizes = [2, 1, 16], strides = [1, 1, 1]} : vector<2x8x16xf32> to vector<2x1x16xf32>
    %329 = vector.shape_cast %328 : vector<2x1x16xf32> to vector<2x16xf32>
    %330 = vector.extract_strided_slice %327 {offsets = [0, 0], sizes = [2, 16], strides = [1, 1]} : vector<2x48xf32> to vector<2x16xf32>
    %331 = arith.addf %329, %330 : vector<2x16xf32>
    %332 = arith.negf %331 : vector<2x16xf32>
    %333 = math.exp %332 : vector<2x16xf32>
    %cst_95 = arith.constant 1.000000e+00 : f32
    %334 = vector.broadcast %cst_95 : f32 to vector<2x16xf32>
    %335 = arith.addf %334, %333 : vector<2x16xf32>
    %336 = arith.divf %334, %335 : vector<2x16xf32>
    %337 = vector.extract_strided_slice %80 {offsets = [0, 7, 0], sizes = [2, 1, 16], strides = [1, 1, 1]} : vector<2x8x16xf32> to vector<2x1x16xf32>
    %338 = vector.shape_cast %337 : vector<2x1x16xf32> to vector<2x16xf32>
    %339 = vector.extract_strided_slice %327 {offsets = [0, 16], sizes = [2, 16], strides = [1, 1]} : vector<2x48xf32> to vector<2x16xf32>
    %340 = arith.addf %338, %339 : vector<2x16xf32>
    %341 = arith.negf %340 : vector<2x16xf32>
    %342 = math.exp %341 : vector<2x16xf32>
    %cst_96 = arith.constant 1.000000e+00 : f32
    %343 = vector.broadcast %cst_96 : f32 to vector<2x16xf32>
    %344 = arith.addf %343, %342 : vector<2x16xf32>
    %345 = arith.divf %343, %344 : vector<2x16xf32>
    %346 = vector.extract_strided_slice %81 {offsets = [0, 7, 0], sizes = [2, 1, 16], strides = [1, 1, 1]} : vector<2x8x16xf32> to vector<2x1x16xf32>
    %347 = vector.shape_cast %346 : vector<2x1x16xf32> to vector<2x16xf32>
    %348 = vector.extract_strided_slice %327 {offsets = [0, 32], sizes = [2, 16], strides = [1, 1]} : vector<2x48xf32> to vector<2x16xf32>
    %349 = arith.addf %348, %86 : vector<2x16xf32>
    %350 = arith.mulf %336, %349 : vector<2x16xf32>
    %351 = arith.addf %347, %350 : vector<2x16xf32>
    %352 = math.tanh %351 : vector<2x16xf32>
    %cst_97 = arith.constant 1.000000e+00 : f32
    %353 = vector.broadcast %cst_97 : f32 to vector<2x16xf32>
    %354 = arith.subf %353, %345 : vector<2x16xf32>
    %355 = arith.mulf %354, %352 : vector<2x16xf32>
    %356 = arith.mulf %345, %323 : vector<2x16xf32>
    %357 = arith.addf %355, %356 : vector<2x16xf32>
    %358 = vector.shape_cast %357 : vector<2x16xf32> to vector<2x1x16xf32>
    %c0_98 = arith.constant 0 : index
    %c7 = arith.constant 7 : index
    %c16_99 = arith.constant 16 : index
    %359 = vector.load %arg16[%c0_98, %c7, %c16_99] : memref<2x8x48xf32, #tpu.memory_space<vmem>>, vector<2x1x16xf32>
    tpu.vector_store %arg16[%c0_98, %c7, %c16_99], %358 {strides = array<i32>} : memref<2x8x48xf32, #tpu.memory_space<vmem>>, vector<2x1x16xf32>,
    return
  }
  func.func @transform_0(%arg0: i32) -> (i32, i32, i32) {
    %c0_i32 = arith.constant 0 : i32
    %c0_i32_0 = arith.constant 0 : i32
    %c0_i32_1 = arith.constant 0 : i32
    return %arg0, %c0_i32, %c0_i32_0 : i32, i32, i32
  }
  func.func @transform_1(%arg0: i32) -> (i32, i32, i32) {
    %c0_i32 = arith.constant 0 : i32
    %c0_i32_0 = arith.constant 0 : i32
    %c0_i32_1 = arith.constant 0 : i32
    return %arg0, %c0_i32, %c0_i32_0 : i32, i32, i32
  }
  func.func @transform_2(%arg0: i32) -> (i32, i32, i32) {
    %c0_i32 = arith.constant 0 : i32
    %c0_i32_0 = arith.constant 0 : i32
    %c0_i32_1 = arith.constant 0 : i32
    return %arg0, %c0_i32, %c0_i32_0 : i32, i32, i32
  }
  func.func @transform_3(%arg0: i32) -> (i32, i32) {
    %c0_i32 = arith.constant 0 : i32
    %c0_i32_0 = arith.constant 0 : i32
    %c0_i32_1 = arith.constant 0 : i32
    return %c0_i32, %c0_i32_0 : i32, i32
  }
  func.func @transform_4(%arg0: i32) -> (i32, i32) {
    %c0_i32 = arith.constant 0 : i32
    %c0_i32_0 = arith.constant 0 : i32
    %c0_i32_1 = arith.constant 0 : i32
    return %c0_i32, %c0_i32_0 : i32, i32
  }
  func.func @transform_5(%arg0: i32) -> (i32, i32) {
    %c0_i32 = arith.constant 0 : i32
    %c0_i32_0 = arith.constant 0 : i32
    %c0_i32_1 = arith.constant 0 : i32
    return %c0_i32, %c0_i32_0 : i32, i32
  }
  func.func @transform_6(%arg0: i32) -> (i32, i32) {
    %c0_i32 = arith.constant 0 : i32
    %c0_i32_0 = arith.constant 0 : i32
    %c0_i32_1 = arith.constant 0 : i32
    return %c0_i32, %c0_i32_0 : i32, i32
  }
  func.func @transform_7(%arg0: i32) -> (i32, i32) {
    %c0_i32 = arith.constant 0 : i32
    %c0_i32_0 = arith.constant 0 : i32
    %c0_i32_1 = arith.constant 0 : i32
    return %c0_i32, %c0_i32_0 : i32, i32
  }
  func.func @transform_8(%arg0: i32) -> (i32, i32) {
    %c0_i32 = arith.constant 0 : i32
    %c0_i32_0 = arith.constant 0 : i32
    %c0_i32_1 = arith.constant 0 : i32
    return %c0_i32, %c0_i32_0 : i32, i32
  }
  func.func @transform_9(%arg0: i32) -> (i32, i32) {
    %c0_i32 = arith.constant 0 : i32
    %c0_i32_0 = arith.constant 0 : i32
    %c0_i32_1 = arith.constant 0 : i32
    return %c0_i32, %c0_i32_0 : i32, i32
  }
  func.func @transform_10(%arg0: i32) -> (i32, i32) {
    %c0_i32 = arith.constant 0 : i32
    %c0_i32_0 = arith.constant 0 : i32
    %c0_i32_1 = arith.constant 0 : i32
    return %c0_i32, %c0_i32_0 : i32, i32
  }
  func.func @transform_11(%arg0: i32) -> (i32, i32) {
    %c0_i32 = arith.constant 0 : i32
    %c0_i32_0 = arith.constant 0 : i32
    %c0_i32_1 = arith.constant 0 : i32
    return %c0_i32, %c0_i32_0 : i32, i32
  }
  func.func @transform_12(%arg0: i32) -> (i32, i32) {
    %c0_i32 = arith.constant 0 : i32
    %c0_i32_0 = arith.constant 0 : i32
    %c0_i32_1 = arith.constant 0 : i32
    return %c0_i32, %c0_i32_0 : i32, i32
  }
  func.func @transform_13(%arg0: i32) -> (i32, i32) {
    %c0_i32 = arith.constant 0 : i32
    %c0_i32_0 = arith.constant 0 : i32
    %c0_i32_1 = arith.constant 0 : i32
    return %c0_i32, %c0_i32_0 : i32, i32
  }
  func.func @transform_14(%arg0: i32) -> (i32, i32) {
    %c0_i32 = arith.constant 0 : i32
    %c0_i32_0 = arith.constant 0 : i32
    %c0_i32_1 = arith.constant 0 : i32
    return %c0_i32, %c0_i32_0 : i32, i32
  }
  func.func @transform_15(%arg0: i32) -> (i32, i32, i32) {
    %c0_i32 = arith.constant 0 : i32
    %c0_i32_0 = arith.constant 0 : i32
    %c0_i32_1 = arith.constant 0 : i32
    return %arg0, %c0_i32, %c0_i32_0 : i32, i32, i32
  }
}

</mosaic_0001>

<bundles_post_ra>
// kernel: tpu_custom_call.1
= control target key start
LH: loop header
LB: loop body
LE: loop exit
PB: predicated region body
PF: predicated region fallthrough
CT: control target
= control target key end

     0   :  { %20 = vsyncpa [#allocation3], 0  ;;  %s2843_s0 = inlined_call_operand.hbm [shape: bf16[2,8,16], index: 0, kind: input, shape index: {}]   ;;  %s2844_s1 = inlined_call_operand.hbm [shape: bf16[2,8,16], index: 1, kind: input, shape index: {}]   ;;  %s2845_s2 = inlined_call_operand.hbm [shape: f32[2,8,16], index: 2, kind: input, shape index: {}]   ;;  %s2846_s3 = inlined_call_operand.vmem [shape: bf16[16,48], index: 3, kind: input, shape index: {}]   ;;  %s2847_s4 = inlined_call_operand.vmem [shape: f32[1,48], index: 4, kind: input, shape index: {}]   ;;  %s2848_s5 = inlined_call_operand.vmem [shape: bf16[16,16], index: 5, kind: input, shape index: {}]   ;;  %s2849_s6 = inlined_call_operand.hbm [shape: f32[1,16], index: 6, kind: input, shape index: {}]   ;;  %s2850_s7 = inlined_call_operand.vmem [shape: bf16[16,48], index: 7, kind: input, shape index: {}]   ;;  %s2851_s8 = inlined_call_operand.hbm [shape: bf16[16,48], index: 8, kind: input, shape index: {}]   ;;  %s2852_s9 = inlined_call_operand.hbm [shape: f32[1,48], index: 9, kind: input, shape index: {}]   ;;  %s2853_s10 = inlined_call_operand.hbm [shape: f32[1,16], index: 10, kind: input, shape index: {}]   ;;  %s2854_s11 = inlined_call_operand.vmem [shape: bf16[16,16], index: 11, kind: input, shape index: {}]   ;;  %s2855_s12 = inlined_call_operand.vmem [shape: bf16[16,16], index: 12, kind: input, shape index: {}]   ;;  %s2856_s13 = inlined_call_operand.vmem [shape: bf16[16,16], index: 13, kind: input, shape index: {}]   ;;  %s2857_s14 = inlined_call_operand.vmem [shape: f32[1,16], index: 14, kind: input, shape index: {}]   ;;  %s2858_s15 = inlined_call_operand.hbm [shape: f32[2,8,48], index: 15, kind: output, shape index: {}]  }
   0x1   :  { %21 = vsyncpa [#allocation6], 0 }
   0x2   :  { %22 = vsyncpa [#allocation9], 0 }
   0x3   :  { %23 = vsyncpa [#allocation12], 0 }
   0x4   :  { %24 = vsyncpa [#allocation4], 0  ;;  %s2274_s18 = smov [#allocation5]   ;;  %s2275_s20 = smov [#allocation8]  }
   0x5   :  { %s42_s19 = sshll.u32 %s2274_s18, 4  ;;  %s73_s21 = sshll.u32 %s2275_s20, 4  ;;  %s43_s19 = int_to_ptr.vmem [resolvable:$true] %s42_s19  ;;  %s2372_s21 = int_to_ptr.vmem [resolvable:$true] %s73_s21 }
   0x6   :  { %s2088_s24 = scalar_lea.hbm %s2844_s1, 128 }
   0x7   :  { %p2089_p0 = scmp.ne.s32.totalorder %s2844_s1, %s2088_s24  ;;  %p2092_p1 = scmp.lt.u32.totalorder %s2088_s24, %s2844_s1 }
   0x9   :  { %p2094_p2 = pnand %p2092_p1, %p2089_p0 }
   0xb   :  { %2097 = shalt.err (!%p2094_p2)
}
   0xc   :  { %s2098_s29 = scalar_lea.vmem %s43_s19, 128  ;;  %p2103_p4 = scmp.lt.s32.totalorder %s43_s19, %s43_s19 }
   0xd   :  { %p2099_p3 = scmp.ne.s32.totalorder %s43_s19, %s2098_s29  ;;  %p2104_p5 = scmp.lt.s32.totalorder %s2098_s29, %s2098_s29 }
   0xf   :  { %p2105_p6 = por %p2104_p5, %p2103_p4 }
  0x11   :  { %p2106_p7 = pnand %p2105_p6, %p2099_p3 }
  0x13   :  { %2109 = shalt.err (!%p2106_p7)
}
  0x14   :  { %s2276_s30 = smov 64   ;;  %s2277_s16 = smov 4  }
  0x15   :  { %48 = dma.hbm_to_vmem [thread:$0]  %s2844_s1, 128, %s43_s19, [#allocation6], %s2276_s30, %s2276_s30, %s2277_s16  }
  0x16   :  { %s2110_s23 = scalar_lea.hbm %s2849_s6, 16 }
  0x17   :  { %p2111_p8 = scmp.ne.s32.totalorder %s2849_s6, %s2110_s23  ;;  %p2114_p9 = scmp.lt.u32.totalorder %s2110_s23, %s2849_s6 }
  0x19   :  { %p2116_p10 = pnand %p2114_p9, %p2111_p8 }
  0x1b   :  { %2119 = shalt.err (!%p2116_p10)
}
  0x1c   :  { %s2120_s28 = scalar_lea.vmem %s2372_s21, 16  ;;  %s2124_s1 = scalar_lea.vmem %s2372_s21, 32 }
  0x1d   :  { %p2121_p11 = scmp.ne.s32.totalorder %s2372_s21, %s2120_s28  ;;  %p2125_p12 = scmp.lt.s32.totalorder %s2372_s21, %s2372_s21 }
  0x1e   :  { %p2126_p13 = scmp.lt.s32.totalorder %s2124_s1, %s2120_s28 }
  0x20   :  { %p2127_p0 = por %p2126_p13, %p2125_p12 }
  0x22   :  { %p2128_p1 = pnand %p2127_p0, %p2121_p11 }
  0x24   :  { %2131 = shalt.err (!%p2128_p1)
}
  0x25   :  { %76 = dma.hbm_to_vmem [thread:$0]  %s2849_s6, 16, %s2372_s21, [#allocation9]  }
  0x26   :  { %s2278_s17 = smov [#allocation11]   ;;  %s2279_s20 = smov [#allocation2]  }
  0x27   :  { %s97_s18 = sshll.u32 %s2278_s17, 4  ;;  %s30_s22 = sshll.u32 %s2279_s20, 4  ;;  %s98_s18 = int_to_ptr.vmem [resolvable:$true] %s97_s18  ;;  %s2407_s22 = int_to_ptr.vmem [resolvable:$true] %s30_s22 }
  0x28   :  { %s2132_s25 = scalar_lea.hbm %s2852_s9, 16 }
  0x29   :  { %p2133_p2 = scmp.ne.s32.totalorder %s2852_s9, %s2132_s25  ;;  %p2136_p3 = scmp.lt.u32.totalorder %s2132_s25, %s2852_s9 }
  0x2b   :  { %p2138_p4 = pnand %p2136_p3, %p2133_p2 }
  0x2d   :  { %2141 = shalt.err (!%p2138_p4)
}
  0x2e   :  { %s2142_s6 = scalar_lea.vmem %s98_s18, 16  ;;  %s2146_s21 = scalar_lea.vmem %s98_s18, 32 }
  0x2f   :  { %p2143_p5 = scmp.ne.s32.totalorder %s98_s18, %s2142_s6  ;;  %p2147_p6 = scmp.lt.s32.totalorder %s98_s18, %s98_s18 }
  0x30   :  { %p2148_p7 = scmp.lt.s32.totalorder %s2146_s21, %s2142_s6 }
  0x32   :  { %p2149_p8 = por %p2148_p7, %p2147_p6 }
  0x34   :  { %p2150_p9 = pnand %p2149_p8, %p2143_p5 }
  0x36   :  { %2153 = shalt.err (!%p2150_p9)
}
  0x37   :  { %100 = dma.hbm_to_vmem [thread:$0]  %s2852_s9, 16, %s98_s18, [#allocation12]  }
  0x38   :  { %s2154_s23 = scalar_lea.hbm %s2843_s0, 128 }
  0x39   :  { %p2155_p10 = scmp.ne.s32.totalorder %s2843_s0, %s2154_s23  ;;  %p2158_p11 = scmp.lt.u32.totalorder %s2154_s23, %s2843_s0 }
  0x3b   :  { %p2160_p12 = pnand %p2158_p11, %p2155_p10 }
  0x3d   :  { %2163 = shalt.err (!%p2160_p12)
}
  0x3e   :  { %s2164_s28 = scalar_lea.vmem %s2407_s22, 128  ;;  %p2169_p0 = scmp.lt.s32.totalorder %s2407_s22, %s2407_s22 }
  0x3f   :  { %p2165_p13 = scmp.ne.s32.totalorder %s2407_s22, %s2164_s28  ;;  %p2170_p1 = scmp.lt.s32.totalorder %s2164_s28, %s2164_s28 }
  0x41   :  { %p2171_p2 = por %p2170_p1, %p2169_p0 }
  0x43   :  { %p2172_p3 = pnand %p2171_p2, %p2165_p13 }
  0x45   :  { %2175 = shalt.err (!%p2172_p3)
}
  0x46   :  { %36 = dma.hbm_to_vmem [thread:$0]  %s2843_s0, 128, %s2407_s22, [#allocation3], %s2276_s30, %s2276_s30, %s2277_s16  }
  0x47   :  { %s2280_s1 = smov [#allocation7]   ;;  %s2176_s29 = scalar_lea.hbm %s2845_s2, 256 }
  0x48   :  { %s54_s6 = sshll.u32 %s2280_s1, 4  ;;  %p2177_p4 = scmp.ne.s32.totalorder %s2845_s2, %s2176_s29  ;;  %s55_s6 = int_to_ptr.vmem [resolvable:$true] %s54_s6 }
  0x49   :  { %p2180_p5 = scmp.lt.u32.totalorder %s2176_s29, %s2845_s2 }
  0x4b   :  { %p2182_p6 = pnand %p2180_p5, %p2177_p4 }
  0x4d   :  { %2185 = shalt.err (!%p2182_p6)
}
  0x4e   :  { %s2186_s25 = scalar_lea.vmem %s55_s6, 256  ;;  %p2191_p8 = scmp.lt.s32.totalorder %s55_s6, %s55_s6 }
  0x4f   :  { %p2187_p7 = scmp.ne.s32.totalorder %s55_s6, %s2186_s25  ;;  %p2192_p9 = scmp.lt.s32.totalorder %s2186_s25, %s2186_s25 }
  0x51   :  { %p2193_p10 = por %p2192_p9, %p2191_p8 }
  0x53   :  { %p2194_p11 = pnand %p2193_p10, %p2187_p7 }
  0x55   :  { %2197 = shalt.err (!%p2194_p11)
}
  0x56   :  { %s2281_s0 = smov 128   ;;  %s2282_s22 = smov 8  }
  0x57   :  { %60 = dma.hbm_to_vmem [thread:$0]  %s2845_s2, 256, %s55_s6, [#allocation6], %s2281_s0, %s2281_s0, %s2282_s22  }
  0x58   :  { %s2283_s28 = smov [#allocation10]   ;;  %s2284_s18 = smov [#allocation13]  }
  0x59   :  { %s84_s9 = sshll.u32 %s2283_s28, 4  ;;  %s107_s1 = sshll.u32 %s2284_s18, 4  ;;  %s85_s9 = int_to_ptr.vmem [resolvable:$true] %s84_s9  ;;  %s108_s1 = int_to_ptr.vmem [resolvable:$true] %s107_s1 }
  0x5a   :  { %s2198_s29 = scalar_lea.hbm %s2851_s8, 128 }
  0x5b   :  { %p2199_p12 = scmp.ne.s32.totalorder %s2851_s8, %s2198_s29  ;;  %p2202_p13 = scmp.lt.u32.totalorder %s2198_s29, %s2851_s8 }
  0x5d   :  { %p2204_p0 = pnand %p2202_p13, %p2199_p12 }
  0x5f   :  { %2207 = shalt.err (!%p2204_p0)
}
  0x60   :  { %s2208_s2 = scalar_lea.vmem %s85_s9, 128  ;;  %p2213_p2 = scmp.lt.s32.totalorder %s85_s9, %s85_s9 }
  0x61   :  { %p2209_p1 = scmp.ne.s32.totalorder %s85_s9, %s2208_s2  ;;  %p2214_p3 = scmp.lt.s32.totalorder %s2208_s2, %s2208_s2 }
  0x63   :  { %p2215_p4 = por %p2214_p3, %p2213_p2 }
  0x65   :  { %p2216_p5 = pnand %p2215_p4, %p2209_p1 }
  0x67   :  { %2219 = shalt.err (!%p2216_p5)
}
  0x68   :  { %90 = dma.hbm_to_vmem [thread:$0]  %s2851_s8, 128, %s85_s9, [#allocation9], %s2276_s30, %s2276_s30, %s2277_s16  }
  0x69   :  { %s2220_s28 = scalar_lea.hbm %s2853_s10, 16 }
  0x6a   :  { %p2221_p6 = scmp.ne.s32.totalorder %s2853_s10, %s2220_s28  ;;  %p2224_p7 = scmp.lt.u32.totalorder %s2220_s28, %s2853_s10 }
  0x6c   :  { %p2226_p8 = pnand %p2224_p7, %p2221_p6 }
  0x6e   :  { %2229 = shalt.err (!%p2226_p8)
}
  0x6f   :  { %s2230_s17 = scalar_lea.vmem %s108_s1, 16  ;;  %s2234_s20 = scalar_lea.vmem %s108_s1, 32 }
  0x70   :  { %p2231_p9 = scmp.ne.s32.totalorder %s108_s1, %s2230_s17  ;;  %p2235_p10 = scmp.lt.s32.totalorder %s108_s1, %s108_s1 }
  0x71   :  { %p2236_p11 = scmp.lt.s32.totalorder %s2234_s20, %s2230_s17 }
  0x73   :  { %p2237_p12 = por %p2236_p11, %p2235_p10 }
  0x75   :  { %p2238_p13 = pnand %p2237_p12, %p2231_p9 }
  0x77   :  { %2241 = shalt.err (!%p2238_p13)
}
  0x78   :  { %110 = dma.hbm_to_vmem [thread:$0]  %s2853_s10, 16, %s108_s1, [#allocation12]  }
  0x79   :  { %2264 = dma.done.wait [#allocation3], 128  }
  0x7a   :  { %2265 = vsyncadd [#allocation3], 4294967168 }
  0x7b   :  { %2266 = dma.done.wait [#allocation6], 384  }
  0x7c   :  { %2267 = vsyncadd [#allocation6], 4294966912 }
  0x7d   :  { %2268 = dma.done.wait [#allocation9], 144  }
  0x7e   :  { %2269 = vsyncadd [#allocation9], 4294967152 }
  0x7f   :  { %2270 = dma.done.wait [#allocation12], 32  }
  0x80   :  { %2271 = vsyncadd [#allocation12], 4294967264  ;;  %v2285_v0 = vmov 0.0   ;;  %vm2286_vm0 = vmmov 0   ;;  %v1975_v1 = vld [vmem:[%s2846_s3] sm:$0xff]   ;;  %vm163_vm1 = vcmask 130048  }
  0x81   :  { %1839 = vmatprep.subr.bf16.mxu0 %v2285_v0  ;;  %1841 = vmatprep.mubr.msk.bf16.mxu0 %vm2286_vm0, %v2285_v0  ;;  %v1976_v2 = vld [vmem:[#allocation2] sm:$0xff]   ;;  %s2287_s3 = smov 112   ;;  %vm310_vm2 = vcmask 64512   ;;  %vm340_vm3 = vcmask 1043456   ;;  %v1778_v51 = vld [vmem:[#allocation13] ss:$0 sm:$0xff] }
  0x82   :  { %1845 = vmatprep.subr.bf16.mxu1 %v2285_v0  ;;  %1847 = vmatprep.mubr.msk.bf16.mxu1 %vm2286_vm0, %v2285_v0  ;;  %v1756_v3 = vld [vmem:[%s2847_s4] ss:$0 sm:$0xff]  ;;  %s2288_s4 = smov 96   ;;  %s2289_s2 = smov 32   ;;  %v1979_v62 = vld [vmem:[#allocation5] sm:$0xff]   ;;  %vm885_vm4 = vcmask 1041409  }
  0x83   :  { %1840 = vmatpush3.bf16.msra.mxu0 %v1975_v1  ;;  %v1977_v50 = vld [vmem:[%s2848_s5] sm:$0xff]   ;;  %v2290_v1 = vmov 0   ;;  %vm686_vm7 = vcmask 392448   ;;  %vm875_vm8 = vcmask 254080   ;;  %vm996_vm9 = vcmask 255105  }
  0x84   :  { %1851 = vmatprep.subr.bf16.mxu0 %v2285_v0  ;;  %v1978_v57 = vld [vmem:[%s2850_s7] sm:$0xff]   ;;  %vm1118_vm10 = vcmask 256130   ;;  %vm1241_vm11 = vcmask 257155   ;;  %vm1364_vm12 = vcmask 258180   ;;  %vm1487_vm13 = vcmask 259205  }
  0x85   :  { %v2539_v63 = vld [vmem:[#allocation10] sm:$0xff]   ;;  %vm1610_vm14 = vcmask 260230   ;;  %vm1733_vm15 = vcmask 261255  }
  0x86   :  { %1842 = vmatmul.mubr.msk.bf16.vlgmr.msra.gmra.mrb[0].mxu0 %vm163_vm1, %v1976_v2  ;;  %v1764_v2 = vld [vmem:[#allocation8] ss:$0 sm:$0xff] }
  0x87   :  { %1853 = vmatprep.mubr.msk.bf16.mxu0 %vm2286_vm0, %v2285_v0 }
 0x159   :  { %v201_v4 = vpop.f32.mrb[0].mxu0 }
 0x15a   :  { %v202_v5 = vadd.f32 %v1756_v3, %v201_v4  ;;  %v1843_v6 = vpop.f32.mrb[1].mxu0 }
 0x15b   :  { %v204_v7 = vpop.f32.mrb[2].mxu0 }
 0x15c   :  { %v208_v8 = vpack.c.bf16 %v202_v5, %v202_v5  ;;  %v205_v9 = vadd.f32 %v1756_v3, %v204_v7  ;;  %v1844_v10 = vpop.f32.mrb[3].mxu0 }
 0x15e   :  { %211 = vrot.lane.b32.xlu0 %v208_v8, %s2287_s3  ;;  %v209_v11 = vpack.c.bf16 %v205_v9, %v205_v9 }
 0x162   :  { %260 = vrot.lane.b32.xlu0 %v209_v11, %s2287_s3 }
 0x1d0   :  { %v212_v12 = vpop.permute.xlu0 %211 }
 0x1d1   :  { %v217_v13 = vsel %vm163_vm1, %v212_v12, 0 }
 0x1d2   :  { %1846 = vmatpush3.bf16.xpose.msra.mxu1 %v217_v13 }
 0x1d3   :  { %1857 = vmatprep.subr.bf16.mxu1 %v2285_v0 }
 0x1d4   :  { %v261_v14 = vpop.permute.xlu0 %260 }
 0x1d5   :  { %v266_v15 = vsel %vm163_vm1, %v261_v14, 0 }
 0x1d6   :  { %1852 = vmatpush3.bf16.xpose.msra.mxu0 %v266_v15 }
 0x1d7   :  { %1863 = vmatprep.subr.bf16.mxu0 %v2285_v0 }
 0x1d9   :  { %1848 = vmatmul.mubr.msk.bf16.vlgmr.msra.gmra.mrb[0].mxu1 %vm163_vm1, %v208_v8 }
 0x1da   :  { %1859 = vmatprep.mubr.msk.bf16.mxu1 %vm2286_vm0, %v2285_v0 }
 0x1dd   :  { %1854 = vmatmul.mubr.msk.bf16.vlgmr.msra.gmra.mrb[4].mxu0 %vm163_vm1, %v209_v11 }
 0x1de   :  { %1865 = vmatprep.mubr.msk.bf16.mxu0 %vm2286_vm0, %v2285_v0 }
 0x2ac   :  { %v253_v16 = vpop.f32.mrb[0].mxu1 }
 0x2ad   :  { %v308_v17 = vmul.f32 0.25, %v253_v16  ;;  %v1849_v18 = vpop.f32.mrb[1].mxu1 }
 0x2ae   :  { %v256_v19 = vpop.f32.mrb[2].mxu1 }
 0x2af   :  { %v1850_v20 = vpop.f32.mrb[3].mxu1  ;;  %v311_v21 = vsel %vm310_vm2, %v308_v17, -inf }
 0x2b0   :  { %312 = vmax.xlane.f32.xlu1 %v311_v21  ;;  %v302_v22 = vpop.f32.mrb[4].mxu0  ;;  %v1774_v21 = vld [vmem:[#allocation11] ss:$0 sm:$0xff] }
 0x2b1   :  { %v309_v23 = vmul.f32 0.25, %v302_v22  ;;  %v1855_v24 = vpop.f32.mrb[5].mxu0 }
 0x2b2   :  { %v305_v25 = vpop.f32.mrb[6].mxu0 }
 0x2b3   :  { %v1856_v26 = vpop.f32.mrb[7].mxu0  ;;  %v314_v27 = vsel %vm310_vm2, %v309_v23, -inf }
 0x2b4   :  { %315 = vmax.xlane.f32.xlu1 %v314_v27 }
 0x2c5   :  { %335 = vrot.lane.b32.xlu1 %v208_v8, %s2288_s4 }
 0x33d   :  { %v313_v28 = vpop.xlane.xlu1 %312 }
 0x33e   :  { %v317_v29 = vsub.f32 %v308_v17, %v313_v28 }
 0x340   :  { %v319_v30 = vmul.f32 1.442695, %v317_v29 }
 0x341   :  { %v316_v31 = vpop.xlane.xlu1 %315 }
 0x342   :  { %1984 = vpow2.f32 %v319_v30  ;;  %v318_v32 = vsub.f32 %v309_v23, %v316_v31 }
 0x344   :  { %v321_v33 = vmul.f32 1.442695, %v318_v32 }
 0x345   :  { %v336_v34 = vpop.permute.xlu1 %335 }
 0x346   :  { %1986 = vpow2.f32 %v321_v33  ;;  %v342_v35 = vsel %vm340_vm3, %v336_v34, 0 }
 0x347   :  { %1858 = vmatpush3.bf16.msra.mxu1 %v342_v35 }
 0x348   :  { %1869 = vmatprep.subr.bf16.mxu1 %v2285_v0 }
 0x34c   :  { %v1985_v36 = vpop.eup %1984 }
 0x34d   :  { %v323_v37 = vsel %vm310_vm2, %v1985_v36, 0.0 }
 0x34e   :  { %324 = vadd.xlane.f32.xlu0 %v323_v37 }
 0x350   :  { %v1987_v38 = vpop.eup %1986 }
 0x351   :  { %v326_v39 = vsel %vm310_vm2, %v1987_v38, 0.0 }
 0x352   :  { %327 = vadd.xlane.f32.xlu1 %v326_v39 }
 0x363   :  { %384 = vrot.lane.b32.xlu1 %v209_v11, %s2288_s4 }
 0x367   :  { %833 = vrot.lane.b32.xlu1 %v1778_v51, %s2289_s2 }
 0x3db   :  { %v325_v40 = vpop.xlane.xlu0 %324 }
 0x3dc   :  { %1988 = vrcp.f32 %v325_v40 }
 0x3df   :  { %v328_v41 = vpop.xlane.xlu1 %327 }
 0x3e0   :  { %1990 = vrcp.f32 %v328_v41 }
 0x3e3   :  { %v385_v42 = vpop.permute.xlu1 %384 }
 0x3e4   :  { %v390_v43 = vsel %vm340_vm3, %v385_v42, 0 }
 0x3e5   :  { %1864 = vmatpush3.bf16.msra.mxu0 %v390_v43 }
 0x3e6   :  { %v1989_v44 = vpop.eup %1988  ;;  %1875 = vmatprep.subr.bf16.mxu0 %v2285_v0 }
 0x3e7   :  { %v331_v45 = vmul.f32 %v1989_v44, %v1985_v36  ;;  %v2552_v13 = vpop.permute.xlu1 %833 }
 0x3e9   :  { %v333_v46 = vpack.c.bf16 %v331_v45, %v331_v45 }
 0x3ea   :  { %v1991_v47 = vpop.eup %1990 }
 0x3eb   :  { %v332_v48 = vmul.f32 %v1991_v47, %v1987_v38  ;;  %1860 = vmatmul.mubr.msk.bf16.vlgmr.msra.gmra.mrb[4].mxu1 %vm310_vm2, %v333_v46 }
 0x3ec   :  { %1871 = vmatprep.mubr.msk.bf16.mxu1 %vm2286_vm0, %v2285_v0  ;;  %1870 = vmatpush3.bf16.msra.mxu1 %v1977_v50 }
 0x3ed   :  { %v334_v49 = vpack.c.bf16 %v332_v48, %v332_v48  ;;  %1893 = vmatprep.subr.bf16.mxu1 %v2285_v0 }
 0x3ef   :  { %1866 = vmatmul.mubr.msk.bf16.vlgmr.msra.gmra.mrb[8].mxu0 %vm310_vm2, %v334_v49 }
 0x3f0   :  { %1877 = vmatprep.mubr.msk.bf16.mxu0 %vm2286_vm0, %v2285_v0 }
 0x4be   :  { %v378_v52 = vpop.f32.mrb[4].mxu1 }
 0x4bf   :  { %v1861_v53 = vpop.f32.mrb[5].mxu1 }
 0x4c0   :  { %v381_v54 = vpop.f32.mrb[6].mxu1 }
 0x4c1   :  { %v1862_v55 = vpop.f32.mrb[7].mxu1 }
 0x4c2   :  { %v426_v56 = vpop.f32.mrb[8].mxu0 }
 0x4c3   :  { %v435_v58 = vpack.c.bf16 %v426_v56, %v378_v52  ;;  %v1867_v59 = vpop.f32.mrb[9].mxu0 }
 0x4c4   :  { %v429_v60 = vpop.f32.mrb[10].mxu0 }
 0x4c5   :  { %v1868_v61 = vpop.f32.mrb[11].mxu0  ;;  %1872 = vmatmul.mubr.msk.bf16.vlgmr.msra.gmra.mrb[8].mxu1 %vm163_vm1, %v435_v58 }
 0x4c6   :  { %1894 = vmatpush3.bf16.msra.mxu1 %v1978_v57  ;;  %1895 = vmatprep.mubr.msk.bf16.mxu1 %vm2286_vm0, %v2285_v0 }
 0x4c7   :  { %1899 = vmatprep.subr.bf16.mxu1 %v2285_v0 }
 0x4cd   :  { %1896 = vmatmul.mubr.msk.bf16.vlgmr.msra.gmra.mrb[12].mxu1 %vm163_vm1, %v1979_v62 }
 0x4ce   :  { %1900 = vmatpush3.bf16.msra.mxu1 %v2539_v63  ;;  %1901 = vmatprep.mubr.msk.bf16.mxu1 %vm2286_vm0, %v2285_v0 }
 0x4cf   :  { %1905 = vmatprep.subr.bf16.mxu1 %v2285_v0 }
 0x4d5   :  { %1902 = vmatmul.mubr.bf16.vlgmr.msra.gmra.mrb[16].mxu1 %v2290_v1 }
 0x4d6   :  { %1906 = vmatpush3.bf16.msra.mxu1 %v2539_v63  ;;  %1907 = vmatprep.mubr.msk.bf16.mxu1 %vm2286_vm0, %v2285_v0 }
 0x4d7   :  { %1917 = vmatprep.subr.bf16.mxu1 %v2285_v0 }
 0x598   :  { %v485_v3 = vpop.f32.mrb[8].mxu1 }
 0x599   :  { %v486_v4 = vadd.f32 %v1764_v2, %v485_v3  ;;  %v1873_v5 = vpop.f32.mrb[9].mxu1 }
 0x59a   :  { %v488_v6 = vpop.f32.mrb[10].mxu1 }
 0x59b   :  { %492 = vst.msk [vmem:[#allocation14] sm:$0xff] %vm163_vm1, %v486_v4  ;;  %v489_v7 = vadd.f32 %v1764_v2, %v488_v6  ;;  %v1874_v8 = vpop.f32.mrb[11].mxu1 }
 0x59d   :  { %493 = vst.msk [vmem:[#allocation14 + $0x8] sm:$0xff] %vm163_vm1, %v489_v7 }
 0x5a0   :  { %v748_v9 = vpop.f32.mrb[12].mxu1 }
 0x5a1   :  { %v1897_v10 = vpop.f32.mrb[13].mxu1  ;;  %v2560_v24 = vadd.f32 %v1774_v21, %v748_v9 }
 0x5a2   :  { %v751_v11 = vpop.f32.mrb[14].mxu1 }
 0x5a3   :  { %v1898_v12 = vpop.f32.mrb[15].mxu1  ;;  %v2557_v22 = vadd.f32 %v1774_v21, %v751_v11 }
 0x5a8   :  { %v808_v14 = vpop.f32.mrb[16].mxu1 }
 0x5a9   :  { %v836_v15 = vadd.f32 %v2552_v13, %v808_v14  ;;  %v1903_v16 = vpop.f32.mrb[17].mxu1  ;;  %v815_v20 = vrot.slane %v808_v14, 1  ;;  %v818_v25 = vadd.f32 %v808_v14, %v2560_v24 }
 0x5aa   :  { %v811_v17 = vpop.f32.mrb[18].mxu1 }
 0x5ab   :  { %839 = vrot.lane.b32.xlu0 %v836_v15, %s2288_s4  ;;  %v1904_v18 = vpop.f32.mrb[19].mxu1  ;;  %v838_v19 = vrot.slane %v836_v15, 1  ;;  %v819_v23 = vadd.f32 %v815_v20, %v2557_v22  ;;  %v1780_v27 = vmul.f32 -1.442695, %v818_v25 }
 0x5ad   :  { %841 = vrot.lane.b32.xlu1 %v838_v19, %s2288_s4  ;;  %v1781_v26 = vmul.f32 -1.442695, %v819_v23 }
 0x5af   :  { %1992 = vpow2.f32 %v1781_v26 }
 0x5b0   :  { %1994 = vpow2.f32 %v1780_v27 }
 0x5b9   :  { %v1993_v28 = vpop.eup %1992 }
 0x5ba   :  { %v827_v29 = vadd.f32 1.0, %v1993_v28  ;;  %v1995_v30 = vpop.eup %1994 }
 0x5bb   :  { %v826_v31 = vadd.f32 1.0, %v1995_v30  ;;  %v1981_v30 = vld [vmem:[%s2854_s11] sm:$0xff]  }
 0x5bc   :  { %1996 = vrcp.f32 %v827_v29  ;;  %1876 = vmatpush3.bf16.msra.mxu0 %v1981_v30 }
 0x5bd   :  { %1998 = vrcp.f32 %v826_v31  ;;  %v494_v31 = vld [vmem:[#allocation7] sm:$0xff]  ;;  %1881 = vmatprep.subr.bf16.mxu0 %v2285_v0 }
 0x5c6   :  { %v1997_v32 = vpop.eup %1996 }
 0x5c7   :  { %v1999_v36 = vpop.eup %1998  ;;  %v860_v44 = vsub.f32 1.0, %v1997_v32  ;;  %v872_v46 = vmul.f32 0.0, %v1997_v32 }
 0x5c8   :  { %v859_v49 = vsub.f32 1.0, %v1999_v36  ;;  %v871_v52 = vmul.f32 0.0, %v1999_v36 }
 0x61d   :  { %v840_v35 = vpop.permute.xlu0 %839 }
 0x61e   :  { %v845_v37 = vmul.f32 %v1999_v36, %v840_v35 }
 0x61f   :  { %v842_v33 = vpop.permute.xlu1 %841 }
 0x620   :  { %v846_v34 = vmul.f32 %v1997_v32, %v842_v33  ;;  %v495_v32 = vld [vmem:[#allocation7 + $0x8] sm:$0xff]  ;;  %v496_v33 = vlaneseq }
 0x621   :  { %v500_v35 = vrot.slane %v495_v32, 7 }
 0x622   :  { %851 = vrot.lane.b32.xlu1 %v846_v34, %s2289_s2  ;;  %v499_v34 = vrot.slane %v494_v31, 7  ;;  %v497_v36 = vshrl.u32 %v496_v33, 7 }
 0x624   :  { %vm498_vm5 = vcmp.eq.s32.totalorder %v497_v36, 0  ;;  %vm503_vm6 = vcmp.eq.s32.totalorder %v497_v36, 7 }
 0x626   :  { %849 = vrot.lane.b32.xlu1 %v845_v37, %s2289_s2  ;;  %v501_v37 = vsel %vm498_vm5, 0.0, %v499_v34 }
 0x694   :  { %v852_v38 = vpop.permute.xlu1 %851 }
 0x695   :  { %v856_v39 = vadd.f32 %v852_v38, %v2557_v22  ;;  %v502_v38 = vsel %vm498_vm5, 0.0, %v500_v35 }
 0x697   :  { %2000 = vtanh.f32 %v856_v39  ;;  %v1982_v39 = vld [vmem:[%s2855_s12] sm:$0xff]  }
 0x698   :  { %v850_v40 = vpop.permute.xlu1 %849 }
 0x699   :  { %v855_v41 = vadd.f32 %v850_v40, %v2560_v24  ;;  %v510_v40 = vpack.c.bf16 %v502_v38, %v501_v37 }
 0x69b   :  { %2002 = vtanh.f32 %v855_v41  ;;  %1878 = vmatmul.mubr.msk.bf16.vlgmr.msra.gmra.mrb[12].mxu0 %vm163_vm1, %v510_v40  ;;  %v563_v41 = vpack.c.bf16 %v495_v32, %v494_v31 }
 0x69c   :  { %1882 = vmatpush3.bf16.msra.mxu0 %v1982_v39  ;;  %1883 = vmatprep.mubr.msk.bf16.mxu0 %vm2286_vm0, %v2285_v0 }
 0x69d   :  { %1887 = vmatprep.subr.bf16.mxu0 %v2285_v0 }
 0x6a1   :  { %v2001_v42 = vpop.eup %2000 }
 0x6a2   :  { %865 = vrot.lane.b32.xlu1 %v2001_v42, %s2287_s3  ;;  %v1983_v42 = vld [vmem:[%s2856_s13] sm:$0xff]  }
 0x6a5   :  { %v2003_v43 = vpop.eup %2002 }
 0x6a6   :  { %863 = vrot.lane.b32.xlu1 %v2003_v43, %s2287_s3  ;;  %v504_v43 = vrot.slane %v494_v31, 1 }
 0x6a7   :  { %1884 = vmatmul.mubr.msk.bf16.vlgmr.msra.gmra.mrb[12].mxu0 %vm163_vm1, %v563_v41 }
 0x6a8   :  { %1888 = vmatpush3.bf16.msra.mxu0 %v1983_v42  ;;  %1889 = vmatprep.mubr.msk.bf16.mxu0 %vm2286_vm0, %v2285_v0 }
 0x6a9   :  { %1911 = vmatprep.subr.bf16.mxu0 %v2285_v0 }
 0x714   :  { %v866_v45 = vpop.permute.xlu1 %865 }
 0x715   :  { %v870_v47 = vmul.f32 %v866_v45, %v860_v44  ;;  %v505_v44 = vrot.slane %v495_v32, 1  ;;  %v506_v45 = vsel %vm503_vm6, 0.0, %v504_v43 }
 0x717   :  { %v2569_v48 = vadd.f32 %v872_v46, %v870_v47  ;;  %v507_v46 = vsel %vm503_vm6, 0.0, %v505_v44 }
 0x718   :  { %v864_v50 = vpop.permute.xlu1 %863  ;;  %v619_v47 = vpack.c.bf16 %v507_v46, %v506_v45 }
 0x719   :  { %v879_v51 = vpack.c.bf16 %v2569_v48, %v2569_v48  ;;  %v869_v53 = vmul.f32 %v864_v50, %v859_v49  ;;  %v989_v50 = vrot.slane %v2569_v48, 7 }
 0x71a   :  { %1890 = vmatmul.mubr.msk.bf16.vlgmr.msra.gmra.mrb[12].mxu0 %vm163_vm1, %v619_v47 }
 0x71b   :  { %v883_v54 = vunpack.c.l.b16 %v879_v51  ;;  %v2573_v55 = vadd.f32 %v871_v52, %v869_v53  ;;  %1912 = vmatpush3.bf16.msra.mxu0 %v2539_v63  ;;  %1913 = vmatprep.mubr.msk.bf16.mxu0 %vm2286_vm0, %v2285_v0 }
 0x71c   :  { %1923 = vmatprep.subr.bf16.mxu0 %v2285_v0 }
 0x71d   :  { %v878_v56 = vpack.c.bf16 %v2573_v55, %v2573_v55  ;;  %v884_v57 = vrot.slane %v883_v54, 7 }
 0x71f   :  { %v882_v58 = vunpack.c.l.b16 %v878_v56  ;;  %v988_v56 = vrot.slane %v2573_v55, 7 }
 0x721   :  { %v886_v59 = vsel %vm885_vm4, %v884_v57, %v882_v58 }
 0x722   :  { %v887_v60 = vpack.c.b16 %v886_v59, %v886_v59 }
 0x724   :  { %888 = vrot.lane.b32.xlu1 %v887_v60, %s2287_s3 }
 0x796   :  { %v889_v61 = vpop.permute.xlu1 %888 }
 0x797   :  { %1908 = vmatmul.mubr.msk.bf16.vlgmr.msra.gmra.mrb[20].mxu1 %vm163_vm1, %v889_v61 }
 0x798   :  { %1918 = vmatpush3.bf16.msra.mxu1 %v2539_v63  ;;  %1919 = vmatprep.mubr.msk.bf16.mxu1 %vm2286_vm0, %v2285_v0 }
 0x799   :  { %1929 = vmatprep.subr.bf16.mxu1 %v2285_v0 }
 0x86a   :  { %v927_v62 = vpop.f32.mrb[20].mxu1 }
 0x86b   :  { %v951_v1 = vadd.f32 %v927_v62, %v2552_v13  ;;  %v1909_v2 = vpop.f32.mrb[21].mxu1  ;;  %v934_v6 = vrot.slane %v927_v62, 7  ;;  %v938_v7 = vadd.f32 %v927_v62, %v2557_v22 }
 0x86c   :  { %v930_v3 = vpop.f32.mrb[22].mxu1 }
 0x86d   :  { %956 = vrot.lane.b32.xlu1 %v951_v1, %s2288_s4  ;;  %v1910_v4 = vpop.f32.mrb[23].mxu1  ;;  %v953_v5 = vrot.slane %v951_v1, 7  ;;  %v937_v8 = vadd.f32 %v934_v6, %v2560_v24  ;;  %v1784_v9 = vmul.f32 -1.442695, %v938_v7 }
 0x86f   :  { %954 = vrot.lane.b32.xlu0 %v953_v5, %s2288_s4  ;;  %v1783_v10 = vmul.f32 -1.442695, %v937_v8  ;;  %2004 = vpow2.f32 %v1784_v9  ;;  %v2631_v8 = vpop.f32.mrb[12].mxu0 }
 0x870   :  { %v1891_v9 = vpop.f32.mrb[13].mxu0 }
 0x871   :  { %2006 = vpow2.f32 %v1783_v10  ;;  %v2636_v10 = vpop.f32.mrb[14].mxu0 }
 0x879   :  { %v2005_v11 = vpop.eup %2004 }
 0x87a   :  { %v946_v14 = vadd.f32 1.0, %v2005_v11  ;;  %v1892_v11 = vpop.f32.mrb[15].mxu0 }
 0x87b   :  { %v2007_v12 = vpop.eup %2006 }
 0x87c   :  { %v945_v15 = vadd.f32 1.0, %v2007_v12  ;;  %2008 = vrcp.f32 %v946_v14 }
 0x87e   :  { %2010 = vrcp.f32 %v945_v15 }
 0x886   :  { %v2009_v16 = vpop.eup %2008 }
 0x887   :  { %v975_v49 = vsub.f32 1.0, %v2009_v16  ;;  %v993_v52 = vmul.f32 %v2009_v16, %v989_v50 }
 0x888   :  { %v2011_v19 = vpop.eup %2010 }
 0x889   :  { %v974_v54 = vsub.f32 1.0, %v2011_v19  ;;  %v992_v59 = vmul.f32 %v2011_v19, %v988_v56 }
 0x8df   :  { %v957_v17 = vpop.permute.xlu1 %956 }
 0x8e0   :  { %v961_v18 = vmul.f32 %v2009_v16, %v957_v17 }
 0x8e1   :  { %v955_v20 = vpop.permute.xlu0 %954 }
 0x8e2   :  { %v960_v21 = vmul.f32 %v2011_v19, %v955_v20  ;;  %966 = vrot.lane.b32.xlu1 %v961_v18, %s2289_s2 }
 0x8e4   :  { %964 = vrot.lane.b32.xlu0 %v960_v21, %s2289_s2 }
 0x954   :  { %v967_v23 = vpop.permute.xlu1 %966 }
 0x955   :  { %v971_v25 = vadd.f32 %v967_v23, %v2557_v22 }
 0x956   :  { %v965_v26 = vpop.permute.xlu0 %964 }
 0x957   :  { %2012 = vtanh.f32 %v971_v25  ;;  %v970_v27 = vadd.f32 %v965_v26, %v2560_v24 }
 0x959   :  { %2014 = vtanh.f32 %v970_v27 }
 0x961   :  { %v2013_v28 = vpop.eup %2012 }
 0x962   :  { %980 = vrot.lane.b32.xlu1 %v2013_v28, %s2287_s3 }
 0x963   :  { %v2015_v29 = vpop.eup %2014 }
 0x964   :  { %978 = vrot.lane.b32.xlu0 %v2015_v29, %s2287_s3 }
 0x9d4   :  { %v981_v51 = vpop.permute.xlu1 %980 }
 0x9d5   :  { %v985_v53 = vmul.f32 %v981_v51, %v975_v49 }
 0x9d6   :  { %v979_v57 = vpop.permute.xlu0 %978 }
 0x9d7   :  { %v2620_v58 = vadd.f32 %v993_v52, %v985_v53  ;;  %v984_v60 = vmul.f32 %v979_v57, %v974_v54 }
 0x9d9   :  { %v2622_v61 = vadd.f32 %v992_v59, %v984_v60  ;;  %v1000_v62 = vpack.c.bf16 %v2620_v58, %v2620_v58  ;;  %v1111_v45 = vrot.slane %v2620_v58, 7 }
 0x9db   :  { %v999_v1 = vpack.c.bf16 %v2622_v61, %v2622_v61  ;;  %v1004_v3 = vunpack.c.l.b16 %v1000_v62  ;;  %v1110_v49 = vrot.slane %v2622_v61, 7 }
 0x9dd   :  { %v1003_v2 = vunpack.c.l.b16 %v999_v1 }
 0x9df   :  { %v1005_v4 = vrot.slane %v1003_v2, 1 }
 0x9e1   :  { %v1006_v5 = vsel %vm885_vm4, %v1004_v3, %v1005_v4 }
 0x9e2   :  { %v1007_v6 = vpack.c.b16 %v1006_v5, %v1006_v5 }
 0x9e4   :  { %1008 = vrot.lane.b32.xlu0 %v1007_v6, %s2287_s3 }
 0xa56   :  { %v1009_v7 = vpop.permute.xlu0 %1008 }
 0xa57   :  { %1914 = vmatmul.mubr.msk.bf16.vlgmr.msra.gmra.mrb[16].mxu0 %vm163_vm1, %v1009_v7 }
 0xa58   :  { %1924 = vmatpush3.bf16.msra.mxu0 %v2539_v63  ;;  %1925 = vmatprep.mubr.msk.bf16.mxu0 %vm2286_vm0, %v2285_v0 }
 0xa59   :  { %1935 = vmatprep.subr.bf16.mxu0 %v2285_v0 }
 0xb2a   :  { %v1047_v12 = vpop.f32.mrb[16].mxu0 }
 0xb2b   :  { %v1072_v14 = vadd.f32 %v1047_v12, %v2552_v13  ;;  %v1915_v15 = vpop.f32.mrb[17].mxu0  ;;  %v1054_v20 = vrot.slane %v1047_v12, 6  ;;  %v1055_v21 = vrot.slane %v1047_v12, 7 }
 0xb2c   :  { %v1050_v16 = vpop.f32.mrb[18].mxu0 }
 0xb2d   :  { %v1916_v17 = vpop.f32.mrb[19].mxu0  ;;  %v1075_v18 = vrot.slane %v1072_v14, 7  ;;  %v1074_v19 = vrot.slane %v1072_v14, 6  ;;  %v1058_v23 = vadd.f32 %v1054_v20, %v2560_v24  ;;  %v1059_v25 = vadd.f32 %v1055_v21, %v2557_v22 }
 0xb2f   :  { %1078 = vrot.lane.b32.xlu0 %v1075_v18, %s2288_s4  ;;  %1076 = vrot.lane.b32.xlu1 %v1074_v19, %s2288_s4  ;;  %v1786_v26 = vmul.f32 -1.442695, %v1058_v23  ;;  %v1787_v27 = vmul.f32 -1.442695, %v1059_v25 }
 0xb31   :  { %2016 = vpow2.f32 %v1786_v26 }
 0xb32   :  { %2018 = vpow2.f32 %v1787_v27 }
 0xb3b   :  { %v2017_v28 = vpop.eup %2016 }
 0xb3c   :  { %v2019_v29 = vpop.eup %2018  ;;  %v1066_v30 = vadd.f32 1.0, %v2017_v28 }
 0xb3d   :  { %v1067_v31 = vadd.f32 1.0, %v2019_v29 }
 0xb3e   :  { %2020 = vrcp.f32 %v1066_v30 }
 0xb3f   :  { %2022 = vrcp.f32 %v1067_v31 }
 0xb48   :  { %v2021_v32 = vpop.eup %2020 }
 0xb49   :  { %v2023_v33 = vpop.eup %2022  ;;  %v1096_v47 = vsub.f32 1.0, %v2021_v32  ;;  %v1114_v53 = vmul.f32 %v2021_v32, %v1110_v49 }
 0xb4a   :  { %v1097_v44 = vsub.f32 1.0, %v2023_v33  ;;  %v1115_v50 = vmul.f32 %v2023_v33, %v1111_v45 }
 0xba1   :  { %v1079_v34 = vpop.permute.xlu0 %1078  ;;  %v1077_v35 = vpop.permute.xlu1 %1076 }
 0xba2   :  { %v1083_v36 = vmul.f32 %v2023_v33, %v1079_v34  ;;  %v1082_v37 = vmul.f32 %v2021_v32, %v1077_v35 }
 0xba4   :  { %1088 = vrot.lane.b32.xlu0 %v1083_v36, %s2289_s2  ;;  %1086 = vrot.lane.b32.xlu1 %v1082_v37, %s2289_s2 }
 0xc16   :  { %v1089_v38 = vpop.permute.xlu0 %1088  ;;  %v1087_v39 = vpop.permute.xlu1 %1086 }
 0xc17   :  { %v1093_v40 = vadd.f32 %v1089_v38, %v2557_v22  ;;  %v1092_v41 = vadd.f32 %v1087_v39, %v2560_v24 }
 0xc19   :  { %2024 = vtanh.f32 %v1093_v40 }
 0xc1a   :  { %2026 = vtanh.f32 %v1092_v41 }
 0xc23   :  { %v2025_v42 = vpop.eup %2024 }
 0xc24   :  { %v2027_v43 = vpop.eup %2026  ;;  %1102 = vrot.lane.b32.xlu0 %v2025_v42, %s2287_s3 }
 0xc25   :  { %1100 = vrot.lane.b32.xlu1 %v2027_v43, %s2287_s3 }
 0xc96   :  { %v1103_v46 = vpop.permute.xlu0 %1102 }
 0xc97   :  { %v1107_v51 = vmul.f32 %v1103_v46, %v1097_v44  ;;  %v1101_v52 = vpop.permute.xlu1 %1100 }
 0xc98   :  { %v1106_v54 = vmul.f32 %v1101_v52, %v1096_v47 }
 0xc99   :  { %v2652_v56 = vadd.f32 %v1115_v50, %v1107_v51 }
 0xc9a   :  { %v2654_v57 = vadd.f32 %v1114_v53, %v1106_v54 }
 0xc9b   :  { %v1122_v59 = vpack.c.bf16 %v2652_v56, %v2652_v56  ;;  %v1234_v42 = vrot.slane %v2652_v56, 7 }
 0xc9c   :  { %v1121_v60 = vpack.c.bf16 %v2654_v57, %v2654_v57  ;;  %v1233_v45 = vrot.slane %v2654_v57, 7 }
 0xc9d   :  { %v1126_v62 = vunpack.c.l.b16 %v1122_v59 }
 0xc9e   :  { %v1125_v1 = vunpack.c.l.b16 %v1121_v60 }
 0xc9f   :  { %v1128_v2 = vrot.slane %v1126_v62, 1 }
 0xca0   :  { %v1127_v3 = vrot.slane %v1125_v1, 2 }
 0xca2   :  { %v1129_v4 = vsel %vm885_vm4, %v1128_v2, %v1127_v3 }
 0xca3   :  { %v1130_v5 = vpack.c.b16 %v1129_v4, %v1129_v4 }
 0xca5   :  { %1131 = vrot.lane.b32.xlu1 %v1130_v5, %s2287_s3 }
 0xd17   :  { %v1132_v6 = vpop.permute.xlu1 %1131 }
 0xd18   :  { %1920 = vmatmul.mubr.msk.bf16.vlgmr.msra.gmra.mrb[24].mxu1 %vm163_vm1, %v1132_v6 }
 0xd19   :  { %1930 = vmatpush3.bf16.msra.mxu1 %v2539_v63  ;;  %1931 = vmatprep.mubr.msk.bf16.mxu1 %vm2286_vm0, %v2285_v0 }
 0xd1a   :  { %1941 = vmatprep.subr.bf16.mxu1 %v2285_v0 }
 0xdeb   :  { %v1170_v7 = vpop.f32.mrb[24].mxu1 }
 0xdec   :  { %v1195_v9 = vadd.f32 %v1170_v7, %v2552_v13  ;;  %v1921_v11 = vpop.f32.mrb[25].mxu1  ;;  %v1177_v17 = vrot.slane %v1170_v7, 5  ;;  %v1178_v18 = vrot.slane %v1170_v7, 6 }
 0xded   :  { %v1173_v12 = vpop.f32.mrb[26].mxu1 }
 0xdee   :  { %v1922_v14 = vpop.f32.mrb[27].mxu1  ;;  %v1198_v15 = vrot.slane %v1195_v9, 6  ;;  %v1197_v16 = vrot.slane %v1195_v9, 5  ;;  %v1181_v19 = vadd.f32 %v1177_v17, %v2560_v24  ;;  %v1182_v20 = vadd.f32 %v1178_v18, %v2557_v22 }
 0xdf0   :  { %1201 = vrot.lane.b32.xlu1 %v1198_v15, %s2288_s4  ;;  %1199 = vrot.lane.b32.xlu0 %v1197_v16, %s2288_s4  ;;  %v1789_v21 = vmul.f32 -1.442695, %v1181_v19  ;;  %v1790_v23 = vmul.f32 -1.442695, %v1182_v20 }
 0xdf2   :  { %2028 = vpow2.f32 %v1789_v21 }
 0xdf3   :  { %2030 = vpow2.f32 %v1790_v23 }
 0xdfc   :  { %v2029_v25 = vpop.eup %2028 }
 0xdfd   :  { %v2031_v26 = vpop.eup %2030  ;;  %v1189_v27 = vadd.f32 1.0, %v2029_v25 }
 0xdfe   :  { %v1190_v28 = vadd.f32 1.0, %v2031_v26 }
 0xdff   :  { %2032 = vrcp.f32 %v1189_v27 }
 0xe00   :  { %2034 = vrcp.f32 %v1190_v28 }
 0xe09   :  { %v2033_v29 = vpop.eup %2032 }
 0xe0a   :  { %v2035_v30 = vpop.eup %2034  ;;  %v1219_v44 = vsub.f32 1.0, %v2033_v29  ;;  %v1237_v50 = vmul.f32 %v2033_v29, %v1233_v45 }
 0xe0b   :  { %v1220_v41 = vsub.f32 1.0, %v2035_v30  ;;  %v1238_v46 = vmul.f32 %v2035_v30, %v1234_v42 }
 0xe62   :  { %v1202_v31 = vpop.permute.xlu1 %1201  ;;  %v1200_v32 = vpop.permute.xlu0 %1199 }
 0xe63   :  { %v1206_v33 = vmul.f32 %v2035_v30, %v1202_v31  ;;  %v1205_v34 = vmul.f32 %v2033_v29, %v1200_v32 }
 0xe65   :  { %1211 = vrot.lane.b32.xlu1 %v1206_v33, %s2289_s2  ;;  %1209 = vrot.lane.b32.xlu0 %v1205_v34, %s2289_s2 }
 0xed7   :  { %v1212_v35 = vpop.permute.xlu1 %1211  ;;  %v1210_v36 = vpop.permute.xlu0 %1209 }
 0xed8   :  { %v1216_v37 = vadd.f32 %v1212_v35, %v2557_v22  ;;  %v1215_v38 = vadd.f32 %v1210_v36, %v2560_v24 }
 0xeda   :  { %2036 = vtanh.f32 %v1216_v37 }
 0xedb   :  { %2038 = vtanh.f32 %v1215_v38 }
 0xee4   :  { %v2037_v39 = vpop.eup %2036 }
 0xee5   :  { %v2039_v40 = vpop.eup %2038  ;;  %1225 = vrot.lane.b32.xlu1 %v2037_v39, %s2287_s3 }
 0xee6   :  { %1223 = vrot.lane.b32.xlu0 %v2039_v40, %s2287_s3 }
 0xf57   :  { %v1226_v43 = vpop.permute.xlu1 %1225 }
 0xf58   :  { %v1230_v47 = vmul.f32 %v1226_v43, %v1220_v41  ;;  %v1224_v49 = vpop.permute.xlu0 %1223 }
 0xf59   :  { %v1229_v51 = vmul.f32 %v1224_v49, %v1219_v44 }
 0xf5a   :  { %v2680_v52 = vadd.f32 %v1238_v46, %v1230_v47 }
 0xf5b   :  { %v2682_v53 = vadd.f32 %v1237_v50, %v1229_v51 }
 0xf5c   :  { %v1245_v54 = vpack.c.bf16 %v2680_v52, %v2680_v52  ;;  %v1357_v41 = vrot.slane %v2680_v52, 7 }
 0xf5d   :  { %v1244_v59 = vpack.c.bf16 %v2682_v53, %v2682_v53  ;;  %v1356_v44 = vrot.slane %v2682_v53, 7 }
 0xf5e   :  { %v1249_v60 = vunpack.c.l.b16 %v1245_v54 }
 0xf5f   :  { %v1248_v62 = vunpack.c.l.b16 %v1244_v59 }
 0xf60   :  { %v1251_v1 = vrot.slane %v1249_v60, 2 }
 0xf61   :  { %v1250_v2 = vrot.slane %v1248_v62, 3 }
 0xf63   :  { %v1252_v3 = vsel %vm885_vm4, %v1251_v1, %v1250_v2 }
 0xf64   :  { %v1253_v4 = vpack.c.b16 %v1252_v3, %v1252_v3 }
 0xf66   :  { %1254 = vrot.lane.b32.xlu0 %v1253_v4, %s2287_s3 }
 0xfd8   :  { %v1255_v5 = vpop.permute.xlu0 %1254 }
 0xfd9   :  { %1926 = vmatmul.mubr.msk.bf16.vlgmr.msra.gmra.mrb[20].mxu0 %vm163_vm1, %v1255_v5 }
 0xfda   :  { %1936 = vmatpush3.bf16.msra.mxu0 %v2539_v63  ;;  %1937 = vmatprep.mubr.msk.bf16.mxu0 %vm2286_vm0, %v2285_v0 }
0x10ac   :  { %v1293_v6 = vpop.f32.mrb[20].mxu0 }
0x10ad   :  { %v1318_v7 = vadd.f32 %v1293_v6, %v2552_v13  ;;  %v1927_v9 = vpop.f32.mrb[21].mxu0  ;;  %v1300_v16 = vrot.slane %v1293_v6, 4  ;;  %v1301_v17 = vrot.slane %v1293_v6, 5 }
0x10ae   :  { %v1296_v11 = vpop.f32.mrb[22].mxu0 }
0x10af   :  { %v1928_v12 = vpop.f32.mrb[23].mxu0  ;;  %v1321_v14 = vrot.slane %v1318_v7, 5  ;;  %v1320_v15 = vrot.slane %v1318_v7, 4  ;;  %v1304_v18 = vadd.f32 %v1300_v16, %v2560_v24  ;;  %v1305_v19 = vadd.f32 %v1301_v17, %v2557_v22 }
0x10b1   :  { %1324 = vrot.lane.b32.xlu0 %v1321_v14, %s2288_s4  ;;  %1322 = vrot.lane.b32.xlu1 %v1320_v15, %s2288_s4  ;;  %v1792_v20 = vmul.f32 -1.442695, %v1304_v18  ;;  %v1793_v21 = vmul.f32 -1.442695, %v1305_v19 }
0x10b3   :  { %2040 = vpow2.f32 %v1792_v20 }
0x10b4   :  { %2042 = vpow2.f32 %v1793_v21 }
0x10bd   :  { %v2041_v23 = vpop.eup %2040 }
0x10be   :  { %v2043_v25 = vpop.eup %2042  ;;  %v1312_v26 = vadd.f32 1.0, %v2041_v23 }
0x10bf   :  { %v1313_v27 = vadd.f32 1.0, %v2043_v25 }
0x10c0   :  { %2044 = vrcp.f32 %v1312_v26 }
0x10c1   :  { %2046 = vrcp.f32 %v1313_v27 }
0x10ca   :  { %v2045_v28 = vpop.eup %2044 }
0x10cb   :  { %v2047_v29 = vpop.eup %2046  ;;  %v1342_v43 = vsub.f32 1.0, %v2045_v28  ;;  %v1360_v49 = vmul.f32 %v2045_v28, %v1356_v44 }
0x10cc   :  { %v1343_v40 = vsub.f32 1.0, %v2047_v29  ;;  %v1361_v45 = vmul.f32 %v2047_v29, %v1357_v41 }
0x1123   :  { %v1325_v30 = vpop.permute.xlu0 %1324  ;;  %v1323_v31 = vpop.permute.xlu1 %1322 }
0x1124   :  { %v1329_v32 = vmul.f32 %v2047_v29, %v1325_v30  ;;  %v1328_v33 = vmul.f32 %v2045_v28, %v1323_v31 }
0x1126   :  { %1334 = vrot.lane.b32.xlu0 %v1329_v32, %s2289_s2  ;;  %1332 = vrot.lane.b32.xlu1 %v1328_v33, %s2289_s2 }
0x1198   :  { %v1335_v34 = vpop.permute.xlu0 %1334  ;;  %v1333_v35 = vpop.permute.xlu1 %1332 }
0x1199   :  { %v1339_v36 = vadd.f32 %v1335_v34, %v2557_v22  ;;  %v1338_v37 = vadd.f32 %v1333_v35, %v2560_v24 }
0x119b   :  { %2048 = vtanh.f32 %v1339_v36 }
0x119c   :  { %2050 = vtanh.f32 %v1338_v37 }
0x11a5   :  { %v2049_v38 = vpop.eup %2048 }
0x11a6   :  { %v2051_v39 = vpop.eup %2050  ;;  %1348 = vrot.lane.b32.xlu0 %v2049_v38, %s2287_s3 }
0x11a7   :  { %1346 = vrot.lane.b32.xlu1 %v2051_v39, %s2287_s3 }
0x1218   :  { %v1349_v42 = vpop.permute.xlu0 %1348 }
0x1219   :  { %v1353_v46 = vmul.f32 %v1349_v42, %v1343_v40  ;;  %v1347_v47 = vpop.permute.xlu1 %1346 }
0x121a   :  { %v1352_v50 = vmul.f32 %v1347_v47, %v1342_v43 }
0x121b   :  { %v2707_v51 = vadd.f32 %v1361_v45, %v1353_v46 }
0x121c   :  { %v2709_v54 = vadd.f32 %v1360_v49, %v1352_v50 }
0x121d   :  { %v1368_v59 = vpack.c.bf16 %v2707_v51, %v2707_v51  ;;  %v1480_v40 = vrot.slane %v2707_v51, 7 }
0x121e   :  { %v1367_v60 = vpack.c.bf16 %v2709_v54, %v2709_v54  ;;  %v1479_v43 = vrot.slane %v2709_v54, 7 }
0x121f   :  { %v1372_v62 = vunpack.c.l.b16 %v1368_v59 }
0x1220   :  { %v1371_v1 = vunpack.c.l.b16 %v1367_v60 }
0x1221   :  { %v1374_v2 = vrot.slane %v1372_v62, 3 }
0x1222   :  { %v1373_v3 = vrot.slane %v1371_v1, 4 }
0x1224   :  { %v1375_v4 = vsel %vm885_vm4, %v1374_v2, %v1373_v3 }
0x1225   :  { %v1376_v5 = vpack.c.b16 %v1375_v4, %v1375_v4 }
0x1227   :  { %1377 = vrot.lane.b32.xlu1 %v1376_v5, %s2287_s3 }
0x1299   :  { %v1378_v6 = vpop.permute.xlu1 %1377 }
0x129a   :  { %1932 = vmatmul.mubr.msk.bf16.vlgmr.msra.gmra.mrb[28].mxu1 %vm163_vm1, %v1378_v6 }
0x129b   :  { %1942 = vmatpush3.bf16.msra.mxu1 %v2539_v63  ;;  %1943 = vmatprep.mubr.msk.bf16.mxu1 %vm2286_vm0, %v2285_v0 }
0x136d   :  { %v1416_v7 = vpop.f32.mrb[28].mxu1 }
0x136e   :  { %v1441_v9 = vadd.f32 %v1416_v7, %v2552_v13  ;;  %v1933_v11 = vpop.f32.mrb[29].mxu1  ;;  %v1423_v17 = vrot.slane %v1416_v7, 3  ;;  %v1424_v18 = vrot.slane %v1416_v7, 4 }
0x136f   :  { %v1419_v12 = vpop.f32.mrb[30].mxu1 }
0x1370   :  { %v1934_v14 = vpop.f32.mrb[31].mxu1  ;;  %v1444_v15 = vrot.slane %v1441_v9, 4  ;;  %v1443_v16 = vrot.slane %v1441_v9, 3  ;;  %v1427_v19 = vadd.f32 %v1423_v17, %v2560_v24  ;;  %v1428_v63 = vadd.f32 %v1424_v18, %v2557_v22 }
0x1372   :  { %1447 = vrot.lane.b32.xlu1 %v1444_v15, %s2288_s4  ;;  %1445 = vrot.lane.b32.xlu0 %v1443_v16, %s2288_s4  ;;  %v1795_v20 = vmul.f32 -1.442695, %v1427_v19  ;;  %v1796_v0 = vmul.f32 -1.442695, %v1428_v63 }
0x1374   :  { %2052 = vpow2.f32 %v1795_v20 }
0x1375   :  { %2054 = vpow2.f32 %v1796_v0 }
0x137e   :  { %v2053_v21 = vpop.eup %2052 }
0x137f   :  { %v2055_v23 = vpop.eup %2054  ;;  %v1435_v25 = vadd.f32 1.0, %v2053_v21 }
0x1380   :  { %v1436_v26 = vadd.f32 1.0, %v2055_v23 }
0x1381   :  { %2056 = vrcp.f32 %v1435_v25 }
0x1382   :  { %2058 = vrcp.f32 %v1436_v26 }
0x138b   :  { %v2057_v27 = vpop.eup %2056 }
0x138c   :  { %v2059_v28 = vpop.eup %2058  ;;  %v1465_v42 = vsub.f32 1.0, %v2057_v27  ;;  %v1483_v47 = vmul.f32 %v2057_v27, %v1479_v43 }
0x138d   :  { %v1466_v39 = vsub.f32 1.0, %v2059_v28  ;;  %v1484_v44 = vmul.f32 %v2059_v28, %v1480_v40 }
0x13e4   :  { %v1448_v29 = vpop.permute.xlu1 %1447  ;;  %v1446_v30 = vpop.permute.xlu0 %1445 }
0x13e5   :  { %v1452_v31 = vmul.f32 %v2059_v28, %v1448_v29  ;;  %v1451_v32 = vmul.f32 %v2057_v27, %v1446_v30 }
0x13e7   :  { %1457 = vrot.lane.b32.xlu1 %v1452_v31, %s2289_s2  ;;  %1455 = vrot.lane.b32.xlu0 %v1451_v32, %s2289_s2 }
0x1459   :  { %v1458_v33 = vpop.permute.xlu1 %1457  ;;  %v1456_v34 = vpop.permute.xlu0 %1455 }
0x145a   :  { %v1462_v35 = vadd.f32 %v1458_v33, %v2557_v22  ;;  %v1461_v36 = vadd.f32 %v1456_v34, %v2560_v24 }
0x145c   :  { %2060 = vtanh.f32 %v1462_v35 }
0x145d   :  { %2062 = vtanh.f32 %v1461_v36 }
0x1466   :  { %v2061_v37 = vpop.eup %2060 }
0x1467   :  { %v2063_v38 = vpop.eup %2062  ;;  %1471 = vrot.lane.b32.xlu1 %v2061_v37, %s2287_s3 }
0x1468   :  { %1469 = vrot.lane.b32.xlu0 %v2063_v38, %s2287_s3 }
0x14d9   :  { %v1472_v41 = vpop.permute.xlu1 %1471 }
0x14da   :  { %v1476_v45 = vmul.f32 %v1472_v41, %v1466_v39  ;;  %v1470_v46 = vpop.permute.xlu0 %1469 }
0x14db   :  { %v1475_v49 = vmul.f32 %v1470_v46, %v1465_v42 }
0x14dc   :  { %v2734_v50 = vadd.f32 %v1484_v44, %v1476_v45 }
0x14dd   :  { %v2736_v59 = vadd.f32 %v1483_v47, %v1475_v49 }
0x14de   :  { %v1491_v60 = vpack.c.bf16 %v2734_v50, %v2734_v50  ;;  %v1603_v41 = vrot.slane %v2734_v50, 7 }
0x14df   :  { %v1490_v62 = vpack.c.bf16 %v2736_v59, %v2736_v59  ;;  %v1602_v44 = vrot.slane %v2736_v59, 7 }
0x14e0   :  { %v1495_v1 = vunpack.c.l.b16 %v1491_v60 }
0x14e1   :  { %v1494_v2 = vunpack.c.l.b16 %v1490_v62 }
0x14e2   :  { %v1497_v3 = vrot.slane %v1495_v1, 4 }
0x14e3   :  { %v1496_v4 = vrot.slane %v1494_v2, 5 }
0x14e5   :  { %v1498_v5 = vsel %vm885_vm4, %v1497_v3, %v1496_v4 }
0x14e6   :  { %v1499_v6 = vpack.c.b16 %v1498_v5, %v1498_v5 }
0x14e8   :  { %1500 = vrot.lane.b32.xlu0 %v1499_v6, %s2287_s3 }
0x155a   :  { %v1501_v7 = vpop.permute.xlu0 %1500 }
0x155b   :  { %1938 = vmatmul.mubr.msk.bf16.vlgmr.msra.gmra.mrb[24].mxu0 %vm163_vm1, %v1501_v7 }
0x162e   :  { %v1539_v9 = vpop.f32.mrb[24].mxu0 }
0x162f   :  { %v1564_v11 = vadd.f32 %v1539_v9, %v2552_v13  ;;  %v1939_v12 = vpop.f32.mrb[25].mxu0  ;;  %v1546_v18 = vrot.slane %v1539_v9, 2  ;;  %v1547_v19 = vrot.slane %v1539_v9, 3 }
0x1630   :  { %v1542_v14 = vpop.f32.mrb[26].mxu0 }
0x1631   :  { %v1940_v15 = vpop.f32.mrb[27].mxu0  ;;  %v1567_v16 = vrot.slane %v1564_v11, 3  ;;  %v1566_v17 = vrot.slane %v1564_v11, 2  ;;  %v1550_v63 = vadd.f32 %v1546_v18, %v2560_v24  ;;  %v1551_v20 = vadd.f32 %v1547_v19, %v2557_v22 }
0x1633   :  { %1570 = vrot.lane.b32.xlu0 %v1567_v16, %s2288_s4  ;;  %1568 = vrot.lane.b32.xlu1 %v1566_v17, %s2288_s4  ;;  %v1798_v0 = vmul.f32 -1.442695, %v1550_v63  ;;  %v1799_v21 = vmul.f32 -1.442695, %v1551_v20 }
0x1635   :  { %2064 = vpow2.f32 %v1798_v0 }
0x1636   :  { %2066 = vpow2.f32 %v1799_v21 }
0x163f   :  { %v2065_v23 = vpop.eup %2064 }
0x1640   :  { %v2067_v25 = vpop.eup %2066  ;;  %v1558_v26 = vadd.f32 1.0, %v2065_v23 }
0x1641   :  { %v1559_v27 = vadd.f32 1.0, %v2067_v25 }
0x1642   :  { %2068 = vrcp.f32 %v1558_v26 }
0x1643   :  { %2070 = vrcp.f32 %v1559_v27 }
0x164c   :  { %v2069_v28 = vpop.eup %2068 }
0x164d   :  { %v2071_v29 = vpop.eup %2070  ;;  %v1588_v43 = vsub.f32 1.0, %v2069_v28  ;;  %v1606_v49 = vmul.f32 %v2069_v28, %v1602_v44 }
0x164e   :  { %v1589_v40 = vsub.f32 1.0, %v2071_v29  ;;  %v1607_v45 = vmul.f32 %v2071_v29, %v1603_v41  ;;  %v1771_v41 = vld [vmem:[%s2857_s14] ss:$0 sm:$0xff]  ;;  %s2291_s14 = smov [#allocation14]  }
0x164f   :  { %v670_v44 = vadd.f32 %v1771_v41, %v2631_v8  ;;  %s1741_s18 = sshll.u32 %s2291_s14, 4  ;;  %s2790_s18 = int_to_ptr.vmem [resolvable:$true] %s1741_s18 }
0x1650   :  { %s2242_s21 = scalar_lea.vmem %s2790_s18, 256  ;;  %p2247_p1 = scmp.lt.s32.totalorder %s2790_s18, %s2790_s18 }
0x1651   :  { %p2243_p0 = scmp.ne.s32.totalorder %s2790_s18, %s2242_s21  ;;  %p2248_p2 = scmp.lt.s32.totalorder %s2242_s21, %s2242_s21 }
0x1653   :  { %p2249_p3 = por %p2248_p2, %p2247_p1 }
0x1655   :  { %p2250_p4 = pnand %p2249_p3, %p2243_p0 }
0x16a5   :  { %v1571_v30 = vpop.permute.xlu0 %1570  ;;  %v1569_v31 = vpop.permute.xlu1 %1568 }
0x16a6   :  { %v1575_v32 = vmul.f32 %v2071_v29, %v1571_v30  ;;  %v1574_v33 = vmul.f32 %v2069_v28, %v1569_v31 }
0x16a8   :  { %1580 = vrot.lane.b32.xlu0 %v1575_v32, %s2289_s2  ;;  %1578 = vrot.lane.b32.xlu1 %v1574_v33, %s2289_s2 }
0x171a   :  { %v1581_v34 = vpop.permute.xlu0 %1580  ;;  %v1579_v35 = vpop.permute.xlu1 %1578 }
0x171b   :  { %v1585_v36 = vadd.f32 %v1581_v34, %v2557_v22  ;;  %v1584_v37 = vadd.f32 %v1579_v35, %v2560_v24 }
0x171d   :  { %2072 = vtanh.f32 %v1585_v36 }
0x171e   :  { %2074 = vtanh.f32 %v1584_v37 }
0x1727   :  { %v2073_v38 = vpop.eup %2072 }
0x1728   :  { %v2075_v39 = vpop.eup %2074  ;;  %1594 = vrot.lane.b32.xlu0 %v2073_v38, %s2287_s3 }
0x1729   :  { %1592 = vrot.lane.b32.xlu1 %v2075_v39, %s2287_s3 }
0x179a   :  { %v1595_v42 = vpop.permute.xlu0 %1594 }
0x179b   :  { %v1599_v46 = vmul.f32 %v1595_v42, %v1589_v40  ;;  %v1593_v47 = vpop.permute.xlu1 %1592 }
0x179c   :  { %v1598_v60 = vmul.f32 %v1593_v47, %v1588_v43  ;;  %v673_v43 = vadd.f32 %v1771_v41, %v2636_v10 }
0x179d   :  { %v2758_v62 = vadd.f32 %v1607_v45, %v1599_v46 }
0x179e   :  { %v2760_v1 = vadd.f32 %v1606_v49, %v1598_v60 }
0x179f   :  { %v1614_v2 = vpack.c.bf16 %v2758_v62, %v2758_v62 }
0x17a0   :  { %v1613_v3 = vpack.c.bf16 %v2760_v1, %v2760_v1 }
0x17a1   :  { %v1618_v4 = vunpack.c.l.b16 %v1614_v2 }
0x17a2   :  { %v1617_v5 = vunpack.c.l.b16 %v1613_v3 }
0x17a3   :  { %v1620_v6 = vrot.slane %v1618_v4, 5 }
0x17a4   :  { %v1619_v7 = vrot.slane %v1617_v5, 6 }
0x17a6   :  { %v1621_v9 = vsel %vm885_vm4, %v1620_v6, %v1619_v7 }
0x17a7   :  { %v1622_v11 = vpack.c.b16 %v1621_v9, %v1621_v9 }
0x17a9   :  { %1623 = vrot.lane.b32.xlu1 %v1622_v11, %s2287_s3 }
0x181b   :  { %v1624_v12 = vpop.permute.xlu1 %1623 }
0x181c   :  { %1944 = vmatmul.mubr.msk.bf16.vlgmr.msra.gmra.mrb[32].mxu1 %vm163_vm1, %v1624_v12 }
0x18ef   :  { %v1662_v14 = vpop.f32.mrb[32].mxu1 }
0x18f0   :  { %v1687_v15 = vadd.f32 %v1662_v14, %v2552_v13  ;;  %v1945_v16 = vpop.f32.mrb[33].mxu1  ;;  %v1669_v20 = vrot.slane %v1662_v14, 1  ;;  %v1670_v0 = vrot.slane %v1662_v14, 2 }
0x18f1   :  { %v1665_v17 = vpop.f32.mrb[34].mxu1 }
0x18f2   :  { %v1946_v18 = vpop.f32.mrb[35].mxu1  ;;  %v1690_v19 = vrot.slane %v1687_v15, 2  ;;  %v1689_v63 = vrot.slane %v1687_v15, 1  ;;  %v1673_v21 = vadd.f32 %v1669_v20, %v2560_v24  ;;  %v1674_v23 = vadd.f32 %v1670_v0, %v2557_v22 }
0x18f4   :  { %1693 = vrot.lane.b32.xlu1 %v1690_v19, %s2288_s4  ;;  %1691 = vrot.lane.b32.xlu0 %v1689_v63, %s2288_s4  ;;  %v1801_v25 = vmul.f32 -1.442695, %v1673_v21  ;;  %v1802_v26 = vmul.f32 -1.442695, %v1674_v23 }
0x18f6   :  { %2076 = vpow2.f32 %v1801_v25 }
0x18f7   :  { %2078 = vpow2.f32 %v1802_v26 }
0x1900   :  { %v2077_v13 = vpop.eup %2076 }
0x1901   :  { %v2079_v27 = vpop.eup %2078  ;;  %v1681_v28 = vadd.f32 1.0, %v2077_v13 }
0x1902   :  { %v1682_v29 = vadd.f32 1.0, %v2079_v27 }
0x1903   :  { %2080 = vrcp.f32 %v1681_v28 }
0x1904   :  { %2082 = vrcp.f32 %v1682_v29 }
0x190d   :  { %v2081_v30 = vpop.eup %2080 }
0x190e   :  { %v2083_v31 = vpop.eup %2082  ;;  %v1711_v49 = vsub.f32 1.0, %v2081_v30 }
0x190f   :  { %v1712_v45 = vsub.f32 1.0, %v2083_v31 }
0x1966   :  { %v1694_v32 = vpop.permute.xlu1 %1693  ;;  %v1692_v33 = vpop.permute.xlu0 %1691 }
0x1967   :  { %v1698_v34 = vmul.f32 %v2083_v31, %v1694_v32  ;;  %v1697_v35 = vmul.f32 %v2081_v30, %v1692_v33 }
0x1969   :  { %1703 = vrot.lane.b32.xlu1 %v1698_v34, %s2289_s2  ;;  %1701 = vrot.lane.b32.xlu0 %v1697_v35, %s2289_s2 }
0x19db   :  { %v1704_v36 = vpop.permute.xlu1 %1703  ;;  %v1702_v37 = vpop.permute.xlu0 %1701 }
0x19dc   :  { %v1708_v38 = vadd.f32 %v1704_v36, %v2557_v22  ;;  %v1707_v39 = vadd.f32 %v1702_v37, %v2560_v24  ;;  %v1726_v22 = vrot.slane %v2758_v62, 7  ;;  %v1725_v24 = vrot.slane %v2760_v1, 7 }
0x19de   :  { %2084 = vtanh.f32 %v1708_v38  ;;  %v1730_v46 = vmul.f32 %v2083_v31, %v1726_v22  ;;  %v1729_v60 = vmul.f32 %v2081_v30, %v1725_v24 }
0x19df   :  { %2086 = vtanh.f32 %v1707_v39 }
0x19e8   :  { %v2085_v40 = vpop.eup %2084 }
0x19e9   :  { %v2087_v42 = vpop.eup %2086  ;;  %1717 = vrot.lane.b32.xlu1 %v2085_v40, %s2287_s3 }
0x19ea   :  { %1715 = vrot.lane.b32.xlu0 %v2087_v42, %s2287_s3 }
0x19ed   :  { %682 = vrot.lane.b32.xlu1 %v673_v43, %s2289_s2 }
0x19ee   :  { %680 = vrot.lane.b32.xlu0 %v670_v44, %s2289_s2 }
0x1a5b   :  { %v1718_v47 = vpop.permute.xlu1 %1717 }
0x1a5c   :  { %v1722_v2 = vmul.f32 %v1718_v47, %v1712_v45  ;;  %v1716_v3 = vpop.permute.xlu0 %1715 }
0x1a5d   :  { %v1721_v10 = vmul.f32 %v1716_v3, %v1711_v49 }
0x1a5e   :  { %v1732_v8 = vadd.f32 %v1730_v46, %v1722_v2 }
0x1a5f   :  { %v1731_v4 = vadd.f32 %v1729_v60, %v1721_v10  ;;  %v683_v5 = vpop.permute.xlu1 %682 }
0x1a60   :  { %688 = vst.msk [vmem:[#allocation14 + $0x8] sm:$0xff] %vm686_vm7, %v683_v5  ;;  %v681_v6 = vpop.permute.xlu0 %680 }
0x1a61   :  { %877 = vst.msk [vmem:[#allocation14 + $0x8] sm:$0x1] %vm875_vm8, %v2569_v48 }
0x1a62   :  { %998 = vst.msk [vmem:[#allocation14 + $0x8] sm:$0x2] %vm996_vm9, %v2620_v58 }
0x1a63   :  { %1120 = vst.msk [vmem:[#allocation14 + $0x8] sm:$0x4] %vm1118_vm10, %v2652_v56 }
0x1a64   :  { %1243 = vst.msk [vmem:[#allocation14 + $0x8] sm:$0x8] %vm1241_vm11, %v2680_v52 }
0x1a65   :  { %1366 = vst.msk [vmem:[#allocation14 + $0x8] sm:$0x10] %vm1364_vm12, %v2707_v51 }
0x1a66   :  { %1489 = vst.msk [vmem:[#allocation14 + $0x8] sm:$0x20] %vm1487_vm13, %v2734_v50 }
0x1a67   :  { %1612 = vst.msk [vmem:[#allocation14 + $0x8] sm:$0x40] %vm1610_vm14, %v2758_v62 }
0x1a68   :  { %1735 = vst.msk [vmem:[#allocation14 + $0x8] sm:$0x80] %vm1733_vm15, %v1732_v8 }
0x1a69   :  { %687 = vst.msk [vmem:[#allocation14] sm:$0xff] %vm686_vm7, %v681_v6 }
0x1a6a   :  { %876 = vst.msk [vmem:[#allocation14] sm:$0x1] %vm875_vm8, %v2573_v55 }
0x1a6b   :  { %997 = vst.msk [vmem:[#allocation14] sm:$0x2] %vm996_vm9, %v2622_v61 }
0x1a6c   :  { %1119 = vst.msk [vmem:[#allocation14] sm:$0x4] %vm1118_vm10, %v2654_v57 }
0x1a6d   :  { %1242 = vst.msk [vmem:[#allocation14] sm:$0x8] %vm1241_vm11, %v2682_v53 }
0x1a6e   :  { %1365 = vst.msk [vmem:[#allocation14] sm:$0x10] %vm1364_vm12, %v2709_v54 }
0x1a6f   :  { %1488 = vst.msk [vmem:[#allocation14] sm:$0x20] %vm1487_vm13, %v2736_v59 }
0x1a70   :  { %1611 = vst.msk [vmem:[#allocation14] sm:$0x40] %vm1610_vm14, %v2760_v1 }
0x1a71   :  { %1734 = vst.msk [vmem:[#allocation14] sm:$0x80] %vm1733_vm15, %v1731_v4 }
0x1a72   :  { %2253 = shalt.err (!%p2250_p4)
}
0x1a73   :  { %s2254_s17 = scalar_lea.hbm %s2858_s15, 256 }
0x1a74   :  { %p2255_p5 = scmp.ne.s32.totalorder %s2858_s15, %s2254_s17  ;;  %p2258_p6 = scmp.lt.u32.totalorder %s2254_s17, %s2858_s15 }
0x1a76   :  { %p2260_p7 = pnand %p2258_p6, %p2255_p5 }
0x1a78   :  { %2263 = shalt.err (!%p2260_p7)
}
0x1a79   :  { %1747 = dma.vmem_to_hbm [thread:$0]  %s2790_s18, 256, %s2858_s15, [#allocation4], %s2281_s0, %s2281_s0, %s2282_s22  }
0x1a7a   :  { %2272 = dma.done.wait [#allocation4], 256  }
0x1a7b   :  { %2273 = vsyncadd [#allocation4], 4294967040 }
0x1a7c   :  { %1751 = vsyncpa [#allocation3], 1 }
0x1a7d   :  { %1752 = vsyncpa [#allocation6], 1 }
0x1a7e   :  { %1753 = vsyncpa [#allocation9], 1 }
0x1a7f   :  { %1754 = vsyncpa [#allocation12], 1 }
0x1a80   :  { %1755 = vsyncpa [#allocation4], 1 }

// kernel: tpu_custom_call.1
= control target key start
LH: loop header
LB: loop body
LE: loop exit
PB: predicated region body
PF: predicated region fallthrough
CT: control target
= control target key end

     0   :  { %20 = vsyncpa [#allocation3], 0  ;;  %s2843_s0 = inlined_call_operand.hbm [shape: bf16[2,8,16], index: 0, kind: input, shape index: {}]   ;;  %s2844_s1 = inlined_call_operand.hbm [shape: bf16[2,8,16], index: 1, kind: input, shape index: {}]   ;;  %s2845_s2 = inlined_call_operand.hbm [shape: f32[2,8,16], index: 2, kind: input, shape index: {}]   ;;  %s2846_s3 = inlined_call_operand.vmem [shape: bf16[16,48], index: 3, kind: input, shape index: {}]   ;;  %s2847_s4 = inlined_call_operand.vmem [shape: f32[1,48], index: 4, kind: input, shape index: {}]   ;;  %s2848_s5 = inlined_call_operand.vmem [shape: bf16[16,16], index: 5, kind: input, shape index: {}]   ;;  %s2849_s6 = inlined_call_operand.hbm [shape: f32[1,16], index: 6, kind: input, shape index: {}]   ;;  %s2850_s7 = inlined_call_operand.vmem [shape: bf16[16,48], index: 7, kind: input, shape index: {}]   ;;  %s2851_s8 = inlined_call_operand.hbm [shape: bf16[16,48], index: 8, kind: input, shape index: {}]   ;;  %s2852_s9 = inlined_call_operand.hbm [shape: f32[1,48], index: 9, kind: input, shape index: {}]   ;;  %s2853_s10 = inlined_call_operand.hbm [shape: f32[1,16], index: 10, kind: input, shape index: {}]   ;;  %s2854_s11 = inlined_call_operand.vmem [shape: bf16[16,16], index: 11, kind: input, shape index: {}]   ;;  %s2855_s12 = inlined_call_operand.vmem [shape: bf16[16,16], index: 12, kind: input, shape index: {}]   ;;  %s2856_s13 = inlined_call_operand.vmem [shape: bf16[16,16], index: 13, kind: input, shape index: {}]   ;;  %s2857_s14 = inlined_call_operand.vmem [shape: f32[1,16], index: 14, kind: input, shape index: {}]   ;;  %s2858_s15 = inlined_call_operand.hbm [shape: f32[2,8,48], index: 15, kind: output, shape index: {}]  }
   0x1   :  { %21 = vsyncpa [#allocation6], 0 }
   0x2   :  { %22 = vsyncpa [#allocation9], 0 }
   0x3   :  { %23 = vsyncpa [#allocation12], 0 }
   0x4   :  { %24 = vsyncpa [#allocation4], 0  ;;  %s2274_s18 = smov [#allocation5]   ;;  %s2275_s20 = smov [#allocation8]  }
   0x5   :  { %s42_s19 = sshll.u32 %s2274_s18, 4  ;;  %s73_s21 = sshll.u32 %s2275_s20, 4  ;;  %s43_s19 = int_to_ptr.vmem [resolvable:$true] %s42_s19  ;;  %s2372_s21 = int_to_ptr.vmem [resolvable:$true] %s73_s21 }
   0x6   :  { %s2088_s24 = scalar_lea.hbm %s2844_s1, 128 }
   0x7   :  { %p2089_p0 = scmp.ne.s32.totalorder %s2844_s1, %s2088_s24  ;;  %p2092_p1 = scmp.lt.u32.totalorder %s2088_s24, %s2844_s1 }
   0x9   :  { %p2094_p2 = pnand %p2092_p1, %p2089_p0 }
   0xb   :  { %2097 = shalt.err (!%p2094_p2)
}
   0xc   :  { %s2098_s29 = scalar_lea.vmem %s43_s19, 128  ;;  %p2103_p4 = scmp.lt.s32.totalorder %s43_s19, %s43_s19 }
   0xd   :  { %p2099_p3 = scmp.ne.s32.totalorder %s43_s19, %s2098_s29  ;;  %p2104_p5 = scmp.lt.s32.totalorder %s2098_s29, %s2098_s29 }
   0xf   :  { %p2105_p6 = por %p2104_p5, %p2103_p4 }
  0x11   :  { %p2106_p7 = pnand %p2105_p6, %p2099_p3 }
  0x13   :  { %2109 = shalt.err (!%p2106_p7)
}
  0x14   :  { %s2276_s30 = smov 64   ;;  %s2277_s16 = smov 4  }
  0x15   :  { %48 = dma.hbm_to_vmem [thread:$0]  %s2844_s1, 128, %s43_s19, [#allocation6], %s2276_s30, %s2276_s30, %s2277_s16  }
  0x16   :  { %s2110_s23 = scalar_lea.hbm %s2849_s6, 16 }
  0x17   :  { %p2111_p8 = scmp.ne.s32.totalorder %s2849_s6, %s2110_s23  ;;  %p2114_p9 = scmp.lt.u32.totalorder %s2110_s23, %s2849_s6 }
  0x19   :  { %p2116_p10 = pnand %p2114_p9, %p2111_p8 }
  0x1b   :  { %2119 = shalt.err (!%p2116_p10)
}
  0x1c   :  { %s2120_s28 = scalar_lea.vmem %s2372_s21, 16  ;;  %s2124_s1 = scalar_lea.vmem %s2372_s21, 32 }
  0x1d   :  { %p2121_p11 = scmp.ne.s32.totalorder %s2372_s21, %s2120_s28  ;;  %p2125_p12 = scmp.lt.s32.totalorder %s2372_s21, %s2372_s21 }
  0x1e   :  { %p2126_p13 = scmp.lt.s32.totalorder %s2124_s1, %s2120_s28 }
  0x20   :  { %p2127_p0 = por %p2126_p13, %p2125_p12 }
  0x22   :  { %p2128_p1 = pnand %p2127_p0, %p2121_p11 }
  0x24   :  { %2131 = shalt.err (!%p2128_p1)
}
  0x25   :  { %76 = dma.hbm_to_vmem [thread:$0]  %s2849_s6, 16, %s2372_s21, [#allocation9]  }
  0x26   :  { %s2278_s17 = smov [#allocation11]   ;;  %s2279_s20 = smov [#allocation2]  }
  0x27   :  { %s97_s18 = sshll.u32 %s2278_s17, 4  ;;  %s30_s22 = sshll.u32 %s2279_s20, 4  ;;  %s98_s18 = int_to_ptr.vmem [resolvable:$true] %s97_s18  ;;  %s2407_s22 = int_to_ptr.vmem [resolvable:$true] %s30_s22 }
  0x28   :  { %s2132_s25 = scalar_lea.hbm %s2852_s9, 16 }
  0x29   :  { %p2133_p2 = scmp.ne.s32.totalorder %s2852_s9, %s2132_s25  ;;  %p2136_p3 = scmp.lt.u32.totalorder %s2132_s25, %s2852_s9 }
  0x2b   :  { %p2138_p4 = pnand %p2136_p3, %p2133_p2 }
  0x2d   :  { %2141 = shalt.err (!%p2138_p4)
}
  0x2e   :  { %s2142_s6 = scalar_lea.vmem %s98_s18, 16  ;;  %s2146_s21 = scalar_lea.vmem %s98_s18, 32 }
  0x2f   :  { %p2143_p5 = scmp.ne.s32.totalorder %s98_s18, %s2142_s6  ;;  %p2147_p6 = scmp.lt.s32.totalorder %s98_s18, %s98_s18 }
  0x30   :  { %p2148_p7 = scmp.lt.s32.totalorder %s2146_s21, %s2142_s6 }
  0x32   :  { %p2149_p8 = por %p2148_p7, %p2147_p6 }
  0x34   :  { %p2150_p9 = pnand %p2149_p8, %p2143_p5 }
  0x36   :  { %2153 = shalt.err (!%p2150_p9)
}
  0x37   :  { %100 = dma.hbm_to_vmem [thread:$0]  %s2852_s9, 16, %s98_s18, [#allocation12]  }
  0x38   :  { %s2154_s23 = scalar_lea.hbm %s2843_s0, 128 }
  0x39   :  { %p2155_p10 = scmp.ne.s32.totalorder %s2843_s0, %s2154_s23  ;;  %p2158_p11 = scmp.lt.u32.totalorder %s2154_s23, %s2843_s0 }
  0x3b   :  { %p2160_p12 = pnand %p2158_p11, %p2155_p10 }
  0x3d   :  { %2163 = shalt.err (!%p2160_p12)
}
  0x3e   :  { %s2164_s28 = scalar_lea.vmem %s2407_s22, 128  ;;  %p2169_p0 = scmp.lt.s32.totalorder %s2407_s22, %s2407_s22 }
  0x3f   :  { %p2165_p13 = scmp.ne.s32.totalorder %s2407_s22, %s2164_s28  ;;  %p2170_p1 = scmp.lt.s32.totalorder %s2164_s28, %s2164_s28 }
  0x41   :  { %p2171_p2 = por %p2170_p1, %p2169_p0 }
  0x43   :  { %p2172_p3 = pnand %p2171_p2, %p2165_p13 }
  0x45   :  { %2175 = shalt.err (!%p2172_p3)
}
  0x46   :  { %36 = dma.hbm_to_vmem [thread:$0]  %s2843_s0, 128, %s2407_s22, [#allocation3], %s2276_s30, %s2276_s30, %s2277_s16  }
  0x47   :  { %s2280_s1 = smov [#allocation7]   ;;  %s2176_s29 = scalar_lea.hbm %s2845_s2, 256 }
  0x48   :  { %s54_s6 = sshll.u32 %s2280_s1, 4  ;;  %p2177_p4 = scmp.ne.s32.totalorder %s2845_s2, %s2176_s29  ;;  %s55_s6 = int_to_ptr.vmem [resolvable:$true] %s54_s6 }
  0x49   :  { %p2180_p5 = scmp.lt.u32.totalorder %s2176_s29, %s2845_s2 }
  0x4b   :  { %p2182_p6 = pnand %p2180_p5, %p2177_p4 }
  0x4d   :  { %2185 = shalt.err (!%p2182_p6)
}
  0x4e   :  { %s2186_s25 = scalar_lea.vmem %s55_s6, 256  ;;  %p2191_p8 = scmp.lt.s32.totalorder %s55_s6, %s55_s6 }
  0x4f   :  { %p2187_p7 = scmp.ne.s32.totalorder %s55_s6, %s2186_s25  ;;  %p2192_p9 = scmp.lt.s32.totalorder %s2186_s25, %s2186_s25 }
  0x51   :  { %p2193_p10 = por %p2192_p9, %p2191_p8 }
  0x53   :  { %p2194_p11 = pnand %p2193_p10, %p2187_p7 }
  0x55   :  { %2197 = shalt.err (!%p2194_p11)
}
  0x56   :  { %s2281_s0 = smov 128   ;;  %s2282_s22 = smov 8  }
  0x57   :  { %60 = dma.hbm_to_vmem [thread:$0]  %s2845_s2, 256, %s55_s6, [#allocation6], %s2281_s0, %s2281_s0, %s2282_s22  }
  0x58   :  { %s2283_s28 = smov [#allocation10]   ;;  %s2284_s18 = smov [#allocation13]  }
  0x59   :  { %s84_s9 = sshll.u32 %s2283_s28, 4  ;;  %s107_s1 = sshll.u32 %s2284_s18, 4  ;;  %s85_s9 = int_to_ptr.vmem [resolvable:$true] %s84_s9  ;;  %s108_s1 = int_to_ptr.vmem [resolvable:$true] %s107_s1 }
  0x5a   :  { %s2198_s29 = scalar_lea.hbm %s2851_s8, 128 }
  0x5b   :  { %p2199_p12 = scmp.ne.s32.totalorder %s2851_s8, %s2198_s29  ;;  %p2202_p13 = scmp.lt.u32.totalorder %s2198_s29, %s2851_s8 }
  0x5d   :  { %p2204_p0 = pnand %p2202_p13, %p2199_p12 }
  0x5f   :  { %2207 = shalt.err (!%p2204_p0)
}
  0x60   :  { %s2208_s2 = scalar_lea.vmem %s85_s9, 128  ;;  %p2213_p2 = scmp.lt.s32.totalorder %s85_s9, %s85_s9 }
  0x61   :  { %p2209_p1 = scmp.ne.s32.totalorder %s85_s9, %s2208_s2  ;;  %p2214_p3 = scmp.lt.s32.totalorder %s2208_s2, %s2208_s2 }
  0x63   :  { %p2215_p4 = por %p2214_p3, %p2213_p2 }
  0x65   :  { %p2216_p5 = pnand %p2215_p4, %p2209_p1 }
  0x67   :  { %2219 = shalt.err (!%p2216_p5)
}
  0x68   :  { %90 = dma.hbm_to_vmem [thread:$0]  %s2851_s8, 128, %s85_s9, [#allocation9], %s2276_s30, %s2276_s30, %s2277_s16  }
  0x69   :  { %s2220_s28 = scalar_lea.hbm %s2853_s10, 16 }
  0x6a   :  { %p2221_p6 = scmp.ne.s32.totalorder %s2853_s10, %s2220_s28  ;;  %p2224_p7 = scmp.lt.u32.totalorder %s2220_s28, %s2853_s10 }
  0x6c   :  { %p2226_p8 = pnand %p2224_p7, %p2221_p6 }
  0x6e   :  { %2229 = shalt.err (!%p2226_p8)
}
  0x6f   :  { %s2230_s17 = scalar_lea.vmem %s108_s1, 16  ;;  %s2234_s20 = scalar_lea.vmem %s108_s1, 32 }
  0x70   :  { %p2231_p9 = scmp.ne.s32.totalorder %s108_s1, %s2230_s17  ;;  %p2235_p10 = scmp.lt.s32.totalorder %s108_s1, %s108_s1 }
  0x71   :  { %p2236_p11 = scmp.lt.s32.totalorder %s2234_s20, %s2230_s17 }
  0x73   :  { %p2237_p12 = por %p2236_p11, %p2235_p10 }
  0x75   :  { %p2238_p13 = pnand %p2237_p12, %p2231_p9 }
  0x77   :  { %2241 = shalt.err (!%p2238_p13)
}
  0x78   :  { %110 = dma.hbm_to_vmem [thread:$0]  %s2853_s10, 16, %s108_s1, [#allocation12]  }
  0x79   :  { %2264 = dma.done.wait [#allocation3], 128  }
  0x7a   :  { %2265 = vsyncadd [#allocation3], 4294967168 }
  0x7b   :  { %2266 = dma.done.wait [#allocation6], 384  }
  0x7c   :  { %2267 = vsyncadd [#allocation6], 4294966912 }
  0x7d   :  { %2268 = dma.done.wait [#allocation9], 144  }
  0x7e   :  { %2269 = vsyncadd [#allocation9], 4294967152 }
  0x7f   :  { %2270 = dma.done.wait [#allocation12], 32  }
  0x80   :  { %2271 = vsyncadd [#allocation12], 4294967264  ;;  %v2285_v0 = vmov 0.0   ;;  %vm2286_vm0 = vmmov 0   ;;  %v1975_v1 = vld [vmem:[%s2846_s3] sm:$0xff]   ;;  %vm163_vm1 = vcmask 130048  }
  0x81   :  { %1839 = vmatprep.subr.bf16.mxu0 %v2285_v0  ;;  %1841 = vmatprep.mubr.msk.bf16.mxu0 %vm2286_vm0, %v2285_v0  ;;  %v1976_v2 = vld [vmem:[#allocation2] sm:$0xff]   ;;  %s2287_s3 = smov 112   ;;  %vm310_vm2 = vcmask 64512   ;;  %vm340_vm3 = vcmask 1043456   ;;  %v1778_v51 = vld [vmem:[#allocation13] ss:$0 sm:$0xff] }
  0x82   :  { %1845 = vmatprep.subr.bf16.mxu1 %v2285_v0  ;;  %1847 = vmatprep.mubr.msk.bf16.mxu1 %vm2286_vm0, %v2285_v0  ;;  %v1756_v3 = vld [vmem:[%s2847_s4] ss:$0 sm:$0xff]  ;;  %s2288_s4 = smov 96   ;;  %s2289_s2 = smov 32   ;;  %v1979_v62 = vld [vmem:[#allocation5] sm:$0xff]   ;;  %vm885_vm4 = vcmask 1041409  }
  0x83   :  { %1840 = vmatpush3.bf16.msra.mxu0 %v1975_v1  ;;  %v1977_v50 = vld [vmem:[%s2848_s5] sm:$0xff]   ;;  %v2290_v1 = vmov 0   ;;  %vm686_vm7 = vcmask 392448   ;;  %vm875_vm8 = vcmask 254080   ;;  %vm996_vm9 = vcmask 255105  }
  0x84   :  { %1851 = vmatprep.subr.bf16.mxu0 %v2285_v0  ;;  %v1978_v57 = vld [vmem:[%s2850_s7] sm:$0xff]   ;;  %vm1118_vm10 = vcmask 256130   ;;  %vm1241_vm11 = vcmask 257155   ;;  %vm1364_vm12 = vcmask 258180   ;;  %vm1487_vm13 = vcmask 259205  }
  0x85   :  { %v2539_v63 = vld [vmem:[#allocation10] sm:$0xff]   ;;  %vm1610_vm14 = vcmask 260230   ;;  %vm1733_vm15 = vcmask 261255  }
  0x86   :  { %1842 = vmatmul.mubr.msk.bf16.vlgmr.msra.gmra.mrb[0].mxu0 %vm163_vm1, %v1976_v2  ;;  %v1764_v2 = vld [vmem:[#allocation8] ss:$0 sm:$0xff] }
  0x87   :  { %1853 = vmatprep.mubr.msk.bf16.mxu0 %vm2286_vm0, %v2285_v0 }
 0x159   :  { %v201_v4 = vpop.f32.mrb[0].mxu0 }
 0x15a   :  { %v202_v5 = vadd.f32 %v1756_v3, %v201_v4  ;;  %v1843_v6 = vpop.f32.mrb[1].mxu0 }
 0x15b   :  { %v204_v7 = vpop.f32.mrb[2].mxu0 }
 0x15c   :  { %v208_v8 = vpack.c.bf16 %v202_v5, %v202_v5  ;;  %v205_v9 = vadd.f32 %v1756_v3, %v204_v7  ;;  %v1844_v10 = vpop.f32.mrb[3].mxu0 }
 0x15e   :  { %211 = vrot.lane.b32.xlu0 %v208_v8, %s2287_s3  ;;  %v209_v11 = vpack.c.bf16 %v205_v9, %v205_v9 }
 0x162   :  { %260 = vrot.lane.b32.xlu0 %v209_v11, %s2287_s3 }
 0x1d0   :  { %v212_v12 = vpop.permute.xlu0 %211 }
 0x1d1   :  { %v217_v13 = vsel %vm163_vm1, %v212_v12, 0 }
 0x1d2   :  { %1846 = vmatpush3.bf16.xpose.msra.mxu1 %v217_v13 }
 0x1d3   :  { %1857 = vmatprep.subr.bf16.mxu1 %v2285_v0 }
 0x1d4   :  { %v261_v14 = vpop.permute.xlu0 %260 }
 0x1d5   :  { %v266_v15 = vsel %vm163_vm1, %v261_v14, 0 }
 0x1d6   :  { %1852 = vmatpush3.bf16.xpose.msra.mxu0 %v266_v15 }
 0x1d7   :  { %1863 = vmatprep.subr.bf16.mxu0 %v2285_v0 }
 0x1d9   :  { %1848 = vmatmul.mubr.msk.bf16.vlgmr.msra.gmra.mrb[0].mxu1 %vm163_vm1, %v208_v8 }
 0x1da   :  { %1859 = vmatprep.mubr.msk.bf16.mxu1 %vm2286_vm0, %v2285_v0 }
 0x1dd   :  { %1854 = vmatmul.mubr.msk.bf16.vlgmr.msra.gmra.mrb[4].mxu0 %vm163_vm1, %v209_v11 }
 0x1de   :  { %1865 = vmatprep.mubr.msk.bf16.mxu0 %vm2286_vm0, %v2285_v0 }
 0x2ac   :  { %v253_v16 = vpop.f32.mrb[0].mxu1 }
 0x2ad   :  { %v308_v17 = vmul.f32 0.25, %v253_v16  ;;  %v1849_v18 = vpop.f32.mrb[1].mxu1 }
 0x2ae   :  { %v256_v19 = vpop.f32.mrb[2].mxu1 }
 0x2af   :  { %v1850_v20 = vpop.f32.mrb[3].mxu1  ;;  %v311_v21 = vsel %vm310_vm2, %v308_v17, -inf }
 0x2b0   :  { %312 = vmax.xlane.f32.xlu1 %v311_v21  ;;  %v302_v22 = vpop.f32.mrb[4].mxu0  ;;  %v1774_v21 = vld [vmem:[#allocation11] ss:$0 sm:$0xff] }
 0x2b1   :  { %v309_v23 = vmul.f32 0.25, %v302_v22  ;;  %v1855_v24 = vpop.f32.mrb[5].mxu0 }
 0x2b2   :  { %v305_v25 = vpop.f32.mrb[6].mxu0 }
 0x2b3   :  { %v1856_v26 = vpop.f32.mrb[7].mxu0  ;;  %v314_v27 = vsel %vm310_vm2, %v309_v23, -inf }
 0x2b4   :  { %315 = vmax.xlane.f32.xlu1 %v314_v27 }
 0x2c5   :  { %335 = vrot.lane.b32.xlu1 %v208_v8, %s2288_s4 }
 0x33d   :  { %v313_v28 = vpop.xlane.xlu1 %312 }
 0x33e   :  { %v317_v29 = vsub.f32 %v308_v17, %v313_v28 }
 0x340   :  { %v319_v30 = vmul.f32 1.442695, %v317_v29 }
 0x341   :  { %v316_v31 = vpop.xlane.xlu1 %315 }
 0x342   :  { %1984 = vpow2.f32 %v319_v30  ;;  %v318_v32 = vsub.f32 %v309_v23, %v316_v31 }
 0x344   :  { %v321_v33 = vmul.f32 1.442695, %v318_v32 }
 0x345   :  { %v336_v34 = vpop.permute.xlu1 %335 }
 0x346   :  { %1986 = vpow2.f32 %v321_v33  ;;  %v342_v35 = vsel %vm340_vm3, %v336_v34, 0 }
 0x347   :  { %1858 = vmatpush3.bf16.msra.mxu1 %v342_v35 }
 0x348   :  { %1869 = vmatprep.subr.bf16.mxu1 %v2285_v0 }
 0x34c   :  { %v1985_v36 = vpop.eup %1984 }
 0x34d   :  { %v323_v37 = vsel %vm310_vm2, %v1985_v36, 0.0 }
 0x34e   :  { %324 = vadd.xlane.f32.xlu0 %v323_v37 }
 0x350   :  { %v1987_v38 = vpop.eup %1986 }
 0x351   :  { %v326_v39 = vsel %vm310_vm2, %v1987_v38, 0.0 }
 0x352   :  { %327 = vadd.xlane.f32.xlu1 %v326_v39 }
 0x363   :  { %384 = vrot.lane.b32.xlu1 %v209_v11, %s2288_s4 }
 0x367   :  { %833 = vrot.lane.b32.xlu1 %v1778_v51, %s2289_s2 }
 0x3db   :  { %v325_v40 = vpop.xlane.xlu0 %324 }
 0x3dc   :  { %1988 = vrcp.f32 %v325_v40 }
 0x3df   :  { %v328_v41 = vpop.xlane.xlu1 %327 }
 0x3e0   :  { %1990 = vrcp.f32 %v328_v41 }
 0x3e3   :  { %v385_v42 = vpop.permute.xlu1 %384 }
 0x3e4   :  { %v390_v43 = vsel %vm340_vm3, %v385_v42, 0 }
 0x3e5   :  { %1864 = vmatpush3.bf16.msra.mxu0 %v390_v43 }
 0x3e6   :  { %v1989_v44 = vpop.eup %1988  ;;  %1875 = vmatprep.subr.bf16.mxu0 %v2285_v0 }
 0x3e7   :  { %v331_v45 = vmul.f32 %v1989_v44, %v1985_v36  ;;  %v2552_v13 = vpop.permute.xlu1 %833 }
 0x3e9   :  { %v333_v46 = vpack.c.bf16 %v331_v45, %v331_v45 }
 0x3ea   :  { %v1991_v47 = vpop.eup %1990 }
 0x3eb   :  { %v332_v48 = vmul.f32 %v1991_v47, %v1987_v38  ;;  %1860 = vmatmul.mubr.msk.bf16.vlgmr.msra.gmra.mrb[4].mxu1 %vm310_vm2, %v333_v46 }
 0x3ec   :  { %1871 = vmatprep.mubr.msk.bf16.mxu1 %vm2286_vm0, %v2285_v0  ;;  %1870 = vmatpush3.bf16.msra.mxu1 %v1977_v50 }
 0x3ed   :  { %v334_v49 = vpack.c.bf16 %v332_v48, %v332_v48  ;;  %1893 = vmatprep.subr.bf16.mxu1 %v2285_v0 }
 0x3ef   :  { %1866 = vmatmul.mubr.msk.bf16.vlgmr.msra.gmra.mrb[8].mxu0 %vm310_vm2, %v334_v49 }
 0x3f0   :  { %1877 = vmatprep.mubr.msk.bf16.mxu0 %vm2286_vm0, %v2285_v0 }
 0x4be   :  { %v378_v52 = vpop.f32.mrb[4].mxu1 }
 0x4bf   :  { %v1861_v53 = vpop.f32.mrb[5].mxu1 }
 0x4c0   :  { %v381_v54 = vpop.f32.mrb[6].mxu1 }
 0x4c1   :  { %v1862_v55 = vpop.f32.mrb[7].mxu1 }
 0x4c2   :  { %v426_v56 = vpop.f32.mrb[8].mxu0 }
 0x4c3   :  { %v435_v58 = vpack.c.bf16 %v426_v56, %v378_v52  ;;  %v1867_v59 = vpop.f32.mrb[9].mxu0 }
 0x4c4   :  { %v429_v60 = vpop.f32.mrb[10].mxu0 }
 0x4c5   :  { %v1868_v61 = vpop.f32.mrb[11].mxu0  ;;  %1872 = vmatmul.mubr.msk.bf16.vlgmr.msra.gmra.mrb[8].mxu1 %vm163_vm1, %v435_v58 }
 0x4c6   :  { %1894 = vmatpush3.bf16.msra.mxu1 %v1978_v57  ;;  %1895 = vmatprep.mubr.msk.bf16.mxu1 %vm2286_vm0, %v2285_v0 }
 0x4c7   :  { %1899 = vmatprep.subr.bf16.mxu1 %v2285_v0 }
 0x4cd   :  { %1896 = vmatmul.mubr.msk.bf16.vlgmr.msra.gmra.mrb[12].mxu1 %vm163_vm1, %v1979_v62 }
 0x4ce   :  { %1900 = vmatpush3.bf16.msra.mxu1 %v2539_v63  ;;  %1901 = vmatprep.mubr.msk.bf16.mxu1 %vm2286_vm0, %v2285_v0 }
 0x4cf   :  { %1905 = vmatprep.subr.bf16.mxu1 %v2285_v0 }
 0x4d5   :  { %1902 = vmatmul.mubr.bf16.vlgmr.msra.gmra.mrb[16].mxu1 %v2290_v1 }
 0x4d6   :  { %1906 = vmatpush3.bf16.msra.mxu1 %v2539_v63  ;;  %1907 = vmatprep.mubr.msk.bf16.mxu1 %vm2286_vm0, %v2285_v0 }
 0x4d7   :  { %1917 = vmatprep.subr.bf16.mxu1 %v2285_v0 }
 0x598   :  { %v485_v3 = vpop.f32.mrb[8].mxu1 }
 0x599   :  { %v486_v4 = vadd.f32 %v1764_v2, %v485_v3  ;;  %v1873_v5 = vpop.f32.mrb[9].mxu1 }
 0x59a   :  { %v488_v6 = vpop.f32.mrb[10].mxu1 }
 0x59b   :  { %492 = vst.msk [vmem:[#allocation14] sm:$0xff] %vm163_vm1, %v486_v4  ;;  %v489_v7 = vadd.f32 %v1764_v2, %v488_v6  ;;  %v1874_v8 = vpop.f32.mrb[11].mxu1 }
 0x59d   :  { %493 = vst.msk [vmem:[#allocation14 + $0x8] sm:$0xff] %vm163_vm1, %v489_v7 }
 0x5a0   :  { %v748_v9 = vpop.f32.mrb[12].mxu1 }
 0x5a1   :  { %v1897_v10 = vpop.f32.mrb[13].mxu1  ;;  %v2560_v24 = vadd.f32 %v1774_v21, %v748_v9 }
 0x5a2   :  { %v751_v11 = vpop.f32.mrb[14].mxu1 }
 0x5a3   :  { %v1898_v12 = vpop.f32.mrb[15].mxu1  ;;  %v2557_v22 = vadd.f32 %v1774_v21, %v751_v11 }
 0x5a8   :  { %v808_v14 = vpop.f32.mrb[16].mxu1 }
 0x5a9   :  { %v836_v15 = vadd.f32 %v2552_v13, %v808_v14  ;;  %v1903_v16 = vpop.f32.mrb[17].mxu1  ;;  %v815_v20 = vrot.slane %v808_v14, 1  ;;  %v818_v25 = vadd.f32 %v808_v14, %v2560_v24 }
 0x5aa   :  { %v811_v17 = vpop.f32.mrb[18].mxu1 }
 0x5ab   :  { %839 = vrot.lane.b32.xlu0 %v836_v15, %s2288_s4  ;;  %v1904_v18 = vpop.f32.mrb[19].mxu1  ;;  %v838_v19 = vrot.slane %v836_v15, 1  ;;  %v819_v23 = vadd.f32 %v815_v20, %v2557_v22  ;;  %v1780_v27 = vmul.f32 -1.442695, %v818_v25 }
 0x5ad   :  { %841 = vrot.lane.b32.xlu1 %v838_v19, %s2288_s4  ;;  %v1781_v26 = vmul.f32 -1.442695, %v819_v23 }
 0x5af   :  { %1992 = vpow2.f32 %v1781_v26 }
 0x5b0   :  { %1994 = vpow2.f32 %v1780_v27 }
 0x5b9   :  { %v1993_v28 = vpop.eup %1992 }
 0x5ba   :  { %v827_v29 = vadd.f32 1.0, %v1993_v28  ;;  %v1995_v30 = vpop.eup %1994 }
 0x5bb   :  { %v826_v31 = vadd.f32 1.0, %v1995_v30  ;;  %v1981_v30 = vld [vmem:[%s2854_s11] sm:$0xff]  }
 0x5bc   :  { %1996 = vrcp.f32 %v827_v29  ;;  %1876 = vmatpush3.bf16.msra.mxu0 %v1981_v30 }
 0x5bd   :  { %1998 = vrcp.f32 %v826_v31  ;;  %v494_v31 = vld [vmem:[#allocation7] sm:$0xff]  ;;  %1881 = vmatprep.subr.bf16.mxu0 %v2285_v0 }
 0x5c6   :  { %v1997_v32 = vpop.eup %1996 }
 0x5c7   :  { %v1999_v36 = vpop.eup %1998  ;;  %v860_v44 = vsub.f32 1.0, %v1997_v32  ;;  %v872_v46 = vmul.f32 0.0, %v1997_v32 }
 0x5c8   :  { %v859_v49 = vsub.f32 1.0, %v1999_v36  ;;  %v871_v52 = vmul.f32 0.0, %v1999_v36 }
 0x61d   :  { %v840_v35 = vpop.permute.xlu0 %839 }
 0x61e   :  { %v845_v37 = vmul.f32 %v1999_v36, %v840_v35 }
 0x61f   :  { %v842_v33 = vpop.permute.xlu1 %841 }
 0x620   :  { %v846_v34 = vmul.f32 %v1997_v32, %v842_v33  ;;  %v495_v32 = vld [vmem:[#allocation7 + $0x8] sm:$0xff]  ;;  %v496_v33 = vlaneseq }
 0x621   :  { %v500_v35 = vrot.slane %v495_v32, 7 }
 0x622   :  { %851 = vrot.lane.b32.xlu1 %v846_v34, %s2289_s2  ;;  %v499_v34 = vrot.slane %v494_v31, 7  ;;  %v497_v36 = vshrl.u32 %v496_v33, 7 }
 0x624   :  { %vm498_vm5 = vcmp.eq.s32.totalorder %v497_v36, 0  ;;  %vm503_vm6 = vcmp.eq.s32.totalorder %v497_v36, 7 }
 0x626   :  { %849 = vrot.lane.b32.xlu1 %v845_v37, %s2289_s2  ;;  %v501_v37 = vsel %vm498_vm5, 0.0, %v499_v34 }
 0x694   :  { %v852_v38 = vpop.permute.xlu1 %851 }
 0x695   :  { %v856_v39 = vadd.f32 %v852_v38, %v2557_v22  ;;  %v502_v38 = vsel %vm498_vm5, 0.0, %v500_v35 }
 0x697   :  { %2000 = vtanh.f32 %v856_v39  ;;  %v1982_v39 = vld [vmem:[%s2855_s12] sm:$0xff]  }
 0x698   :  { %v850_v40 = vpop.permute.xlu1 %849 }
 0x699   :  { %v855_v41 = vadd.f32 %v850_v40, %v2560_v24  ;;  %v510_v40 = vpack.c.bf16 %v502_v38, %v501_v37 }
 0x69b   :  { %2002 = vtanh.f32 %v855_v41  ;;  %1878 = vmatmul.mubr.msk.bf16.vlgmr.msra.gmra.mrb[12].mxu0 %vm163_vm1, %v510_v40  ;;  %v563_v41 = vpack.c.bf16 %v495_v32, %v494_v31 }
 0x69c   :  { %1882 = vmatpush3.bf16.msra.mxu0 %v1982_v39  ;;  %1883 = vmatprep.mubr.msk.bf16.mxu0 %vm2286_vm0, %v2285_v0 }
 0x69d   :  { %1887 = vmatprep.subr.bf16.mxu0 %v2285_v0 }
 0x6a1   :  { %v2001_v42 = vpop.eup %2000 }
 0x6a2   :  { %865 = vrot.lane.b32.xlu1 %v2001_v42, %s2287_s3  ;;  %v1983_v42 = vld [vmem:[%s2856_s13] sm:$0xff]  }
 0x6a5   :  { %v2003_v43 = vpop.eup %2002 }
 0x6a6   :  { %863 = vrot.lane.b32.xlu1 %v2003_v43, %s2287_s3  ;;  %v504_v43 = vrot.slane %v494_v31, 1 }
 0x6a7   :  { %1884 = vmatmul.mubr.msk.bf16.vlgmr.msra.gmra.mrb[12].mxu0 %vm163_vm1, %v563_v41 }
 0x6a8   :  { %1888 = vmatpush3.bf16.msra.mxu0 %v1983_v42  ;;  %1889 = vmatprep.mubr.msk.bf16.mxu0 %vm2286_vm0, %v2285_v0 }
 0x6a9   :  { %1911 = vmatprep.subr.bf16.mxu0 %v2285_v0 }
 0x714   :  { %v866_v45 = vpop.permute.xlu1 %865 }
 0x715   :  { %v870_v47 = vmul.f32 %v866_v45, %v860_v44  ;;  %v505_v44 = vrot.slane %v495_v32, 1  ;;  %v506_v45 = vsel %vm503_vm6, 0.0, %v504_v43 }
 0x717   :  { %v2569_v48 = vadd.f32 %v872_v46, %v870_v47  ;;  %v507_v46 = vsel %vm503_vm6, 0.0, %v505_v44 }
 0x718   :  { %v864_v50 = vpop.permute.xlu1 %863  ;;  %v619_v47 = vpack.c.bf16 %v507_v46, %v506_v45 }
 0x719   :  { %v879_v51 = vpack.c.bf16 %v2569_v48, %v2569_v48  ;;  %v869_v53 = vmul.f32 %v864_v50, %v859_v49  ;;  %v989_v50 = vrot.slane %v2569_v48, 7 }
 0x71a   :  { %1890 = vmatmul.mubr.msk.bf16.vlgmr.msra.gmra.mrb[12].mxu0 %vm163_vm1, %v619_v47 }
 0x71b   :  { %v883_v54 = vunpack.c.l.b16 %v879_v51  ;;  %v2573_v55 = vadd.f32 %v871_v52, %v869_v53  ;;  %1912 = vmatpush3.bf16.msra.mxu0 %v2539_v63  ;;  %1913 = vmatprep.mubr.msk.bf16.mxu0 %vm2286_vm0, %v2285_v0 }
 0x71c   :  { %1923 = vmatprep.subr.bf16.mxu0 %v2285_v0 }
 0x71d   :  { %v878_v56 = vpack.c.bf16 %v2573_v55, %v2573_v55  ;;  %v884_v57 = vrot.slane %v883_v54, 7 }
 0x71f   :  { %v882_v58 = vunpack.c.l.b16 %v878_v56  ;;  %v988_v56 = vrot.slane %v2573_v55, 7 }
 0x721   :  { %v886_v59 = vsel %vm885_vm4, %v884_v57, %v882_v58 }
 0x722   :  { %v887_v60 = vpack.c.b16 %v886_v59, %v886_v59 }
 0x724   :  { %888 = vrot.lane.b32.xlu1 %v887_v60, %s2287_s3 }
 0x796   :  { %v889_v61 = vpop.permute.xlu1 %888 }
 0x797   :  { %1908 = vmatmul.mubr.msk.bf16.vlgmr.msra.gmra.mrb[20].mxu1 %vm163_vm1, %v889_v61 }
 0x798   :  { %1918 = vmatpush3.bf16.msra.mxu1 %v2539_v63  ;;  %1919 = vmatprep.mubr.msk.bf16.mxu1 %vm2286_vm0, %v2285_v0 }
 0x799   :  { %1929 = vmatprep.subr.bf16.mxu1 %v2285_v0 }
 0x86a   :  { %v927_v62 = vpop.f32.mrb[20].mxu1 }
 0x86b   :  { %v951_v1 = vadd.f32 %v927_v62, %v2552_v13  ;;  %v1909_v2 = vpop.f32.mrb[21].mxu1  ;;  %v934_v6 = vrot.slane %v927_v62, 7  ;;  %v938_v7 = vadd.f32 %v927_v62, %v2557_v22 }
 0x86c   :  { %v930_v3 = vpop.f32.mrb[22].mxu1 }
 0x86d   :  { %956 = vrot.lane.b32.xlu1 %v951_v1, %s2288_s4  ;;  %v1910_v4 = vpop.f32.mrb[23].mxu1  ;;  %v953_v5 = vrot.slane %v951_v1, 7  ;;  %v937_v8 = vadd.f32 %v934_v6, %v2560_v24  ;;  %v1784_v9 = vmul.f32 -1.442695, %v938_v7 }
 0x86f   :  { %954 = vrot.lane.b32.xlu0 %v953_v5, %s2288_s4  ;;  %v1783_v10 = vmul.f32 -1.442695, %v937_v8  ;;  %2004 = vpow2.f32 %v1784_v9  ;;  %v2631_v8 = vpop.f32.mrb[12].mxu0 }
 0x870   :  { %v1891_v9 = vpop.f32.mrb[13].mxu0 }
 0x871   :  { %2006 = vpow2.f32 %v1783_v10  ;;  %v2636_v10 = vpop.f32.mrb[14].mxu0 }
 0x879   :  { %v2005_v11 = vpop.eup %2004 }
 0x87a   :  { %v946_v14 = vadd.f32 1.0, %v2005_v11  ;;  %v1892_v11 = vpop.f32.mrb[15].mxu0 }
 0x87b   :  { %v2007_v12 = vpop.eup %2006 }
 0x87c   :  { %v945_v15 = vadd.f32 1.0, %v2007_v12  ;;  %2008 = vrcp.f32 %v946_v14 }
 0x87e   :  { %2010 = vrcp.f32 %v945_v15 }
 0x886   :  { %v2009_v16 = vpop.eup %2008 }
 0x887   :  { %v975_v49 = vsub.f32 1.0, %v2009_v16  ;;  %v993_v52 = vmul.f32 %v2009_v16, %v989_v50 }
 0x888   :  { %v2011_v19 = vpop.eup %2010 }
 0x889   :  { %v974_v54 = vsub.f32 1.0, %v2011_v19  ;;  %v992_v59 = vmul.f32 %v2011_v19, %v988_v56 }
 0x8df   :  { %v957_v17 = vpop.permute.xlu1 %956 }
 0x8e0   :  { %v961_v18 = vmul.f32 %v2009_v16, %v957_v17 }
 0x8e1   :  { %v955_v20 = vpop.permute.xlu0 %954 }
 0x8e2   :  { %v960_v21 = vmul.f32 %v2011_v19, %v955_v20  ;;  %966 = vrot.lane.b32.xlu1 %v961_v18, %s2289_s2 }
 0x8e4   :  { %964 = vrot.lane.b32.xlu0 %v960_v21, %s2289_s2 }
 0x954   :  { %v967_v23 = vpop.permute.xlu1 %966 }
 0x955   :  { %v971_v25 = vadd.f32 %v967_v23, %v2557_v22 }
 0x956   :  { %v965_v26 = vpop.permute.xlu0 %964 }
 0x957   :  { %2012 = vtanh.f32 %v971_v25  ;;  %v970_v27 = vadd.f32 %v965_v26, %v2560_v24 }
 0x959   :  { %2014 = vtanh.f32 %v970_v27 }
 0x961   :  { %v2013_v28 = vpop.eup %2012 }
 0x962   :  { %980 = vrot.lane.b32.xlu1 %v2013_v28, %s2287_s3 }
 0x963   :  { %v2015_v29 = vpop.eup %2014 }
 0x964   :  { %978 = vrot.lane.b32.xlu0 %v2015_v29, %s2287_s3 }
 0x9d4   :  { %v981_v51 = vpop.permute.xlu1 %980 }
 0x9d5   :  { %v985_v53 = vmul.f32 %v981_v51, %v975_v49 }
 0x9d6   :  { %v979_v57 = vpop.permute.xlu0 %978 }
 0x9d7   :  { %v2620_v58 = vadd.f32 %v993_v52, %v985_v53  ;;  %v984_v60 = vmul.f32 %v979_v57, %v974_v54 }
 0x9d9   :  { %v2622_v61 = vadd.f32 %v992_v59, %v984_v60  ;;  %v1000_v62 = vpack.c.bf16 %v2620_v58, %v2620_v58  ;;  %v1111_v45 = vrot.slane %v2620_v58, 7 }
 0x9db   :  { %v999_v1 = vpack.c.bf16 %v2622_v61, %v2622_v61  ;;  %v1004_v3 = vunpack.c.l.b16 %v1000_v62  ;;  %v1110_v49 = vrot.slane %v2622_v61, 7 }
 0x9dd   :  { %v1003_v2 = vunpack.c.l.b16 %v999_v1 }
 0x9df   :  { %v1005_v4 = vrot.slane %v1003_v2, 1 }
 0x9e1   :  { %v1006_v5 = vsel %vm885_vm4, %v1004_v3, %v1005_v4 }
 0x9e2   :  { %v1007_v6 = vpack.c.b16 %v1006_v5, %v1006_v5 }
 0x9e4   :  { %1008 = vrot.lane.b32.xlu0 %v1007_v6, %s2287_s3 }
 0xa56   :  { %v1009_v7 = vpop.permute.xlu0 %1008 }
 0xa57   :  { %1914 = vmatmul.mubr.msk.bf16.vlgmr.msra.gmra.mrb[16].mxu0 %vm163_vm1, %v1009_v7 }
 0xa58   :  { %1924 = vmatpush3.bf16.msra.mxu0 %v2539_v63  ;;  %1925 = vmatprep.mubr.msk.bf16.mxu0 %vm2286_vm0, %v2285_v0 }
 0xa59   :  { %1935 = vmatprep.subr.bf16.mxu0 %v2285_v0 }
 0xb2a   :  { %v1047_v12 = vpop.f32.mrb[16].mxu0 }
 0xb2b   :  { %v1072_v14 = vadd.f32 %v1047_v12, %v2552_v13  ;;  %v1915_v15 = vpop.f32.mrb[17].mxu0  ;;  %v1054_v20 = vrot.slane %v1047_v12, 6  ;;  %v1055_v21 = vrot.slane %v1047_v12, 7 }
 0xb2c   :  { %v1050_v16 = vpop.f32.mrb[18].mxu0 }
 0xb2d   :  { %v1916_v17 = vpop.f32.mrb[19].mxu0  ;;  %v1075_v18 = vrot.slane %v1072_v14, 7  ;;  %v1074_v19 = vrot.slane %v1072_v14, 6  ;;  %v1058_v23 = vadd.f32 %v1054_v20, %v2560_v24  ;;  %v1059_v25 = vadd.f32 %v1055_v21, %v2557_v22 }
 0xb2f   :  { %1078 = vrot.lane.b32.xlu0 %v1075_v18, %s2288_s4  ;;  %1076 = vrot.lane.b32.xlu1 %v1074_v19, %s2288_s4  ;;  %v1786_v26 = vmul.f32 -1.442695, %v1058_v23  ;;  %v1787_v27 = vmul.f32 -1.442695, %v1059_v25 }
 0xb31   :  { %2016 = vpow2.f32 %v1786_v26 }
 0xb32   :  { %2018 = vpow2.f32 %v1787_v27 }
 0xb3b   :  { %v2017_v28 = vpop.eup %2016 }
 0xb3c   :  { %v2019_v29 = vpop.eup %2018  ;;  %v1066_v30 = vadd.f32 1.0, %v2017_v28 }
 0xb3d   :  { %v1067_v31 = vadd.f32 1.0, %v2019_v29 }
 0xb3e   :  { %2020 = vrcp.f32 %v1066_v30 }
 0xb3f   :  { %2022 = vrcp.f32 %v1067_v31 }
 0xb48   :  { %v2021_v32 = vpop.eup %2020 }
 0xb49   :  { %v2023_v33 = vpop.eup %2022  ;;  %v1096_v47 = vsub.f32 1.0, %v2021_v32  ;;  %v1114_v53 = vmul.f32 %v2021_v32, %v1110_v49 }
 0xb4a   :  { %v1097_v44 = vsub.f32 1.0, %v2023_v33  ;;  %v1115_v50 = vmul.f32 %v2023_v33, %v1111_v45 }
 0xba1   :  { %v1079_v34 = vpop.permute.xlu0 %1078  ;;  %v1077_v35 = vpop.permute.xlu1 %1076 }
 0xba2   :  { %v1083_v36 = vmul.f32 %v2023_v33, %v1079_v34  ;;  %v1082_v37 = vmul.f32 %v2021_v32, %v1077_v35 }
 0xba4   :  { %1088 = vrot.lane.b32.xlu0 %v1083_v36, %s2289_s2  ;;  %1086 = vrot.lane.b32.xlu1 %v1082_v37, %s2289_s2 }
 0xc16   :  { %v1089_v38 = vpop.permute.xlu0 %1088  ;;  %v1087_v39 = vpop.permute.xlu1 %1086 }
 0xc17   :  { %v1093_v40 = vadd.f32 %v1089_v38, %v2557_v22  ;;  %v1092_v41 = vadd.f32 %v1087_v39, %v2560_v24 }
 0xc19   :  { %2024 = vtanh.f32 %v1093_v40 }
 0xc1a   :  { %2026 = vtanh.f32 %v1092_v41 }
 0xc23   :  { %v2025_v42 = vpop.eup %2024 }
 0xc24   :  { %v2027_v43 = vpop.eup %2026  ;;  %1102 = vrot.lane.b32.xlu0 %v2025_v42, %s2287_s3 }
 0xc25   :  { %1100 = vrot.lane.b32.xlu1 %v2027_v43, %s2287_s3 }
 0xc96   :  { %v1103_v46 = vpop.permute.xlu0 %1102 }
 0xc97   :  { %v1107_v51 = vmul.f32 %v1103_v46, %v1097_v44  ;;  %v1101_v52 = vpop.permute.xlu1 %1100 }
 0xc98   :  { %v1106_v54 = vmul.f32 %v1101_v52, %v1096_v47 }
 0xc99   :  { %v2652_v56 = vadd.f32 %v1115_v50, %v1107_v51 }
 0xc9a   :  { %v2654_v57 = vadd.f32 %v1114_v53, %v1106_v54 }
 0xc9b   :  { %v1122_v59 = vpack.c.bf16 %v2652_v56, %v2652_v56  ;;  %v1234_v42 = vrot.slane %v2652_v56, 7 }
 0xc9c   :  { %v1121_v60 = vpack.c.bf16 %v2654_v57, %v2654_v57  ;;  %v1233_v45 = vrot.slane %v2654_v57, 7 }
 0xc9d   :  { %v1126_v62 = vunpack.c.l.b16 %v1122_v59 }
 0xc9e   :  { %v1125_v1 = vunpack.c.l.b16 %v1121_v60 }
 0xc9f   :  { %v1128_v2 = vrot.slane %v1126_v62, 1 }
 0xca0   :  { %v1127_v3 = vrot.slane %v1125_v1, 2 }
 0xca2   :  { %v1129_v4 = vsel %vm885_vm4, %v1128_v2, %v1127_v3 }
 0xca3   :  { %v1130_v5 = vpack.c.b16 %v1129_v4, %v1129_v4 }
 0xca5   :  { %1131 = vrot.lane.b32.xlu1 %v1130_v5, %s2287_s3 }
 0xd17   :  { %v1132_v6 = vpop.permute.xlu1 %1131 }
 0xd18   :  { %1920 = vmatmul.mubr.msk.bf16.vlgmr.msra.gmra.mrb[24].mxu1 %vm163_vm1, %v1132_v6 }
 0xd19   :  { %1930 = vmatpush3.bf16.msra.mxu1 %v2539_v63  ;;  %1931 = vmatprep.mubr.msk.bf16.mxu1 %vm2286_vm0, %v2285_v0 }
 0xd1a   :  { %1941 = vmatprep.subr.bf16.mxu1 %v2285_v0 }
 0xdeb   :  { %v1170_v7 = vpop.f32.mrb[24].mxu1 }
 0xdec   :  { %v1195_v9 = vadd.f32 %v1170_v7, %v2552_v13  ;;  %v1921_v11 = vpop.f32.mrb[25].mxu1  ;;  %v1177_v17 = vrot.slane %v1170_v7, 5  ;;  %v1178_v18 = vrot.slane %v1170_v7, 6 }
 0xded   :  { %v1173_v12 = vpop.f32.mrb[26].mxu1 }
 0xdee   :  { %v1922_v14 = vpop.f32.mrb[27].mxu1  ;;  %v1198_v15 = vrot.slane %v1195_v9, 6  ;;  %v1197_v16 = vrot.slane %v1195_v9, 5  ;;  %v1181_v19 = vadd.f32 %v1177_v17, %v2560_v24  ;;  %v1182_v20 = vadd.f32 %v1178_v18, %v2557_v22 }
 0xdf0   :  { %1201 = vrot.lane.b32.xlu1 %v1198_v15, %s2288_s4  ;;  %1199 = vrot.lane.b32.xlu0 %v1197_v16, %s2288_s4  ;;  %v1789_v21 = vmul.f32 -1.442695, %v1181_v19  ;;  %v1790_v23 = vmul.f32 -1.442695, %v1182_v20 }
 0xdf2   :  { %2028 = vpow2.f32 %v1789_v21 }
 0xdf3   :  { %2030 = vpow2.f32 %v1790_v23 }
 0xdfc   :  { %v2029_v25 = vpop.eup %2028 }
 0xdfd   :  { %v2031_v26 = vpop.eup %2030  ;;  %v1189_v27 = vadd.f32 1.0, %v2029_v25 }
 0xdfe   :  { %v1190_v28 = vadd.f32 1.0, %v2031_v26 }
 0xdff   :  { %2032 = vrcp.f32 %v1189_v27 }
 0xe00   :  { %2034 = vrcp.f32 %v1190_v28 }
 0xe09   :  { %v2033_v29 = vpop.eup %2032 }
 0xe0a   :  { %v2035_v30 = vpop.eup %2034  ;;  %v1219_v44 = vsub.f32 1.0, %v2033_v29  ;;  %v1237_v50 = vmul.f32 %v2033_v29, %v1233_v45 }
 0xe0b   :  { %v1220_v41 = vsub.f32 1.0, %v2035_v30  ;;  %v1238_v46 = vmul.f32 %v2035_v30, %v1234_v42 }
 0xe62   :  { %v1202_v31 = vpop.permute.xlu1 %1201  ;;  %v1200_v32 = vpop.permute.xlu0 %1199 }
 0xe63   :  { %v1206_v33 = vmul.f32 %v2035_v30, %v1202_v31  ;;  %v1205_v34 = vmul.f32 %v2033_v29, %v1200_v32 }
 0xe65   :  { %1211 = vrot.lane.b32.xlu1 %v1206_v33, %s2289_s2  ;;  %1209 = vrot.lane.b32.xlu0 %v1205_v34, %s2289_s2 }
 0xed7   :  { %v1212_v35 = vpop.permute.xlu1 %1211  ;;  %v1210_v36 = vpop.permute.xlu0 %1209 }
 0xed8   :  { %v1216_v37 = vadd.f32 %v1212_v35, %v2557_v22  ;;  %v1215_v38 = vadd.f32 %v1210_v36, %v2560_v24 }
 0xeda   :  { %2036 = vtanh.f32 %v1216_v37 }
 0xedb   :  { %2038 = vtanh.f32 %v1215_v38 }
 0xee4   :  { %v2037_v39 = vpop.eup %2036 }
 0xee5   :  { %v2039_v40 = vpop.eup %2038  ;;  %1225 = vrot.lane.b32.xlu1 %v2037_v39, %s2287_s3 }
 0xee6   :  { %1223 = vrot.lane.b32.xlu0 %v2039_v40, %s2287_s3 }
 0xf57   :  { %v1226_v43 = vpop.permute.xlu1 %1225 }
 0xf58   :  { %v1230_v47 = vmul.f32 %v1226_v43, %v1220_v41  ;;  %v1224_v49 = vpop.permute.xlu0 %1223 }
 0xf59   :  { %v1229_v51 = vmul.f32 %v1224_v49, %v1219_v44 }
 0xf5a   :  { %v2680_v52 = vadd.f32 %v1238_v46, %v1230_v47 }
 0xf5b   :  { %v2682_v53 = vadd.f32 %v1237_v50, %v1229_v51 }
 0xf5c   :  { %v1245_v54 = vpack.c.bf16 %v2680_v52, %v2680_v52  ;;  %v1357_v41 = vrot.slane %v2680_v52, 7 }
 0xf5d   :  { %v1244_v59 = vpack.c.bf16 %v2682_v53, %v2682_v53  ;;  %v1356_v44 = vrot.slane %v2682_v53, 7 }
 0xf5e   :  { %v1249_v60 = vunpack.c.l.b16 %v1245_v54 }
 0xf5f   :  { %v1248_v62 = vunpack.c.l.b16 %v1244_v59 }
 0xf60   :  { %v1251_v1 = vrot.slane %v1249_v60, 2 }
 0xf61   :  { %v1250_v2 = vrot.slane %v1248_v62, 3 }
 0xf63   :  { %v1252_v3 = vsel %vm885_vm4, %v1251_v1, %v1250_v2 }
 0xf64   :  { %v1253_v4 = vpack.c.b16 %v1252_v3, %v1252_v3 }
 0xf66   :  { %1254 = vrot.lane.b32.xlu0 %v1253_v4, %s2287_s3 }
 0xfd8   :  { %v1255_v5 = vpop.permute.xlu0 %1254 }
 0xfd9   :  { %1926 = vmatmul.mubr.msk.bf16.vlgmr.msra.gmra.mrb[20].mxu0 %vm163_vm1, %v1255_v5 }
 0xfda   :  { %1936 = vmatpush3.bf16.msra.mxu0 %v2539_v63  ;;  %1937 = vmatprep.mubr.msk.bf16.mxu0 %vm2286_vm0, %v2285_v0 }
0x10ac   :  { %v1293_v6 = vpop.f32.mrb[20].mxu0 }
0x10ad   :  { %v1318_v7 = vadd.f32 %v1293_v6, %v2552_v13  ;;  %v1927_v9 = vpop.f32.mrb[21].mxu0  ;;  %v1300_v16 = vrot.slane %v1293_v6, 4  ;;  %v1301_v17 = vrot.slane %v1293_v6, 5 }
0x10ae   :  { %v1296_v11 = vpop.f32.mrb[22].mxu0 }
0x10af   :  { %v1928_v12 = vpop.f32.mrb[23].mxu0  ;;  %v1321_v14 = vrot.slane %v1318_v7, 5  ;;  %v1320_v15 = vrot.slane %v1318_v7, 4  ;;  %v1304_v18 = vadd.f32 %v1300_v16, %v2560_v24  ;;  %v1305_v19 = vadd.f32 %v1301_v17, %v2557_v22 }
0x10b1   :  { %1324 = vrot.lane.b32.xlu0 %v1321_v14, %s2288_s4  ;;  %1322 = vrot.lane.b32.xlu1 %v1320_v15, %s2288_s4  ;;  %v1792_v20 = vmul.f32 -1.442695, %v1304_v18  ;;  %v1793_v21 = vmul.f32 -1.442695, %v1305_v19 }
0x10b3   :  { %2040 = vpow2.f32 %v1792_v20 }
0x10b4   :  { %2042 = vpow2.f32 %v1793_v21 }
0x10bd   :  { %v2041_v23 = vpop.eup %2040 }
0x10be   :  { %v2043_v25 = vpop.eup %2042  ;;  %v1312_v26 = vadd.f32 1.0, %v2041_v23 }
0x10bf   :  { %v1313_v27 = vadd.f32 1.0, %v2043_v25 }
0x10c0   :  { %2044 = vrcp.f32 %v1312_v26 }
0x10c1   :  { %2046 = vrcp.f32 %v1313_v27 }
0x10ca   :  { %v2045_v28 = vpop.eup %2044 }
0x10cb   :  { %v2047_v29 = vpop.eup %2046  ;;  %v1342_v43 = vsub.f32 1.0, %v2045_v28  ;;  %v1360_v49 = vmul.f32 %v2045_v28, %v1356_v44 }
0x10cc   :  { %v1343_v40 = vsub.f32 1.0, %v2047_v29  ;;  %v1361_v45 = vmul.f32 %v2047_v29, %v1357_v41 }
0x1123   :  { %v1325_v30 = vpop.permute.xlu0 %1324  ;;  %v1323_v31 = vpop.permute.xlu1 %1322 }
0x1124   :  { %v1329_v32 = vmul.f32 %v2047_v29, %v1325_v30  ;;  %v1328_v33 = vmul.f32 %v2045_v28, %v1323_v31 }
0x1126   :  { %1334 = vrot.lane.b32.xlu0 %v1329_v32, %s2289_s2  ;;  %1332 = vrot.lane.b32.xlu1 %v1328_v33, %s2289_s2 }
0x1198   :  { %v1335_v34 = vpop.permute.xlu0 %1334  ;;  %v1333_v35 = vpop.permute.xlu1 %1332 }
0x1199   :  { %v1339_v36 = vadd.f32 %v1335_v34, %v2557_v22  ;;  %v1338_v37 = vadd.f32 %v1333_v35, %v2560_v24 }
0x119b   :  { %2048 = vtanh.f32 %v1339_v36 }
0x119c   :  { %2050 = vtanh.f32 %v1338_v37 }
0x11a5   :  { %v2049_v38 = vpop.eup %2048 }
0x11a6   :  { %v2051_v39 = vpop.eup %2050  ;;  %1348 = vrot.lane.b32.xlu0 %v2049_v38, %s2287_s3 }
0x11a7   :  { %1346 = vrot.lane.b32.xlu1 %v2051_v39, %s2287_s3 }
0x1218   :  { %v1349_v42 = vpop.permute.xlu0 %1348 }
0x1219   :  { %v1353_v46 = vmul.f32 %v1349_v42, %v1343_v40  ;;  %v1347_v47 = vpop.permute.xlu1 %1346 }
0x121a   :  { %v1352_v50 = vmul.f32 %v1347_v47, %v1342_v43 }
0x121b   :  { %v2707_v51 = vadd.f32 %v1361_v45, %v1353_v46 }
0x121c   :  { %v2709_v54 = vadd.f32 %v1360_v49, %v1352_v50 }
0x121d   :  { %v1368_v59 = vpack.c.bf16 %v2707_v51, %v2707_v51  ;;  %v1480_v40 = vrot.slane %v2707_v51, 7 }
0x121e   :  { %v1367_v60 = vpack.c.bf16 %v2709_v54, %v2709_v54  ;;  %v1479_v43 = vrot.slane %v2709_v54, 7 }
0x121f   :  { %v1372_v62 = vunpack.c.l.b16 %v1368_v59 }
0x1220   :  { %v1371_v1 = vunpack.c.l.b16 %v1367_v60 }
0x1221   :  { %v1374_v2 = vrot.slane %v1372_v62, 3 }
0x1222   :  { %v1373_v3 = vrot.slane %v1371_v1, 4 }
0x1224   :  { %v1375_v4 = vsel %vm885_vm4, %v1374_v2, %v1373_v3 }
0x1225   :  { %v1376_v5 = vpack.c.b16 %v1375_v4, %v1375_v4 }
0x1227   :  { %1377 = vrot.lane.b32.xlu1 %v1376_v5, %s2287_s3 }
0x1299   :  { %v1378_v6 = vpop.permute.xlu1 %1377 }
0x129a   :  { %1932 = vmatmul.mubr.msk.bf16.vlgmr.msra.gmra.mrb[28].mxu1 %vm163_vm1, %v1378_v6 }
0x129b   :  { %1942 = vmatpush3.bf16.msra.mxu1 %v2539_v63  ;;  %1943 = vmatprep.mubr.msk.bf16.mxu1 %vm2286_vm0, %v2285_v0 }
0x136d   :  { %v1416_v7 = vpop.f32.mrb[28].mxu1 }
0x136e   :  { %v1441_v9 = vadd.f32 %v1416_v7, %v2552_v13  ;;  %v1933_v11 = vpop.f32.mrb[29].mxu1  ;;  %v1423_v17 = vrot.slane %v1416_v7, 3  ;;  %v1424_v18 = vrot.slane %v1416_v7, 4 }
0x136f   :  { %v1419_v12 = vpop.f32.mrb[30].mxu1 }
0x1370   :  { %v1934_v14 = vpop.f32.mrb[31].mxu1  ;;  %v1444_v15 = vrot.slane %v1441_v9, 4  ;;  %v1443_v16 = vrot.slane %v1441_v9, 3  ;;  %v1427_v19 = vadd.f32 %v1423_v17, %v2560_v24  ;;  %v1428_v63 = vadd.f32 %v1424_v18, %v2557_v22 }
0x1372   :  { %1447 = vrot.lane.b32.xlu1 %v1444_v15, %s2288_s4  ;;  %1445 = vrot.lane.b32.xlu0 %v1443_v16, %s2288_s4  ;;  %v1795_v20 = vmul.f32 -1.442695, %v1427_v19  ;;  %v1796_v0 = vmul.f32 -1.442695, %v1428_v63 }
0x1374   :  { %2052 = vpow2.f32 %v1795_v20 }
0x1375   :  { %2054 = vpow2.f32 %v1796_v0 }
0x137e   :  { %v2053_v21 = vpop.eup %2052 }
0x137f   :  { %v2055_v23 = vpop.eup %2054  ;;  %v1435_v25 = vadd.f32 1.0, %v2053_v21 }
0x1380   :  { %v1436_v26 = vadd.f32 1.0, %v2055_v23 }
0x1381   :  { %2056 = vrcp.f32 %v1435_v25 }
0x1382   :  { %2058 = vrcp.f32 %v1436_v26 }
0x138b   :  { %v2057_v27 = vpop.eup %2056 }
0x138c   :  { %v2059_v28 = vpop.eup %2058  ;;  %v1465_v42 = vsub.f32 1.0, %v2057_v27  ;;  %v1483_v47 = vmul.f32 %v2057_v27, %v1479_v43 }
0x138d   :  { %v1466_v39 = vsub.f32 1.0, %v2059_v28  ;;  %v1484_v44 = vmul.f32 %v2059_v28, %v1480_v40 }
0x13e4   :  { %v1448_v29 = vpop.permute.xlu1 %1447  ;;  %v1446_v30 = vpop.permute.xlu0 %1445 }
0x13e5   :  { %v1452_v31 = vmul.f32 %v2059_v28, %v1448_v29  ;;  %v1451_v32 = vmul.f32 %v2057_v27, %v1446_v30 }
0x13e7   :  { %1457 = vrot.lane.b32.xlu1 %v1452_v31, %s2289_s2  ;;  %1455 = vrot.lane.b32.xlu0 %v1451_v32, %s2289_s2 }
0x1459   :  { %v1458_v33 = vpop.permute.xlu1 %1457  ;;  %v1456_v34 = vpop.permute.xlu0 %1455 }
0x145a   :  { %v1462_v35 = vadd.f32 %v1458_v33, %v2557_v22  ;;  %v1461_v36 = vadd.f32 %v1456_v34, %v2560_v24 }
0x145c   :  { %2060 = vtanh.f32 %v1462_v35 }
0x145d   :  { %2062 = vtanh.f32 %v1461_v36 }
0x1466   :  { %v2061_v37 = vpop.eup %2060 }
0x1467   :  { %v2063_v38 = vpop.eup %2062  ;;  %1471 = vrot.lane.b32.xlu1 %v2061_v37, %s2287_s3 }
0x1468   :  { %1469 = vrot.lane.b32.xlu0 %v2063_v38, %s2287_s3 }
0x14d9   :  { %v1472_v41 = vpop.permute.xlu1 %1471 }
0x14da   :  { %v1476_v45 = vmul.f32 %v1472_v41, %v1466_v39  ;;  %v1470_v46 = vpop.permute.xlu0 %1469 }
0x14db   :  { %v1475_v49 = vmul.f32 %v1470_v46, %v1465_v42 }
0x14dc   :  { %v2734_v50 = vadd.f32 %v1484_v44, %v1476_v45 }
0x14dd   :  { %v2736_v59 = vadd.f32 %v1483_v47, %v1475_v49 }
0x14de   :  { %v1491_v60 = vpack.c.bf16 %v2734_v50, %v2734_v50  ;;  %v1603_v41 = vrot.slane %v2734_v50, 7 }
0x14df   :  { %v1490_v62 = vpack.c.bf16 %v2736_v59, %v2736_v59  ;;  %v1602_v44 = vrot.slane %v2736_v59, 7 }
0x14e0   :  { %v1495_v1 = vunpack.c.l.b16 %v1491_v60 }
0x14e1   :  { %v1494_v2 = vunpack.c.l.b16 %v1490_v62 }
0x14e2   :  { %v1497_v3 = vrot.slane %v1495_v1, 4 }
0x14e3   :  { %v1496_v4 = vrot.slane %v1494_v2, 5 }
0x14e5   :  { %v1498_v5 = vsel %vm885_vm4, %v1497_v3, %v1496_v4 }
0x14e6   :  { %v1499_v6 = vpack.c.b16 %v1498_v5, %v1498_v5 }
0x14e8   :  { %1500 = vrot.lane.b32.xlu0 %v1499_v6, %s2287_s3 }
0x155a   :  { %v1501_v7 = vpop.permute.xlu0 %1500 }
0x155b   :  { %1938 = vmatmul.mubr.msk.bf16.vlgmr.msra.gmra.mrb[24].mxu0 %vm163_vm1, %v1501_v7 }
0x162e   :  { %v1539_v9 = vpop.f32.mrb[24].mxu0 }
0x162f   :  { %v1564_v11 = vadd.f32 %v1539_v9, %v2552_v13  ;;  %v1939_v12 = vpop.f32.mrb[25].mxu0  ;;  %v1546_v18 = vrot.slane %v1539_v9, 2  ;;  %v1547_v19 = vrot.slane %v1539_v9, 3 }
0x1630   :  { %v1542_v14 = vpop.f32.mrb[26].mxu0 }
0x1631   :  { %v1940_v15 = vpop.f32.mrb[27].mxu0  ;;  %v1567_v16 = vrot.slane %v1564_v11, 3  ;;  %v1566_v17 = vrot.slane %v1564_v11, 2  ;;  %v1550_v63 = vadd.f32 %v1546_v18, %v2560_v24  ;;  %v1551_v20 = vadd.f32 %v1547_v19, %v2557_v22 }
0x1633   :  { %1570 = vrot.lane.b32.xlu0 %v1567_v16, %s2288_s4  ;;  %1568 = vrot.lane.b32.xlu1 %v1566_v17, %s2288_s4  ;;  %v1798_v0 = vmul.f32 -1.442695, %v1550_v63  ;;  %v1799_v21 = vmul.f32 -1.442695, %v1551_v20 }
0x1635   :  { %2064 = vpow2.f32 %v1798_v0 }
0x1636   :  { %2066 = vpow2.f32 %v1799_v21 }
0x163f   :  { %v2065_v23 = vpop.eup %2064 }
0x1640   :  { %v2067_v25 = vpop.eup %2066  ;;  %v1558_v26 = vadd.f32 1.0, %v2065_v23 }
0x1641   :  { %v1559_v27 = vadd.f32 1.0, %v2067_v25 }
0x1642   :  { %2068 = vrcp.f32 %v1558_v26 }
0x1643   :  { %2070 = vrcp.f32 %v1559_v27 }
0x164c   :  { %v2069_v28 = vpop.eup %2068 }
0x164d   :  { %v2071_v29 = vpop.eup %2070  ;;  %v1588_v43 = vsub.f32 1.0, %v2069_v28  ;;  %v1606_v49 = vmul.f32 %v2069_v28, %v1602_v44 }
0x164e   :  { %v1589_v40 = vsub.f32 1.0, %v2071_v29  ;;  %v1607_v45 = vmul.f32 %v2071_v29, %v1603_v41  ;;  %v1771_v41 = vld [vmem:[%s2857_s14] ss:$0 sm:$0xff]  ;;  %s2291_s14 = smov [#allocation14]  }
0x164f   :  { %v670_v44 = vadd.f32 %v1771_v41, %v2631_v8  ;;  %s1741_s18 = sshll.u32 %s2291_s14, 4  ;;  %s2790_s18 = int_to_ptr.vmem [resolvable:$true] %s1741_s18 }
0x1650   :  { %s2242_s21 = scalar_lea.vmem %s2790_s18, 256  ;;  %p2247_p1 = scmp.lt.s32.totalorder %s2790_s18, %s2790_s18 }
0x1651   :  { %p2243_p0 = scmp.ne.s32.totalorder %s2790_s18, %s2242_s21  ;;  %p2248_p2 = scmp.lt.s32.totalorder %s2242_s21, %s2242_s21 }
0x1653   :  { %p2249_p3 = por %p2248_p2, %p2247_p1 }
0x1655   :  { %p2250_p4 = pnand %p2249_p3, %p2243_p0 }
0x16a5   :  { %v1571_v30 = vpop.permute.xlu0 %1570  ;;  %v1569_v31 = vpop.permute.xlu1 %1568 }
0x16a6   :  { %v1575_v32 = vmul.f32 %v2071_v29, %v1571_v30  ;;  %v1574_v33 = vmul.f32 %v2069_v28, %v1569_v31 }
0x16a8   :  { %1580 = vrot.lane.b32.xlu0 %v1575_v32, %s2289_s2  ;;  %1578 = vrot.lane.b32.xlu1 %v1574_v33, %s2289_s2 }
0x171a   :  { %v1581_v34 = vpop.permute.xlu0 %1580  ;;  %v1579_v35 = vpop.permute.xlu1 %1578 }
0x171b   :  { %v1585_v36 = vadd.f32 %v1581_v34, %v2557_v22  ;;  %v1584_v37 = vadd.f32 %v1579_v35, %v2560_v24 }
0x171d   :  { %2072 = vtanh.f32 %v1585_v36 }
0x171e   :  { %2074 = vtanh.f32 %v1584_v37 }
0x1727   :  { %v2073_v38 = vpop.eup %2072 }
0x1728   :  { %v2075_v39 = vpop.eup %2074  ;;  %1594 = vrot.lane.b32.xlu0 %v2073_v38, %s2287_s3 }
0x1729   :  { %1592 = vrot.lane.b32.xlu1 %v2075_v39, %s2287_s3 }
0x179a   :  { %v1595_v42 = vpop.permute.xlu0 %1594 }
0x179b   :  { %v1599_v46 = vmul.f32 %v1595_v42, %v1589_v40  ;;  %v1593_v47 = vpop.permute.xlu1 %1592 }
0x179c   :  { %v1598_v60 = vmul.f32 %v1593_v47, %v1588_v43  ;;  %v673_v43 = vadd.f32 %v1771_v41, %v2636_v10 }
0x179d   :  { %v2758_v62 = vadd.f32 %v1607_v45, %v1599_v46 }
0x179e   :  { %v2760_v1 = vadd.f32 %v1606_v49, %v1598_v60 }
0x179f   :  { %v1614_v2 = vpack.c.bf16 %v2758_v62, %v2758_v62 }
0x17a0   :  { %v1613_v3 = vpack.c.bf16 %v2760_v1, %v2760_v1 }
0x17a1   :  { %v1618_v4 = vunpack.c.l.b16 %v1614_v2 }
0x17a2   :  { %v1617_v5 = vunpack.c.l.b16 %v1613_v3 }
0x17a3   :  { %v1620_v6 = vrot.slane %v1618_v4, 5 }
0x17a4   :  { %v1619_v7 = vrot.slane %v1617_v5, 6 }
0x17a6   :  { %v1621_v9 = vsel %vm885_vm4, %v1620_v6, %v1619_v7 }
0x17a7   :  { %v1622_v11 = vpack.c.b16 %v1621_v9, %v1621_v9 }
0x17a9   :  { %1623 = vrot.lane.b32.xlu1 %v1622_v11, %s2287_s3 }
0x181b   :  { %v1624_v12 = vpop.permute.xlu1 %1623 }
0x181c   :  { %1944 = vmatmul.mubr.msk.bf16.vlgmr.msra.gmra.mrb[32].mxu1 %vm163_vm1, %v1624_v12 }
0x18ef   :  { %v1662_v14 = vpop.f32.mrb[32].mxu1 }
0x18f0   :  { %v1687_v15 = vadd.f32 %v1662_v14, %v2552_v13  ;;  %v1945_v16 = vpop.f32.mrb[33].mxu1  ;;  %v1669_v20 = vrot.slane %v1662_v14, 1  ;;  %v1670_v0 = vrot.slane %v1662_v14, 2 }
0x18f1   :  { %v1665_v17 = vpop.f32.mrb[34].mxu1 }
0x18f2   :  { %v1946_v18 = vpop.f32.mrb[35].mxu1  ;;  %v1690_v19 = vrot.slane %v1687_v15, 2  ;;  %v1689_v63 = vrot.slane %v1687_v15, 1  ;;  %v1673_v21 = vadd.f32 %v1669_v20, %v2560_v24  ;;  %v1674_v23 = vadd.f32 %v1670_v0, %v2557_v22 }
0x18f4   :  { %1693 = vrot.lane.b32.xlu1 %v1690_v19, %s2288_s4  ;;  %1691 = vrot.lane.b32.xlu0 %v1689_v63, %s2288_s4  ;;  %v1801_v25 = vmul.f32 -1.442695, %v1673_v21  ;;  %v1802_v26 = vmul.f32 -1.442695, %v1674_v23 }
0x18f6   :  { %2076 = vpow2.f32 %v1801_v25 }
0x18f7   :  { %2078 = vpow2.f32 %v1802_v26 }
0x1900   :  { %v2077_v13 = vpop.eup %2076 }
0x1901   :  { %v2079_v27 = vpop.eup %2078  ;;  %v1681_v28 = vadd.f32 1.0, %v2077_v13 }
0x1902   :  { %v1682_v29 = vadd.f32 1.0, %v2079_v27 }
0x1903   :  { %2080 = vrcp.f32 %v1681_v28 }
0x1904   :  { %2082 = vrcp.f32 %v1682_v29 }
0x190d   :  { %v2081_v30 = vpop.eup %2080 }
0x190e   :  { %v2083_v31 = vpop.eup %2082  ;;  %v1711_v49 = vsub.f32 1.0, %v2081_v30 }
0x190f   :  { %v1712_v45 = vsub.f32 1.0, %v2083_v31 }
0x1966   :  { %v1694_v32 = vpop.permute.xlu1 %1693  ;;  %v1692_v33 = vpop.permute.xlu0 %1691 }
0x1967   :  { %v1698_v34 = vmul.f32 %v2083_v31, %v1694_v32  ;;  %v1697_v35 = vmul.f32 %v2081_v30, %v1692_v33 }
0x1969   :  { %1703 = vrot.lane.b32.xlu1 %v1698_v34, %s2289_s2  ;;  %1701 = vrot.lane.b32.xlu0 %v1697_v35, %s2289_s2 }
0x19db   :  { %v1704_v36 = vpop.permute.xlu1 %1703  ;;  %v1702_v37 = vpop.permute.xlu0 %1701 }
0x19dc   :  { %v1708_v38 = vadd.f32 %v1704_v36, %v2557_v22  ;;  %v1707_v39 = vadd.f32 %v1702_v37, %v2560_v24  ;;  %v1726_v22 = vrot.slane %v2758_v62, 7  ;;  %v1725_v24 = vrot.slane %v2760_v1, 7 }
0x19de   :  { %2084 = vtanh.f32 %v1708_v38  ;;  %v1730_v46 = vmul.f32 %v2083_v31, %v1726_v22  ;;  %v1729_v60 = vmul.f32 %v2081_v30, %v1725_v24 }
0x19df   :  { %2086 = vtanh.f32 %v1707_v39 }
0x19e8   :  { %v2085_v40 = vpop.eup %2084 }
0x19e9   :  { %v2087_v42 = vpop.eup %2086  ;;  %1717 = vrot.lane.b32.xlu1 %v2085_v40, %s2287_s3 }
0x19ea   :  { %1715 = vrot.lane.b32.xlu0 %v2087_v42, %s2287_s3 }
0x19ed   :  { %682 = vrot.lane.b32.xlu1 %v673_v43, %s2289_s2 }
0x19ee   :  { %680 = vrot.lane.b32.xlu0 %v670_v44, %s2289_s2 }
0x1a5b   :  { %v1718_v47 = vpop.permute.xlu1 %1717 }
0x1a5c   :  { %v1722_v2 = vmul.f32 %v1718_v47, %v1712_v45  ;;  %v1716_v3 = vpop.permute.xlu0 %1715 }
0x1a5d   :  { %v1721_v10 = vmul.f32 %v1716_v3, %v1711_v49 }
0x1a5e   :  { %v1732_v8 = vadd.f32 %v1730_v46, %v1722_v2 }
0x1a5f   :  { %v1731_v4 = vadd.f32 %v1729_v60, %v1721_v10  ;;  %v683_v5 = vpop.permute.xlu1 %682 }
0x1a60   :  { %688 = vst.msk [vmem:[#allocation14 + $0x8] sm:$0xff] %vm686_vm7, %v683_v5  ;;  %v681_v6 = vpop.permute.xlu0 %680 }
0x1a61   :  { %877 = vst.msk [vmem:[#allocation14 + $0x8] sm:$0x1] %vm875_vm8, %v2569_v48 }
0x1a62   :  { %998 = vst.msk [vmem:[#allocation14 + $0x8] sm:$0x2] %vm996_vm9, %v2620_v58 }
0x1a63   :  { %1120 = vst.msk [vmem:[#allocation14 + $0x8] sm:$0x4] %vm1118_vm10, %v2652_v56 }
0x1a64   :  { %1243 = vst.msk [vmem:[#allocation14 + $0x8] sm:$0x8] %vm1241_vm11, %v2680_v52 }
0x1a65   :  { %1366 = vst.msk [vmem:[#allocation14 + $0x8] sm:$0x10] %vm1364_vm12, %v2707_v51 }
0x1a66   :  { %1489 = vst.msk [vmem:[#allocation14 + $0x8] sm:$0x20] %vm1487_vm13, %v2734_v50 }
0x1a67   :  { %1612 = vst.msk [vmem:[#allocation14 + $0x8] sm:$0x40] %vm1610_vm14, %v2758_v62 }
0x1a68   :  { %1735 = vst.msk [vmem:[#allocation14 + $0x8] sm:$0x80] %vm1733_vm15, %v1732_v8 }
0x1a69   :  { %687 = vst.msk [vmem:[#allocation14] sm:$0xff] %vm686_vm7, %v681_v6 }
0x1a6a   :  { %876 = vst.msk [vmem:[#allocation14] sm:$0x1] %vm875_vm8, %v2573_v55 }
0x1a6b   :  { %997 = vst.msk [vmem:[#allocation14] sm:$0x2] %vm996_vm9, %v2622_v61 }
0x1a6c   :  { %1119 = vst.msk [vmem:[#allocation14] sm:$0x4] %vm1118_vm10, %v2654_v57 }
0x1a6d   :  { %1242 = vst.msk [vmem:[#allocation14] sm:$0x8] %vm1241_vm11, %v2682_v53 }
0x1a6e   :  { %1365 = vst.msk [vmem:[#allocation14] sm:$0x10] %vm1364_vm12, %v2709_v54 }
0x1a6f   :  { %1488 = vst.msk [vmem:[#allocation14] sm:$0x20] %vm1487_vm13, %v2736_v59 }
0x1a70   :  { %1611 = vst.msk [vmem:[#allocation14] sm:$0x40] %vm1610_vm14, %v2760_v1 }
0x1a71   :  { %1734 = vst.msk [vmem:[#allocation14] sm:$0x80] %vm1733_vm15, %v1731_v4 }
0x1a72   :  { %2253 = shalt.err (!%p2250_p4)
}
0x1a73   :  { %s2254_s17 = scalar_lea.hbm %s2858_s15, 256 }
0x1a74   :  { %p2255_p5 = scmp.ne.s32.totalorder %s2858_s15, %s2254_s17  ;;  %p2258_p6 = scmp.lt.u32.totalorder %s2254_s17, %s2858_s15 }
0x1a76   :  { %p2260_p7 = pnand %p2258_p6, %p2255_p5 }
0x1a78   :  { %2263 = shalt.err (!%p2260_p7)
}
0x1a79   :  { %1747 = dma.vmem_to_hbm [thread:$0]  %s2790_s18, 256, %s2858_s15, [#allocation4], %s2281_s0, %s2281_s0, %s2282_s22  }
0x1a7a   :  { %2272 = dma.done.wait [#allocation4], 256  }
0x1a7b   :  { %2273 = vsyncadd [#allocation4], 4294967040 }
0x1a7c   :  { %1751 = vsyncpa [#allocation3], 1 }
0x1a7d   :  { %1752 = vsyncpa [#allocation6], 1 }
0x1a7e   :  { %1753 = vsyncpa [#allocation9], 1 }
0x1a7f   :  { %1754 = vsyncpa [#allocation12], 1 }
0x1a80   :  { %1755 = vsyncpa [#allocation4], 1 }

</bundles_post_ra>
